<compile_context>
chip_gen: v5e
topology: v5e:2x2
jax: 0.10.0
libtpu: 0.0.40
codegen_flags: <defaults>
</compile_context>

<pallas_src>
import numpy as np

import jax
import jax.numpy as jnp
from jax import lax
from jax.experimental import pallas as pl
from jax.experimental.pallas import tpu as pltpu

HIDDEN = 128
ACTION_DIM = 3
LOWDIM_DIM = 9
ENC_DIM = 8 + 4 + 4 + 2                 # encoder feature width (lowdim|delta|target|time)
ENC_IN_DIM = LOWDIM_DIM + 3 + 3 + 1     # 16
AUX_DIM = 1 + ACTION_DIM                # [distance | action]
HEAD_PAD = 128                          # lane-dense head block [action(3)|q(1)|value(1)|0...]
POOL = 3
CNN_COUT = 32
_BN_EPS = 1e-5
_LN_EPS = 1e-5

_WKEYS_A = ("s1", "m1", "b1", "s2", "m2", "b2", "s3", "m3", "b3",
            "prow", "pcol", "wf", "enc_w1", "enc_b1", "enc_w2", "enc_b2")
_WKEYS_B = ("w_cell_enc", "w_cell_aux", "w_cell_h", "b_cell", "inv_tau",
            "ln_g", "ln_b", "w_head1", "b_head1", "w_head2", "b_head2")


# ----------------------------------------------------------------------------
# The single fused kernel.  Grid = (B,), one image per step ("parallel").
# Weight operands use constant index maps, so they are DMA'd to VMEM once and
# stay resident across the whole grid (~0.8 MB bf16, well under every gen's
# scoped VMEM default).
# ----------------------------------------------------------------------------
def _forward_kernel(*refs):
    (x_ref, enc_ref, aux_ref, h_ref,
     s1, m1, b1, s2, m2, b2, s3, m3, b3,
     prow, pcol, wf,
     ew1, eb1, ew2, eb2, emask,
     wce, wca, wch, bc, itau, lng, lnb,
     wh1, bh1, wh2, bh2,
     hnew_ref, heads_ref) = refs

    f32 = jnp.float32
    bf16 = jnp.bfloat16

    def conv_layer(a, s_ref, m_ref, b_ref):
        # a: (Hi, Wi*Cin) bf16.  out = relu(sum_ki (S_ki @ a) @ M_ki + bias)
        out = None
        for ki in range(s_ref.shape[0]):                       # static unroll (<=5)
            rows = jnp.dot(s_ref[ki], a, preferred_element_type=f32)
            term = jnp.dot(rows.astype(bf16), m_ref[ki],
                           preferred_element_type=f32)
            out = term if out is None else out + term
        return jnp.maximum(out + b_ref[...], 0.0)

    # ---- CNN (BN scale folded into weights, shift as bias, ReLU) ----
    a0 = x_ref[0]                                              # (H, W*C) bf16
    a1 = conv_layer(a0, s1, m1, b1).astype(bf16)               # (12, 12*16)
    a2 = conv_layer(a1, s2, m2, b2).astype(bf16)               # (6,  6*32)
    a3 = conv_layer(a2, s3, m3, b3).astype(bf16)               # (3,  3*32)
    # AdaptiveAvgPool2d((3,3)) as two matmuls (identity when already 3x3).
    pooled = jnp.dot(
        jnp.dot(prow[...], a3, preferred_element_type=f32).astype(bf16),
        pcol[...], preferred_element_type=f32).astype(bf16)    # (3, 96)

    # ---- LNN pre-activation, feature part (torch channel-major flatten is
    #      baked into the row permutation of wf at init) ----
    pre = bc[...]                                              # (1, 128) f32
    for hh in range(pooled.shape[0]):                          # static unroll (3)
        pre = pre + jnp.dot(pooled[hh:hh + 1, :], wf[hh],
                            preferred_element_type=f32)

    # ---- four encoder MLPs fused via block-diagonal weights + None mask ----
    enc_in = enc_ref[0].astype(bf16)                           # (1, 16)
    e1 = jnp.maximum(
        jnp.dot(enc_in, ew1[...], preferred_element_type=f32) + eb1[...], 0.0)
    enc_out = (jnp.dot(e1.astype(bf16), ew2[...], preferred_element_type=f32)
               + eb2[...]) * emask[...]                        # (1, 18)

    # ---- liquid time-constant cell ----
    h = h_ref[0]                                               # (1, 128) f32
    pre = (pre
           + jnp.dot(enc_out.astype(bf16), wce[...], preferred_element_type=f32)
           + jnp.dot(aux_ref[0].astype(bf16), wca[...], preferred_element_type=f32)
           + jnp.dot(h.astype(bf16), wch[...], preferred_element_type=f32))
    dh = jnp.tanh(pre)
    h_new = h + (dh - h) * itau[...]                           # precomputed 1/tau
    hnew_ref[0] = h_new.astype(hnew_ref.dtype)

    # ---- LayerNorm(128) ----
    mu = jnp.mean(h_new, axis=-1, keepdims=True)
    var = jnp.mean((h_new - mu) ** 2, axis=-1, keepdims=True)
    y = (h_new - mu) * lax.rsqrt(var + _LN_EPS) * lng[...] + lnb[...]

    # ---- heads: fused first layers (128->192), block-diagonal second layers
    #      into one lane-dense (1,128) block [action|q|value|zeros] ----
    y1 = jnp.maximum(
        jnp.dot(y.astype(bf16), wh1[...], preferred_element_type=f32) + bh1[...], 0.0)
    raw = jnp.dot(y1.astype(bf16), wh2[...], preferred_element_type=f32) + bh2[...]
    col = lax.broadcasted_iota(jnp.int32, raw.shape, 1)
    heads_ref[0] = jnp.where(col < ACTION_DIM, jnp.tanh(raw), raw).astype(heads_ref.dtype)


def _full_block(arr):
    nd = arr.ndim
    return pl.BlockSpec(arr.shape, lambda b, _nd=nd: (0,) * _nd)


# ----------------------------------------------------------------------------
# Wrapper: input prep (one small NCHW->NHWC transpose + bf16 cast of the image,
# concatenation of the tiny scalar inputs) and the single pallas_call.
# ----------------------------------------------------------------------------
def vision_lnn_forward(params, state, action=None, lowdim=None, delta_pos=None,
                       target_pos=None, elapsed_time=None, distance=None,
                       h_prev=None):
    B, C, H, W = state.shape
    # NCHW -> rows=H, lanes=W*C (pure reshape after one small transpose), bf16 once.
    x2d = jnp.transpose(state.astype(jnp.float32), (0, 2, 3, 1)
                        ).reshape(B, H, W * C).astype(jnp.bfloat16)

    # Encoder inputs + None handling: zero the encoder *output* segments of
    # missing modalities (matches the torch forward) via a constant mask.
    segs = [(lowdim, LOWDIM_DIM, 0, 8), (delta_pos, 3, 8, 12),
            (target_pos, 3, 12, 16), (elapsed_time, 1, 16, 18)]
    enc_parts = []
    mask = np.ones((1, ENC_DIM), np.float32)
    for v, dim, lo, hi in segs:
        if v is None:
            v = jnp.zeros((B, dim), jnp.float32)
            mask[0, lo:hi] = 0.0
        enc_parts.append(v.reshape(B, dim).astype(jnp.float32))
    enc_in = jnp.concatenate(enc_parts, axis=1).reshape(B, 1, ENC_IN_DIM)
    enc_mask = jnp.asarray(mask)

    if distance is None:
        distance = jnp.zeros((B, 1), jnp.float32)
    if action is None:
        action = jnp.zeros((B, ACTION_DIM), jnp.float32)
    aux = jnp.concatenate([distance.reshape(B, 1).astype(jnp.float32),
                           action.reshape(B, ACTION_DIM).astype(jnp.float32)],
                          axis=1).reshape(B, 1, AUX_DIM)

    if h_prev is None:
        h_prev = jnp.zeros((B, HIDDEN), jnp.float32)
    h_prev = h_prev.reshape(B, 1, HIDDEN).astype(jnp.float32)

    weight_args = ([params[k] for k in _WKEYS_A] + [enc_mask]
                   + [params[k] for k in _WKEYS_B])

    batch_specs = [
        pl.BlockSpec((1, H, W * C), lambda b: (b, 0, 0)),
        pl.BlockSpec((1, 1, ENC_IN_DIM), lambda b: (b, 0, 0)),
        pl.BlockSpec((1, 1, AUX_DIM), lambda b: (b, 0, 0)),
        pl.BlockSpec((1, 1, HIDDEN), lambda b: (b, 0, 0)),
    ]
    h_new, heads = pl.pallas_call(
        _forward_kernel,
        out_shape=(jax.ShapeDtypeStruct((B, 1, HIDDEN), jnp.float32),
                   jax.ShapeDtypeStruct((B, 1, HEAD_PAD), jnp.float32)),
        grid=(B,),
        in_specs=batch_specs + [_full_block(a) for a in weight_args],
        out_specs=(pl.BlockSpec((1, 1, HIDDEN), lambda b: (b, 0, 0)),
                   pl.BlockSpec((1, 1, HEAD_PAD), lambda b: (b, 0, 0))),
        compiler_params=pltpu.CompilerParams(dimension_semantics=("parallel",)),
    )(x2d, enc_in, aux, h_prev, *weight_args)

    h_new = h_new.reshape(B, HIDDEN)
    heads = heads.reshape(B, HEAD_PAD)
    out = {"action": heads[:, :ACTION_DIM],
           "q": heads[:, ACTION_DIM:ACTION_DIM + 1],
           "value": heads[:, ACTION_DIM + 1:ACTION_DIM + 2]}
    return out, h_new


# ----------------------------------------------------------------------------
# Deterministic synthetic parameter init (shapes from the module __init__) with
# all the kernel-side preprocessing baked in: stride/padding selection matrices,
# BN scale folding, block-diagonal encoder/head fusion, flatten permutation,
# bf16 weight storage and 1/tau precomputation.
# ----------------------------------------------------------------------------
def init_params(seed=0, input_shape=(3, 24, 24), action_dim=ACTION_DIM,
                lowdim_dim=LOWDIM_DIM):
    rng = np.random.default_rng(seed)

    def dense(fan_in, fan_out):
        w = rng.standard_normal((fan_in, fan_out)).astype(np.float32) / np.sqrt(fan_in)
        b = (0.01 * rng.standard_normal((fan_out,))).astype(np.float32)
        return w, b

    def conv_sm(cin, cout, k, stride, pad, hi, wi):
        # torch conv weight (Cout,Cin,k,k) + bias, eval-mode BN folded.
        w = rng.standard_normal((cout, cin, k, k)).astype(np.float32) / np.sqrt(cin * k * k)
        b = (0.01 * rng.standard_normal((cout,))).astype(np.float32)
        gamma = np.ones(cout, np.float32)
        beta = np.zeros(cout, np.float32)
        mean = np.zeros(cout, np.float32)
        var = np.ones(cout, np.float32)
        scale = gamma / np.sqrt(var + _BN_EPS)
        shift = (b - mean) * scale + beta
        ho = (hi + 2 * pad - k) // stride + 1
        wo = (wi + 2 * pad - k) // stride + 1
        S = np.zeros((k, ho, hi), np.float32)
        M = np.zeros((k, wi * cin, wo * cout), np.float32)
        for ki in range(k):
            for io in range(ho):
                r = stride * io + ki - pad
                if 0 <= r < hi:
                    S[ki, io, r] = 1.0
            for kj in range(k):
                wk = (w[:, :, ki, kj] * scale[:, None]).T       # (cin, cout), BN folded
                for jo in range(wo):
                    win = stride * jo + kj - pad
                    if 0 <= win < wi:
                        M[ki, win * cin:(win + 1) * cin,
                          jo * cout:(jo + 1) * cout] += wk
        bias = np.tile(shift, wo).reshape(1, wo * cout)
        return S, M, bias, ho, wo

    def block_diag(blocks):
        r = sum(b.shape[0] for b in blocks)
        c = sum(b.shape[1] for b in blocks)
        out = np.zeros((r, c), np.float32)
        i = j = 0
        for b in blocks:
            out[i:i + b.shape[0], j:j + b.shape[1]] = b
            i += b.shape[0]
            j += b.shape[1]
        return out

    def pool_mats(hi, wi, ch, oh):
        prow = np.zeros((oh, hi), np.float32)
        pcol = np.zeros((wi * ch, oh * ch), np.float32)
        for i in range(oh):
            a = (i * hi) // oh
            e = -((-(i + 1) * hi) // oh)
            prow[i, a:e] = 1.0 / (e - a)
        for j in range(oh):
            a = (j * wi) // oh
            e = -((-(j + 1) * wi) // oh)
            for ww in range(a, e):
                for cc in range(ch):
                    pcol[ww * ch + cc, j * ch + cc] = 1.0 / (e - a)
        return prow, pcol

    c, h, w = input_shape
    s1, m1, b1, h1, w1 = conv_sm(c, 16, 5, 2, 2, h, w)
    s2, m2, b2, h2, w2 = conv_sm(16, 32, 5, 2, 2, h1, w1)
    s3, m3, b3, h3, w3 = conv_sm(32, CNN_COUT, 3, 2, 1, h2, w2)
    prow, pcol = pool_mats(h3, w3, CNN_COUT, POOL)
    feat_dim = CNN_COUT * POOL * POOL                           # 288

    # four encoder MLPs -> block-diagonal fused 2-layer weights
    ld1, dp1, tp1, et1 = dense(lowdim_dim, 16), dense(3, 8), dense(3, 8), dense(1, 4)
    ld2, dp2, tp2, et2 = dense(16, 8), dense(8, 4), dense(8, 4), dense(4, 2)
    enc_w1 = block_diag([ld1[0], dp1[0], tp1[0], et1[0]])       # (16, 36)
    enc_b1 = np.concatenate([ld1[1], dp1[1], tp1[1], et1[1]]).reshape(1, -1)
    enc_w2 = block_diag([ld2[0], dp2[0], tp2[0], et2[0]])       # (36, 18)
    enc_b2 = np.concatenate([ld2[1], dp2[1], tp2[1], et2[1]]).reshape(1, -1)

    # LNN cell (assumed liquid time-constant form; see module-level TODO)
    lnn_in_dim = feat_dim + ENC_DIM + AUX_DIM                   # 310
    w_in, b_in = dense(lnn_in_dim, HIDDEN)
    w_h, b_h = dense(HIDDEN, HIDDEN)
    tau = np.ones(HIDDEN, np.float32)
    w_feat = w_in[:feat_dim]                                    # torch rows: c*9 + h*3 + w
    # bake the channel-major flatten into the weight: wf[h, w*32+c, :] = w_feat[c*9+h*3+w, :]
    wf = w_feat.reshape(CNN_COUT, POOL, POOL, HIDDEN).transpose(1, 2, 0, 3) \
               .reshape(POOL, POOL * CNN_COUT, HIDDEN)
    w_cell_enc = w_in[feat_dim:feat_dim + ENC_DIM]
    w_cell_aux = w_in[feat_dim + ENC_DIM:]
    b_cell = (b_in + b_h).reshape(1, -1)
    # TODO(synk): clamp / reparametrize tau to match the real LiquidNeuralNetwork.
    inv_tau = (1.0 / tau).reshape(1, -1)

    ln_g = np.ones((1, HIDDEN), np.float32)
    ln_b = np.zeros((1, HIDDEN), np.float32)

    # heads: fuse first layers on the lane axis, second layers block-diagonal
    wa1, ba1 = dense(HIDDEN, 64)
    wq1, bq1 = dense(HIDDEN, 64)
    wv1, bv1 = dense(HIDDEN, 64)
    wa2, ba2 = dense(64, action_dim)
    wq2, bq2 = dense(64, 1)
    wv2, bv2 = dense(64, 1)
    w_head1 = np.concatenate([wa1, wq1, wv1], axis=1)           # (128, 192)
    b_head1 = np.concatenate([ba1, bq1, bv1]).reshape(1, -1)
    w_head2 = np.zeros((192, HEAD_PAD), np.float32)
    w_head2[0:64, 0:action_dim] = wa2
    w_head2[64:128, action_dim:action_dim + 1] = wq2
    w_head2[128:192, action_dim + 1:action_dim + 2] = wv2
    b_head2 = np.zeros((1, HEAD_PAD), np.float32)
    b_head2[0, 0:action_dim] = ba2
    b_head2[0, action_dim] = bq2[0]
    b_head2[0, action_dim + 1] = bv2[0]

    bf = lambda a: jnp.asarray(a, jnp.bfloat16)
    f32 = lambda a: jnp.asarray(a, jnp.float32)
    return {
        "s1": bf(s1), "m1": bf(m1), "b1": f32(b1),
        "s2": bf(s2), "m2": bf(m2), "b2": f32(b2),
        "s3": bf(s3), "m3": bf(m3), "b3": f32(b3),
        "prow": bf(prow), "pcol": bf(pcol),
        "wf": bf(wf),
        "enc_w1": bf(enc_w1), "enc_b1": f32(enc_b1),
        "enc_w2": bf(enc_w2), "enc_b2": f32(enc_b2),
        "w_cell_enc": bf(w_cell_enc), "w_cell_aux": bf(w_cell_aux),
        "w_cell_h": bf(w_h), "b_cell": f32(b_cell), "inv_tau": f32(inv_tau),
        "ln_g": f32(ln_g), "ln_b": f32(ln_b),
        "w_head1": bf(w_head1), "b_head1": f32(b_head1),
        "w_head2": bf(w_head2), "b_head2": f32(b_head2),
    }


if __name__ == "__main__":
    B, C, H, W = 2, 3, 24, 24           # CNN: 24 -> 12 -> 6 -> 3 (3x3 pool is identity)
    params = init_params(seed=0, input_shape=(C, H, W))

    key = jax.random.PRNGKey(0)
    ks = jax.random.split(key, 7)
    state = jax.random.normal(ks[0], (B, C, H, W), jnp.float32)
    action = jax.random.normal(ks[1], (B, ACTION_DIM), jnp.float32)
    lowdim = jax.random.normal(ks[2], (B, LOWDIM_DIM), jnp.float32)
    delta_pos = jax.random.normal(ks[3], (B, 3), jnp.float32)
    target_pos = jax.random.normal(ks[4], (B, 3), jnp.float32)
    elapsed_time = jax.random.uniform(ks[5], (B, 1), jnp.float32)
    distance = jax.random.uniform(ks[6], (B, 1), jnp.float32)

    fwd = jax.jit(vision_lnn_forward)
    out, h_new = fwd(params, state, action, lowdim, delta_pos, target_pos,
                     elapsed_time, distance)
    jax.block_until_ready((out, h_new))

    assert out["action"].shape == (B, ACTION_DIM)
    assert out["q"].shape == (B, 1)
    assert out["value"].shape == (B, 1)
    assert h_new.shape == (B, HIDDEN)
    assert bool(jnp.all(jnp.isfinite(out["action"])))
    assert bool(jnp.all(jnp.isfinite(h_new)))
    print("KERNEL_OK")
</pallas_src>

<mosaic_0001>
module attributes {stable_mosaic.version = 11 : i64} {
  func.func @_forward_kernel(%arg0: i32, %arg1: memref<1x24x72xbf16, #tpu.memory_space<vmem>>, %arg2: memref<1x1x16xf32, #tpu.memory_space<vmem>>, %arg3: memref<1x1x4xf32, #tpu.memory_space<vmem>>, %arg4: memref<1x1x128xf32, #tpu.memory_space<vmem>>, %arg5: memref<5x12x24xbf16, #tpu.memory_space<vmem>>, %arg6: memref<5x72x192xbf16, #tpu.memory_space<vmem>>, %arg7: memref<1x192xf32, #tpu.memory_space<vmem>>, %arg8: memref<5x6x12xbf16, #tpu.memory_space<vmem>>, %arg9: memref<5x192x192xbf16, #tpu.memory_space<vmem>>, %arg10: memref<1x192xf32, #tpu.memory_space<vmem>>, %arg11: memref<3x3x6xbf16, #tpu.memory_space<vmem>>, %arg12: memref<3x192x96xbf16, #tpu.memory_space<vmem>>, %arg13: memref<1x96xf32, #tpu.memory_space<vmem>>, %arg14: memref<3x3xbf16, #tpu.memory_space<vmem>>, %arg15: memref<96x96xbf16, #tpu.memory_space<vmem>>, %arg16: memref<3x96x128xbf16, #tpu.memory_space<vmem>>, %arg17: memref<16x36xbf16, #tpu.memory_space<vmem>>, %arg18: memref<1x36xf32, #tpu.memory_space<vmem>>, %arg19: memref<36x18xbf16, #tpu.memory_space<vmem>>, %arg20: memref<1x18xf32, #tpu.memory_space<vmem>>, %arg21: memref<1x18xf32, #tpu.memory_space<vmem>>, %arg22: memref<18x128xbf16, #tpu.memory_space<vmem>>, %arg23: memref<4x128xbf16, #tpu.memory_space<vmem>>, %arg24: memref<128x128xbf16, #tpu.memory_space<vmem>>, %arg25: memref<1x128xf32, #tpu.memory_space<vmem>>, %arg26: memref<1x128xf32, #tpu.memory_space<vmem>>, %arg27: memref<1x128xf32, #tpu.memory_space<vmem>>, %arg28: memref<1x128xf32, #tpu.memory_space<vmem>>, %arg29: memref<128x192xbf16, #tpu.memory_space<vmem>>, %arg30: memref<1x192xf32, #tpu.memory_space<vmem>>, %arg31: memref<192x128xbf16, #tpu.memory_space<vmem>>, %arg32: memref<1x128xf32, #tpu.memory_space<vmem>>, %arg33: memref<1x1x128xf32, #tpu.memory_space<vmem>>, %arg34: memref<1x1x128xf32, #tpu.memory_space<vmem>>) attributes {dimension_semantics = [#tpu.dimension_semantics<parallel>], iteration_bounds = array<i64: 2>, scalar_prefetch = 0 : i64, scratch_operands = 0 : i64, tpu.core_type = #tpu.core_type<tc>, window_params = [{transform_indices = @transform_0, window_bounds = array<i64: 1, 24, 72>}, {transform_indices = @transform_1, window_bounds = array<i64: 1, 1, 16>}, {transform_indices = @transform_2, window_bounds = array<i64: 1, 1, 4>}, {transform_indices = @transform_3, window_bounds = array<i64: 1, 1, 128>}, {pipeline_mode = #tpu.pipeline_mode<synchronous>, transform_indices = @transform_4, window_bounds = array<i64: 5, 12, 24>}, {pipeline_mode = #tpu.pipeline_mode<synchronous>, transform_indices = @transform_5, window_bounds = array<i64: 5, 72, 192>}, {pipeline_mode = #tpu.pipeline_mode<synchronous>, transform_indices = @transform_6, window_bounds = array<i64: 1, 192>}, {pipeline_mode = #tpu.pipeline_mode<synchronous>, transform_indices = @transform_7, window_bounds = array<i64: 5, 6, 12>}, {pipeline_mode = #tpu.pipeline_mode<synchronous>, transform_indices = @transform_8, window_bounds = array<i64: 5, 192, 192>}, {pipeline_mode = #tpu.pipeline_mode<synchronous>, transform_indices = @transform_9, window_bounds = array<i64: 1, 192>}, {pipeline_mode = #tpu.pipeline_mode<synchronous>, transform_indices = @transform_10, window_bounds = array<i64: 3, 3, 6>}, {pipeline_mode = #tpu.pipeline_mode<synchronous>, transform_indices = @transform_11, window_bounds = array<i64: 3, 192, 96>}, {pipeline_mode = #tpu.pipeline_mode<synchronous>, transform_indices = @transform_12, window_bounds = array<i64: 1, 96>}, {pipeline_mode = #tpu.pipeline_mode<synchronous>, transform_indices = @transform_13, window_bounds = array<i64: 3, 3>}, {pipeline_mode = #tpu.pipeline_mode<synchronous>, transform_indices = @transform_14, window_bounds = array<i64: 96, 96>}, {pipeline_mode = #tpu.pipeline_mode<synchronous>, transform_indices = @transform_15, window_bounds = array<i64: 3, 96, 128>}, {pipeline_mode = #tpu.pipeline_mode<synchronous>, transform_indices = @transform_16, window_bounds = array<i64: 16, 36>}, {pipeline_mode = #tpu.pipeline_mode<synchronous>, transform_indices = @transform_17, window_bounds = array<i64: 1, 36>}, {pipeline_mode = #tpu.pipeline_mode<synchronous>, transform_indices = @transform_18, window_bounds = array<i64: 36, 18>}, {pipeline_mode = #tpu.pipeline_mode<synchronous>, transform_indices = @transform_19, window_bounds = array<i64: 1, 18>}, {pipeline_mode = #tpu.pipeline_mode<synchronous>, transform_indices = @transform_20, window_bounds = array<i64: 1, 18>}, {pipeline_mode = #tpu.pipeline_mode<synchronous>, transform_indices = @transform_21, window_bounds = array<i64: 18, 128>}, {pipeline_mode = #tpu.pipeline_mode<synchronous>, transform_indices = @transform_22, window_bounds = array<i64: 4, 128>}, {pipeline_mode = #tpu.pipeline_mode<synchronous>, transform_indices = @transform_23, window_bounds = array<i64: 128, 128>}, {pipeline_mode = #tpu.pipeline_mode<synchronous>, transform_indices = @transform_24, window_bounds = array<i64: 1, 128>}, {pipeline_mode = #tpu.pipeline_mode<synchronous>, transform_indices = @transform_25, window_bounds = array<i64: 1, 128>}, {pipeline_mode = #tpu.pipeline_mode<synchronous>, transform_indices = @transform_26, window_bounds = array<i64: 1, 128>}, {pipeline_mode = #tpu.pipeline_mode<synchronous>, transform_indices = @transform_27, window_bounds = array<i64: 1, 128>}, {pipeline_mode = #tpu.pipeline_mode<synchronous>, transform_indices = @transform_28, window_bounds = array<i64: 128, 192>}, {pipeline_mode = #tpu.pipeline_mode<synchronous>, transform_indices = @transform_29, window_bounds = array<i64: 1, 192>}, {pipeline_mode = #tpu.pipeline_mode<synchronous>, transform_indices = @transform_30, window_bounds = array<i64: 192, 128>}, {pipeline_mode = #tpu.pipeline_mode<synchronous>, transform_indices = @transform_31, window_bounds = array<i64: 1, 128>}, {transform_indices = @transform_32, window_bounds = array<i64: 1, 1, 128>}, {transform_indices = @transform_33, window_bounds = array<i64: 1, 1, 128>}]} {
    %c0 = arith.constant 0 : index
    %c0_0 = arith.constant 0 : index
    %c0_1 = arith.constant 0 : index
    %0 = vector.load %arg1[%c0, %c0_0, %c0_1] : memref<1x24x72xbf16, #tpu.memory_space<vmem>>, vector<1x24x72xbf16>
    %1 = vector.shape_cast %0 : vector<1x24x72xbf16> to vector<24x72xbf16>
    %c0_2 = arith.constant 0 : index
    %c0_3 = arith.constant 0 : index
    %c0_4 = arith.constant 0 : index
    %2 = vector.load %arg5[%c0_2, %c0_3, %c0_4] : memref<5x12x24xbf16, #tpu.memory_space<vmem>>, vector<1x12x24xbf16>
    %3 = vector.shape_cast %2 : vector<1x12x24xbf16> to vector<12x24xbf16>
    %cst = arith.constant dense<0.000000e+00> : vector<12x72xf32>
    %4 = tpu.matmul %3, %1, %cst {dimension_numbers = #tpu.dot_dimension_numbers<[1], [0], [0], [1], [0, 0, 1, 1], [], []>} : vector<12x24xbf16>, vector<24x72xbf16>, vector<12x72xf32> -> vector<12x72xf32>
    %5 = arith.truncf %4 : vector<12x72xf32> to vector<12x72xbf16>
    %c0_5 = arith.constant 0 : index
    %c0_6 = arith.constant 0 : index
    %c0_7 = arith.constant 0 : index
    %6 = vector.load %arg6[%c0_5, %c0_6, %c0_7] : memref<5x72x192xbf16, #tpu.memory_space<vmem>>, vector<1x72x192xbf16>
    %7 = vector.shape_cast %6 : vector<1x72x192xbf16> to vector<72x192xbf16>
    %cst_8 = arith.constant dense<0.000000e+00> : vector<12x192xf32>
    %8 = tpu.matmul %5, %7, %cst_8 {dimension_numbers = #tpu.dot_dimension_numbers<[1], [0], [0], [1], [0, 0, 1, 1], [], []>} : vector<12x72xbf16>, vector<72x192xbf16>, vector<12x192xf32> -> vector<12x192xf32>
    %c1 = arith.constant 1 : index
    %c0_9 = arith.constant 0 : index
    %c0_10 = arith.constant 0 : index
    %9 = vector.load %arg5[%c1, %c0_9, %c0_10] : memref<5x12x24xbf16, #tpu.memory_space<vmem>>, vector<1x12x24xbf16>
    %10 = vector.shape_cast %9 : vector<1x12x24xbf16> to vector<12x24xbf16>
    %cst_11 = arith.constant dense<0.000000e+00> : vector<12x72xf32>
    %11 = tpu.matmul %10, %1, %cst_11 {dimension_numbers = #tpu.dot_dimension_numbers<[1], [0], [0], [1], [0, 0, 1, 1], [], []>} : vector<12x24xbf16>, vector<24x72xbf16>, vector<12x72xf32> -> vector<12x72xf32>
    %12 = arith.truncf %11 : vector<12x72xf32> to vector<12x72xbf16>
    %c1_12 = arith.constant 1 : index
    %c0_13 = arith.constant 0 : index
    %c0_14 = arith.constant 0 : index
    %13 = vector.load %arg6[%c1_12, %c0_13, %c0_14] : memref<5x72x192xbf16, #tpu.memory_space<vmem>>, vector<1x72x192xbf16>
    %14 = vector.shape_cast %13 : vector<1x72x192xbf16> to vector<72x192xbf16>
    %cst_15 = arith.constant dense<0.000000e+00> : vector<12x192xf32>
    %15 = tpu.matmul %12, %14, %cst_15 {dimension_numbers = #tpu.dot_dimension_numbers<[1], [0], [0], [1], [0, 0, 1, 1], [], []>} : vector<12x72xbf16>, vector<72x192xbf16>, vector<12x192xf32> -> vector<12x192xf32>
    %16 = arith.addf %8, %15 : vector<12x192xf32>
    %c2 = arith.constant 2 : index
    %c0_16 = arith.constant 0 : index
    %c0_17 = arith.constant 0 : index
    %17 = vector.load %arg5[%c2, %c0_16, %c0_17] : memref<5x12x24xbf16, #tpu.memory_space<vmem>>, vector<1x12x24xbf16>
    %18 = vector.shape_cast %17 : vector<1x12x24xbf16> to vector<12x24xbf16>
    %cst_18 = arith.constant dense<0.000000e+00> : vector<12x72xf32>
    %19 = tpu.matmul %18, %1, %cst_18 {dimension_numbers = #tpu.dot_dimension_numbers<[1], [0], [0], [1], [0, 0, 1, 1], [], []>} : vector<12x24xbf16>, vector<24x72xbf16>, vector<12x72xf32> -> vector<12x72xf32>
    %20 = arith.truncf %19 : vector<12x72xf32> to vector<12x72xbf16>
    %c2_19 = arith.constant 2 : index
    %c0_20 = arith.constant 0 : index
    %c0_21 = arith.constant 0 : index
    %21 = vector.load %arg6[%c2_19, %c0_20, %c0_21] : memref<5x72x192xbf16, #tpu.memory_space<vmem>>, vector<1x72x192xbf16>
    %22 = vector.shape_cast %21 : vector<1x72x192xbf16> to vector<72x192xbf16>
    %cst_22 = arith.constant dense<0.000000e+00> : vector<12x192xf32>
    %23 = tpu.matmul %20, %22, %cst_22 {dimension_numbers = #tpu.dot_dimension_numbers<[1], [0], [0], [1], [0, 0, 1, 1], [], []>} : vector<12x72xbf16>, vector<72x192xbf16>, vector<12x192xf32> -> vector<12x192xf32>
    %24 = arith.addf %16, %23 : vector<12x192xf32>
    %c3 = arith.constant 3 : index
    %c0_23 = arith.constant 0 : index
    %c0_24 = arith.constant 0 : index
    %25 = vector.load %arg5[%c3, %c0_23, %c0_24] : memref<5x12x24xbf16, #tpu.memory_space<vmem>>, vector<1x12x24xbf16>
    %26 = vector.shape_cast %25 : vector<1x12x24xbf16> to vector<12x24xbf16>
    %cst_25 = arith.constant dense<0.000000e+00> : vector<12x72xf32>
    %27 = tpu.matmul %26, %1, %cst_25 {dimension_numbers = #tpu.dot_dimension_numbers<[1], [0], [0], [1], [0, 0, 1, 1], [], []>} : vector<12x24xbf16>, vector<24x72xbf16>, vector<12x72xf32> -> vector<12x72xf32>
    %28 = arith.truncf %27 : vector<12x72xf32> to vector<12x72xbf16>
    %c3_26 = arith.constant 3 : index
    %c0_27 = arith.constant 0 : index
    %c0_28 = arith.constant 0 : index
    %29 = vector.load %arg6[%c3_26, %c0_27, %c0_28] : memref<5x72x192xbf16, #tpu.memory_space<vmem>>, vector<1x72x192xbf16>
    %30 = vector.shape_cast %29 : vector<1x72x192xbf16> to vector<72x192xbf16>
    %cst_29 = arith.constant dense<0.000000e+00> : vector<12x192xf32>
    %31 = tpu.matmul %28, %30, %cst_29 {dimension_numbers = #tpu.dot_dimension_numbers<[1], [0], [0], [1], [0, 0, 1, 1], [], []>} : vector<12x72xbf16>, vector<72x192xbf16>, vector<12x192xf32> -> vector<12x192xf32>
    %32 = arith.addf %24, %31 : vector<12x192xf32>
    %c4 = arith.constant 4 : index
    %c0_30 = arith.constant 0 : index
    %c0_31 = arith.constant 0 : index
    %33 = vector.load %arg5[%c4, %c0_30, %c0_31] : memref<5x12x24xbf16, #tpu.memory_space<vmem>>, vector<1x12x24xbf16>
    %34 = vector.shape_cast %33 : vector<1x12x24xbf16> to vector<12x24xbf16>
    %cst_32 = arith.constant dense<0.000000e+00> : vector<12x72xf32>
    %35 = tpu.matmul %34, %1, %cst_32 {dimension_numbers = #tpu.dot_dimension_numbers<[1], [0], [0], [1], [0, 0, 1, 1], [], []>} : vector<12x24xbf16>, vector<24x72xbf16>, vector<12x72xf32> -> vector<12x72xf32>
    %36 = arith.truncf %35 : vector<12x72xf32> to vector<12x72xbf16>
    %c4_33 = arith.constant 4 : index
    %c0_34 = arith.constant 0 : index
    %c0_35 = arith.constant 0 : index
    %37 = vector.load %arg6[%c4_33, %c0_34, %c0_35] : memref<5x72x192xbf16, #tpu.memory_space<vmem>>, vector<1x72x192xbf16>
    %38 = vector.shape_cast %37 : vector<1x72x192xbf16> to vector<72x192xbf16>
    %cst_36 = arith.constant dense<0.000000e+00> : vector<12x192xf32>
    %39 = tpu.matmul %36, %38, %cst_36 {dimension_numbers = #tpu.dot_dimension_numbers<[1], [0], [0], [1], [0, 0, 1, 1], [], []>} : vector<12x72xbf16>, vector<72x192xbf16>, vector<12x192xf32> -> vector<12x192xf32>
    %40 = arith.addf %32, %39 : vector<12x192xf32>
    %c0_37 = arith.constant 0 : index
    %c0_38 = arith.constant 0 : index
    %41 = vector.load %arg7[%c0_37, %c0_38] : memref<1x192xf32, #tpu.memory_space<vmem>>, vector<1x192xf32>
    %42 = vector.broadcast %41 : vector<1x192xf32> to vector<12x192xf32>
    %43 = arith.addf %40, %42 : vector<12x192xf32>
    %cst_39 = arith.constant 0.000000e+00 : f32
    %44 = vector.broadcast %cst_39 : f32 to vector<12x192xf32>
    %45 = arith.maximumf %43, %44 : vector<12x192xf32>
    %46 = arith.truncf %45 : vector<12x192xf32> to vector<12x192xbf16>
    %c0_40 = arith.constant 0 : index
    %c0_41 = arith.constant 0 : index
    %c0_42 = arith.constant 0 : index
    %47 = vector.load %arg8[%c0_40, %c0_41, %c0_42] : memref<5x6x12xbf16, #tpu.memory_space<vmem>>, vector<1x6x12xbf16>
    %48 = vector.shape_cast %47 : vector<1x6x12xbf16> to vector<6x12xbf16>
    %cst_43 = arith.constant dense<0.000000e+00> : vector<6x192xf32>
    %49 = tpu.matmul %48, %46, %cst_43 {dimension_numbers = #tpu.dot_dimension_numbers<[1], [0], [0], [1], [0, 0, 1, 1], [], []>} : vector<6x12xbf16>, vector<12x192xbf16>, vector<6x192xf32> -> vector<6x192xf32>
    %50 = arith.truncf %49 : vector<6x192xf32> to vector<6x192xbf16>
    %c0_44 = arith.constant 0 : index
    %c0_45 = arith.constant 0 : index
    %c0_46 = arith.constant 0 : index
    %51 = vector.load %arg9[%c0_44, %c0_45, %c0_46] : memref<5x192x192xbf16, #tpu.memory_space<vmem>>, vector<1x192x192xbf16>
    %52 = vector.shape_cast %51 : vector<1x192x192xbf16> to vector<192x192xbf16>
    %cst_47 = arith.constant dense<0.000000e+00> : vector<6x192xf32>
    %53 = tpu.matmul %50, %52, %cst_47 {dimension_numbers = #tpu.dot_dimension_numbers<[1], [0], [0], [1], [0, 0, 1, 1], [], []>} : vector<6x192xbf16>, vector<192x192xbf16>, vector<6x192xf32> -> vector<6x192xf32>
    %c1_48 = arith.constant 1 : index
    %c0_49 = arith.constant 0 : index
    %c0_50 = arith.constant 0 : index
    %54 = vector.load %arg8[%c1_48, %c0_49, %c0_50] : memref<5x6x12xbf16, #tpu.memory_space<vmem>>, vector<1x6x12xbf16>
    %55 = vector.shape_cast %54 : vector<1x6x12xbf16> to vector<6x12xbf16>
    %cst_51 = arith.constant dense<0.000000e+00> : vector<6x192xf32>
    %56 = tpu.matmul %55, %46, %cst_51 {dimension_numbers = #tpu.dot_dimension_numbers<[1], [0], [0], [1], [0, 0, 1, 1], [], []>} : vector<6x12xbf16>, vector<12x192xbf16>, vector<6x192xf32> -> vector<6x192xf32>
    %57 = arith.truncf %56 : vector<6x192xf32> to vector<6x192xbf16>
    %c1_52 = arith.constant 1 : index
    %c0_53 = arith.constant 0 : index
    %c0_54 = arith.constant 0 : index
    %58 = vector.load %arg9[%c1_52, %c0_53, %c0_54] : memref<5x192x192xbf16, #tpu.memory_space<vmem>>, vector<1x192x192xbf16>
    %59 = vector.shape_cast %58 : vector<1x192x192xbf16> to vector<192x192xbf16>
    %cst_55 = arith.constant dense<0.000000e+00> : vector<6x192xf32>
    %60 = tpu.matmul %57, %59, %cst_55 {dimension_numbers = #tpu.dot_dimension_numbers<[1], [0], [0], [1], [0, 0, 1, 1], [], []>} : vector<6x192xbf16>, vector<192x192xbf16>, vector<6x192xf32> -> vector<6x192xf32>
    %61 = arith.addf %53, %60 : vector<6x192xf32>
    %c2_56 = arith.constant 2 : index
    %c0_57 = arith.constant 0 : index
    %c0_58 = arith.constant 0 : index
    %62 = vector.load %arg8[%c2_56, %c0_57, %c0_58] : memref<5x6x12xbf16, #tpu.memory_space<vmem>>, vector<1x6x12xbf16>
    %63 = vector.shape_cast %62 : vector<1x6x12xbf16> to vector<6x12xbf16>
    %cst_59 = arith.constant dense<0.000000e+00> : vector<6x192xf32>
    %64 = tpu.matmul %63, %46, %cst_59 {dimension_numbers = #tpu.dot_dimension_numbers<[1], [0], [0], [1], [0, 0, 1, 1], [], []>} : vector<6x12xbf16>, vector<12x192xbf16>, vector<6x192xf32> -> vector<6x192xf32>
    %65 = arith.truncf %64 : vector<6x192xf32> to vector<6x192xbf16>
    %c2_60 = arith.constant 2 : index
    %c0_61 = arith.constant 0 : index
    %c0_62 = arith.constant 0 : index
    %66 = vector.load %arg9[%c2_60, %c0_61, %c0_62] : memref<5x192x192xbf16, #tpu.memory_space<vmem>>, vector<1x192x192xbf16>
    %67 = vector.shape_cast %66 : vector<1x192x192xbf16> to vector<192x192xbf16>
    %cst_63 = arith.constant dense<0.000000e+00> : vector<6x192xf32>
    %68 = tpu.matmul %65, %67, %cst_63 {dimension_numbers = #tpu.dot_dimension_numbers<[1], [0], [0], [1], [0, 0, 1, 1], [], []>} : vector<6x192xbf16>, vector<192x192xbf16>, vector<6x192xf32> -> vector<6x192xf32>
    %69 = arith.addf %61, %68 : vector<6x192xf32>
    %c3_64 = arith.constant 3 : index
    %c0_65 = arith.constant 0 : index
    %c0_66 = arith.constant 0 : index
    %70 = vector.load %arg8[%c3_64, %c0_65, %c0_66] : memref<5x6x12xbf16, #tpu.memory_space<vmem>>, vector<1x6x12xbf16>
    %71 = vector.shape_cast %70 : vector<1x6x12xbf16> to vector<6x12xbf16>
    %cst_67 = arith.constant dense<0.000000e+00> : vector<6x192xf32>
    %72 = tpu.matmul %71, %46, %cst_67 {dimension_numbers = #tpu.dot_dimension_numbers<[1], [0], [0], [1], [0, 0, 1, 1], [], []>} : vector<6x12xbf16>, vector<12x192xbf16>, vector<6x192xf32> -> vector<6x192xf32>
    %73 = arith.truncf %72 : vector<6x192xf32> to vector<6x192xbf16>
    %c3_68 = arith.constant 3 : index
    %c0_69 = arith.constant 0 : index
    %c0_70 = arith.constant 0 : index
    %74 = vector.load %arg9[%c3_68, %c0_69, %c0_70] : memref<5x192x192xbf16, #tpu.memory_space<vmem>>, vector<1x192x192xbf16>
    %75 = vector.shape_cast %74 : vector<1x192x192xbf16> to vector<192x192xbf16>
    %cst_71 = arith.constant dense<0.000000e+00> : vector<6x192xf32>
    %76 = tpu.matmul %73, %75, %cst_71 {dimension_numbers = #tpu.dot_dimension_numbers<[1], [0], [0], [1], [0, 0, 1, 1], [], []>} : vector<6x192xbf16>, vector<192x192xbf16>, vector<6x192xf32> -> vector<6x192xf32>
    %77 = arith.addf %69, %76 : vector<6x192xf32>
    %c4_72 = arith.constant 4 : index
    %c0_73 = arith.constant 0 : index
    %c0_74 = arith.constant 0 : index
    %78 = vector.load %arg8[%c4_72, %c0_73, %c0_74] : memref<5x6x12xbf16, #tpu.memory_space<vmem>>, vector<1x6x12xbf16>
    %79 = vector.shape_cast %78 : vector<1x6x12xbf16> to vector<6x12xbf16>
    %cst_75 = arith.constant dense<0.000000e+00> : vector<6x192xf32>
    %80 = tpu.matmul %79, %46, %cst_75 {dimension_numbers = #tpu.dot_dimension_numbers<[1], [0], [0], [1], [0, 0, 1, 1], [], []>} : vector<6x12xbf16>, vector<12x192xbf16>, vector<6x192xf32> -> vector<6x192xf32>
    %81 = arith.truncf %80 : vector<6x192xf32> to vector<6x192xbf16>
    %c4_76 = arith.constant 4 : index
    %c0_77 = arith.constant 0 : index
    %c0_78 = arith.constant 0 : index
    %82 = vector.load %arg9[%c4_76, %c0_77, %c0_78] : memref<5x192x192xbf16, #tpu.memory_space<vmem>>, vector<1x192x192xbf16>
    %83 = vector.shape_cast %82 : vector<1x192x192xbf16> to vector<192x192xbf16>
    %cst_79 = arith.constant dense<0.000000e+00> : vector<6x192xf32>
    %84 = tpu.matmul %81, %83, %cst_79 {dimension_numbers = #tpu.dot_dimension_numbers<[1], [0], [0], [1], [0, 0, 1, 1], [], []>} : vector<6x192xbf16>, vector<192x192xbf16>, vector<6x192xf32> -> vector<6x192xf32>
    %85 = arith.addf %77, %84 : vector<6x192xf32>
    %c0_80 = arith.constant 0 : index
    %c0_81 = arith.constant 0 : index
    %86 = vector.load %arg10[%c0_80, %c0_81] : memref<1x192xf32, #tpu.memory_space<vmem>>, vector<1x192xf32>
    %87 = vector.broadcast %86 : vector<1x192xf32> to vector<6x192xf32>
    %88 = arith.addf %85, %87 : vector<6x192xf32>
    %cst_82 = arith.constant 0.000000e+00 : f32
    %89 = vector.broadcast %cst_82 : f32 to vector<6x192xf32>
    %90 = arith.maximumf %88, %89 : vector<6x192xf32>
    %91 = arith.truncf %90 : vector<6x192xf32> to vector<6x192xbf16>
    %c0_83 = arith.constant 0 : index
    %c0_84 = arith.constant 0 : index
    %c0_85 = arith.constant 0 : index
    %92 = vector.load %arg11[%c0_83, %c0_84, %c0_85] : memref<3x3x6xbf16, #tpu.memory_space<vmem>>, vector<1x3x6xbf16>
    %93 = vector.shape_cast %92 : vector<1x3x6xbf16> to vector<3x6xbf16>
    %cst_86 = arith.constant dense<0.000000e+00> : vector<3x192xf32>
    %94 = tpu.matmul %93, %91, %cst_86 {dimension_numbers = #tpu.dot_dimension_numbers<[1], [0], [0], [1], [0, 0, 1, 1], [], []>} : vector<3x6xbf16>, vector<6x192xbf16>, vector<3x192xf32> -> vector<3x192xf32>
    %95 = arith.truncf %94 : vector<3x192xf32> to vector<3x192xbf16>
    %c0_87 = arith.constant 0 : index
    %c0_88 = arith.constant 0 : index
    %c0_89 = arith.constant 0 : index
    %96 = vector.load %arg12[%c0_87, %c0_88, %c0_89] : memref<3x192x96xbf16, #tpu.memory_space<vmem>>, vector<1x192x96xbf16>
    %97 = vector.shape_cast %96 : vector<1x192x96xbf16> to vector<192x96xbf16>
    %cst_90 = arith.constant dense<0.000000e+00> : vector<3x96xf32>
    %98 = tpu.matmul %95, %97, %cst_90 {dimension_numbers = #tpu.dot_dimension_numbers<[1], [0], [0], [1], [0, 0, 1, 1], [], []>} : vector<3x192xbf16>, vector<192x96xbf16>, vector<3x96xf32> -> vector<3x96xf32>
    %c1_91 = arith.constant 1 : index
    %c0_92 = arith.constant 0 : index
    %c0_93 = arith.constant 0 : index
    %99 = vector.load %arg11[%c1_91, %c0_92, %c0_93] : memref<3x3x6xbf16, #tpu.memory_space<vmem>>, vector<1x3x6xbf16>
    %100 = vector.shape_cast %99 : vector<1x3x6xbf16> to vector<3x6xbf16>
    %cst_94 = arith.constant dense<0.000000e+00> : vector<3x192xf32>
    %101 = tpu.matmul %100, %91, %cst_94 {dimension_numbers = #tpu.dot_dimension_numbers<[1], [0], [0], [1], [0, 0, 1, 1], [], []>} : vector<3x6xbf16>, vector<6x192xbf16>, vector<3x192xf32> -> vector<3x192xf32>
    %102 = arith.truncf %101 : vector<3x192xf32> to vector<3x192xbf16>
    %c1_95 = arith.constant 1 : index
    %c0_96 = arith.constant 0 : index
    %c0_97 = arith.constant 0 : index
    %103 = vector.load %arg12[%c1_95, %c0_96, %c0_97] : memref<3x192x96xbf16, #tpu.memory_space<vmem>>, vector<1x192x96xbf16>
    %104 = vector.shape_cast %103 : vector<1x192x96xbf16> to vector<192x96xbf16>
    %cst_98 = arith.constant dense<0.000000e+00> : vector<3x96xf32>
    %105 = tpu.matmul %102, %104, %cst_98 {dimension_numbers = #tpu.dot_dimension_numbers<[1], [0], [0], [1], [0, 0, 1, 1], [], []>} : vector<3x192xbf16>, vector<192x96xbf16>, vector<3x96xf32> -> vector<3x96xf32>
    %106 = arith.addf %98, %105 : vector<3x96xf32>
    %c2_99 = arith.constant 2 : index
    %c0_100 = arith.constant 0 : index
    %c0_101 = arith.constant 0 : index
    %107 = vector.load %arg11[%c2_99, %c0_100, %c0_101] : memref<3x3x6xbf16, #tpu.memory_space<vmem>>, vector<1x3x6xbf16>
    %108 = vector.shape_cast %107 : vector<1x3x6xbf16> to vector<3x6xbf16>
    %cst_102 = arith.constant dense<0.000000e+00> : vector<3x192xf32>
    %109 = tpu.matmul %108, %91, %cst_102 {dimension_numbers = #tpu.dot_dimension_numbers<[1], [0], [0], [1], [0, 0, 1, 1], [], []>} : vector<3x6xbf16>, vector<6x192xbf16>, vector<3x192xf32> -> vector<3x192xf32>
    %110 = arith.truncf %109 : vector<3x192xf32> to vector<3x192xbf16>
    %c2_103 = arith.constant 2 : index
    %c0_104 = arith.constant 0 : index
    %c0_105 = arith.constant 0 : index
    %111 = vector.load %arg12[%c2_103, %c0_104, %c0_105] : memref<3x192x96xbf16, #tpu.memory_space<vmem>>, vector<1x192x96xbf16>
    %112 = vector.shape_cast %111 : vector<1x192x96xbf16> to vector<192x96xbf16>
    %cst_106 = arith.constant dense<0.000000e+00> : vector<3x96xf32>
    %113 = tpu.matmul %110, %112, %cst_106 {dimension_numbers = #tpu.dot_dimension_numbers<[1], [0], [0], [1], [0, 0, 1, 1], [], []>} : vector<3x192xbf16>, vector<192x96xbf16>, vector<3x96xf32> -> vector<3x96xf32>
    %114 = arith.addf %106, %113 : vector<3x96xf32>
    %c0_107 = arith.constant 0 : index
    %c0_108 = arith.constant 0 : index
    %115 = vector.load %arg13[%c0_107, %c0_108] : memref<1x96xf32, #tpu.memory_space<vmem>>, vector<1x96xf32>
    %116 = vector.broadcast %115 : vector<1x96xf32> to vector<3x96xf32>
    %117 = arith.addf %114, %116 : vector<3x96xf32>
    %cst_109 = arith.constant 0.000000e+00 : f32
    %118 = vector.broadcast %cst_109 : f32 to vector<3x96xf32>
    %119 = arith.maximumf %117, %118 : vector<3x96xf32>
    %120 = arith.truncf %119 : vector<3x96xf32> to vector<3x96xbf16>
    %c0_110 = arith.constant 0 : index
    %c0_111 = arith.constant 0 : index
    %121 = vector.load %arg14[%c0_110, %c0_111] : memref<3x3xbf16, #tpu.memory_space<vmem>>, vector<3x3xbf16>
    %cst_112 = arith.constant dense<0.000000e+00> : vector<3x96xf32>
    %122 = tpu.matmul %121, %120, %cst_112 {dimension_numbers = #tpu.dot_dimension_numbers<[1], [0], [0], [1], [0, 0, 1, 1], [], []>} : vector<3x3xbf16>, vector<3x96xbf16>, vector<3x96xf32> -> vector<3x96xf32>
    %123 = arith.truncf %122 : vector<3x96xf32> to vector<3x96xbf16>
    %c0_113 = arith.constant 0 : index
    %c0_114 = arith.constant 0 : index
    %124 = vector.load %arg15[%c0_113, %c0_114] : memref<96x96xbf16, #tpu.memory_space<vmem>>, vector<96x96xbf16>
    %cst_115 = arith.constant dense<0.000000e+00> : vector<3x96xf32>
    %125 = tpu.matmul %123, %124, %cst_115 {dimension_numbers = #tpu.dot_dimension_numbers<[1], [0], [0], [1], [0, 0, 1, 1], [], []>} : vector<3x96xbf16>, vector<96x96xbf16>, vector<3x96xf32> -> vector<3x96xf32>
    %126 = arith.truncf %125 : vector<3x96xf32> to vector<3x96xbf16>
    %c0_116 = arith.constant 0 : index
    %c0_117 = arith.constant 0 : index
    %127 = vector.load %arg25[%c0_116, %c0_117] : memref<1x128xf32, #tpu.memory_space<vmem>>, vector<1x128xf32>
    %128 = vector.extract_strided_slice %126 {offsets = [0, 0], sizes = [1, 96], strides = [1, 1]} : vector<3x96xbf16> to vector<1x96xbf16>
    %c0_118 = arith.constant 0 : index
    %c0_119 = arith.constant 0 : index
    %c0_120 = arith.constant 0 : index
    %129 = vector.load %arg16[%c0_118, %c0_119, %c0_120] : memref<3x96x128xbf16, #tpu.memory_space<vmem>>, vector<1x96x128xbf16>
    %130 = vector.shape_cast %129 : vector<1x96x128xbf16> to vector<96x128xbf16>
    %cst_121 = arith.constant dense<0.000000e+00> : vector<1x128xf32>
    %131 = tpu.matmul %128, %130, %cst_121 {dimension_numbers = #tpu.dot_dimension_numbers<[1], [0], [0], [1], [0, 0, 1, 1], [], []>} : vector<1x96xbf16>, vector<96x128xbf16>, vector<1x128xf32> -> vector<1x128xf32>
    %132 = arith.addf %127, %131 : vector<1x128xf32>
    %133 = vector.extract_strided_slice %126 {offsets = [1, 0], sizes = [1, 96], strides = [1, 1]} : vector<3x96xbf16> to vector<1x96xbf16>
    %c1_122 = arith.constant 1 : index
    %c0_123 = arith.constant 0 : index
    %c0_124 = arith.constant 0 : index
    %134 = vector.load %arg16[%c1_122, %c0_123, %c0_124] : memref<3x96x128xbf16, #tpu.memory_space<vmem>>, vector<1x96x128xbf16>
    %135 = vector.shape_cast %134 : vector<1x96x128xbf16> to vector<96x128xbf16>
    %cst_125 = arith.constant dense<0.000000e+00> : vector<1x128xf32>
    %136 = tpu.matmul %133, %135, %cst_125 {dimension_numbers = #tpu.dot_dimension_numbers<[1], [0], [0], [1], [0, 0, 1, 1], [], []>} : vector<1x96xbf16>, vector<96x128xbf16>, vector<1x128xf32> -> vector<1x128xf32>
    %137 = arith.addf %132, %136 : vector<1x128xf32>
    %138 = vector.extract_strided_slice %126 {offsets = [2, 0], sizes = [1, 96], strides = [1, 1]} : vector<3x96xbf16> to vector<1x96xbf16>
    %c2_126 = arith.constant 2 : index
    %c0_127 = arith.constant 0 : index
    %c0_128 = arith.constant 0 : index
    %139 = vector.load %arg16[%c2_126, %c0_127, %c0_128] : memref<3x96x128xbf16, #tpu.memory_space<vmem>>, vector<1x96x128xbf16>
    %140 = vector.shape_cast %139 : vector<1x96x128xbf16> to vector<96x128xbf16>
    %cst_129 = arith.constant dense<0.000000e+00> : vector<1x128xf32>
    %141 = tpu.matmul %138, %140, %cst_129 {dimension_numbers = #tpu.dot_dimension_numbers<[1], [0], [0], [1], [0, 0, 1, 1], [], []>} : vector<1x96xbf16>, vector<96x128xbf16>, vector<1x128xf32> -> vector<1x128xf32>
    %142 = arith.addf %137, %141 : vector<1x128xf32>
    %c0_130 = arith.constant 0 : index
    %c0_131 = arith.constant 0 : index
    %c0_132 = arith.constant 0 : index
    %143 = vector.load %arg2[%c0_130, %c0_131, %c0_132] : memref<1x1x16xf32, #tpu.memory_space<vmem>>, vector<1x1x16xf32>
    %144 = vector.shape_cast %143 : vector<1x1x16xf32> to vector<1x16xf32>
    %145 = arith.truncf %144 : vector<1x16xf32> to vector<1x16xbf16>
    %c0_133 = arith.constant 0 : index
    %c0_134 = arith.constant 0 : index
    %146 = vector.load %arg17[%c0_133, %c0_134] : memref<16x36xbf16, #tpu.memory_space<vmem>>, vector<16x36xbf16>
    %cst_135 = arith.constant dense<0.000000e+00> : vector<1x36xf32>
    %147 = tpu.matmul %145, %146, %cst_135 {dimension_numbers = #tpu.dot_dimension_numbers<[1], [0], [0], [1], [0, 0, 1, 1], [], []>} : vector<1x16xbf16>, vector<16x36xbf16>, vector<1x36xf32> -> vector<1x36xf32>
    %c0_136 = arith.constant 0 : index
    %c0_137 = arith.constant 0 : index
    %148 = vector.load %arg18[%c0_136, %c0_137] : memref<1x36xf32, #tpu.memory_space<vmem>>, vector<1x36xf32>
    %149 = arith.addf %147, %148 : vector<1x36xf32>
    %cst_138 = arith.constant 0.000000e+00 : f32
    %150 = vector.broadcast %cst_138 : f32 to vector<1x36xf32>
    %151 = arith.maximumf %149, %150 : vector<1x36xf32>
    %152 = arith.truncf %151 : vector<1x36xf32> to vector<1x36xbf16>
    %c0_139 = arith.constant 0 : index
    %c0_140 = arith.constant 0 : index
    %153 = vector.load %arg19[%c0_139, %c0_140] : memref<36x18xbf16, #tpu.memory_space<vmem>>, vector<36x18xbf16>
    %cst_141 = arith.constant dense<0.000000e+00> : vector<1x18xf32>
    %154 = tpu.matmul %152, %153, %cst_141 {dimension_numbers = #tpu.dot_dimension_numbers<[1], [0], [0], [1], [0, 0, 1, 1], [], []>} : vector<1x36xbf16>, vector<36x18xbf16>, vector<1x18xf32> -> vector<1x18xf32>
    %c0_142 = arith.constant 0 : index
    %c0_143 = arith.constant 0 : index
    %155 = vector.load %arg20[%c0_142, %c0_143] : memref<1x18xf32, #tpu.memory_space<vmem>>, vector<1x18xf32>
    %156 = arith.addf %154, %155 : vector<1x18xf32>
    %c0_144 = arith.constant 0 : index
    %c0_145 = arith.constant 0 : index
    %157 = vector.load %arg21[%c0_144, %c0_145] : memref<1x18xf32, #tpu.memory_space<vmem>>, vector<1x18xf32>
    %158 = arith.mulf %156, %157 : vector<1x18xf32>
    %c0_146 = arith.constant 0 : index
    %c0_147 = arith.constant 0 : index
    %c0_148 = arith.constant 0 : index
    %159 = vector.load %arg4[%c0_146, %c0_147, %c0_148] : memref<1x1x128xf32, #tpu.memory_space<vmem>>, vector<1x1x128xf32>
    %160 = vector.shape_cast %159 : vector<1x1x128xf32> to vector<1x128xf32>
    %161 = arith.truncf %158 : vector<1x18xf32> to vector<1x18xbf16>
    %c0_149 = arith.constant 0 : index
    %c0_150 = arith.constant 0 : index
    %162 = vector.load %arg22[%c0_149, %c0_150] : memref<18x128xbf16, #tpu.memory_space<vmem>>, vector<18x128xbf16>
    %cst_151 = arith.constant dense<0.000000e+00> : vector<1x128xf32>
    %163 = tpu.matmul %161, %162, %cst_151 {dimension_numbers = #tpu.dot_dimension_numbers<[1], [0], [0], [1], [0, 0, 1, 1], [], []>} : vector<1x18xbf16>, vector<18x128xbf16>, vector<1x128xf32> -> vector<1x128xf32>
    %164 = arith.addf %142, %163 : vector<1x128xf32>
    %c0_152 = arith.constant 0 : index
    %c0_153 = arith.constant 0 : index
    %c0_154 = arith.constant 0 : index
    %165 = vector.load %arg3[%c0_152, %c0_153, %c0_154] : memref<1x1x4xf32, #tpu.memory_space<vmem>>, vector<1x1x4xf32>
    %166 = vector.shape_cast %165 : vector<1x1x4xf32> to vector<1x4xf32>
    %167 = arith.truncf %166 : vector<1x4xf32> to vector<1x4xbf16>
    %c0_155 = arith.constant 0 : index
    %c0_156 = arith.constant 0 : index
    %168 = vector.load %arg23[%c0_155, %c0_156] : memref<4x128xbf16, #tpu.memory_space<vmem>>, vector<4x128xbf16>
    %cst_157 = arith.constant dense<0.000000e+00> : vector<1x128xf32>
    %169 = tpu.matmul %167, %168, %cst_157 {dimension_numbers = #tpu.dot_dimension_numbers<[1], [0], [0], [1], [0, 0, 1, 1], [], []>} : vector<1x4xbf16>, vector<4x128xbf16>, vector<1x128xf32> -> vector<1x128xf32>
    %170 = arith.addf %164, %169 : vector<1x128xf32>
    %171 = arith.truncf %160 : vector<1x128xf32> to vector<1x128xbf16>
    %c0_158 = arith.constant 0 : index
    %c0_159 = arith.constant 0 : index
    %172 = vector.load %arg24[%c0_158, %c0_159] : memref<128x128xbf16, #tpu.memory_space<vmem>>, vector<128x128xbf16>
    %cst_160 = arith.constant dense<0.000000e+00> : vector<1x128xf32>
    %173 = tpu.matmul %171, %172, %cst_160 {dimension_numbers = #tpu.dot_dimension_numbers<[1], [0], [0], [1], [0, 0, 1, 1], [], []>} : vector<1x128xbf16>, vector<128x128xbf16>, vector<1x128xf32> -> vector<1x128xf32>
    %174 = arith.addf %170, %173 : vector<1x128xf32>
    %175 = math.tanh %174 : vector<1x128xf32>
    %176 = arith.subf %175, %160 : vector<1x128xf32>
    %c0_161 = arith.constant 0 : index
    %c0_162 = arith.constant 0 : index
    %177 = vector.load %arg26[%c0_161, %c0_162] : memref<1x128xf32, #tpu.memory_space<vmem>>, vector<1x128xf32>
    %178 = arith.mulf %176, %177 : vector<1x128xf32>
    %179 = arith.addf %160, %178 : vector<1x128xf32>
    %c0_163 = arith.constant 0 : index
    %c0_164 = arith.constant 0 : index
    %c0_165 = arith.constant 0 : index
    %180 = vector.load %arg33[%c0_163, %c0_164, %c0_165] : memref<1x1x128xf32, #tpu.memory_space<vmem>>, vector<1x1x128xf32>
    %181 = vector.shape_cast %180 : vector<1x1x128xf32> to vector<1x128xf32>
    %182 = vector.shape_cast %179 : vector<1x128xf32> to vector<1x1x128xf32>
    tpu.vector_store %arg33[%c0_163, %c0_164, %c0_165], %182 {strides = array<i32>} : memref<1x1x128xf32, #tpu.memory_space<vmem>>, vector<1x1x128xf32>,
    %cst_166 = arith.constant dense<0.000000e+00> : vector<1xf32>
    %183 = vector.multi_reduction <add>, %179, %cst_166 [1] : vector<1x128xf32> to vector<1xf32>
    %184 = vector.shape_cast %183 : vector<1xf32> to vector<1x1xf32>
    %cst_167 = arith.constant 1.280000e+02 : f32
    %185 = vector.broadcast %cst_167 : f32 to vector<1x1xf32>
    %186 = arith.divf %184, %185 : vector<1x1xf32>
    %187 = vector.broadcast %186 : vector<1x1xf32> to vector<1x128xf32>
    %188 = arith.subf %179, %187 : vector<1x128xf32>
    %189 = arith.mulf %188, %188 : vector<1x128xf32>
    %cst_168 = arith.constant dense<0.000000e+00> : vector<1xf32>
    %190 = vector.multi_reduction <add>, %189, %cst_168 [1] : vector<1x128xf32> to vector<1xf32>
    %191 = vector.shape_cast %190 : vector<1xf32> to vector<1x1xf32>
    %cst_169 = arith.constant 1.280000e+02 : f32
    %192 = vector.broadcast %cst_169 : f32 to vector<1x1xf32>
    %193 = arith.divf %191, %192 : vector<1x1xf32>
    %194 = vector.broadcast %186 : vector<1x1xf32> to vector<1x128xf32>
    %195 = arith.subf %179, %194 : vector<1x128xf32>
    %cst_170 = arith.constant 9.99999974E-6 : f32
    %196 = vector.broadcast %cst_170 : f32 to vector<1x1xf32>
    %197 = arith.addf %193, %196 : vector<1x1xf32>
    %198 = math.rsqrt %197 : vector<1x1xf32>
    %199 = vector.broadcast %198 : vector<1x1xf32> to vector<1x128xf32>
    %200 = arith.mulf %195, %199 : vector<1x128xf32>
    %c0_171 = arith.constant 0 : index
    %c0_172 = arith.constant 0 : index
    %201 = vector.load %arg27[%c0_171, %c0_172] : memref<1x128xf32, #tpu.memory_space<vmem>>, vector<1x128xf32>
    %202 = arith.mulf %200, %201 : vector<1x128xf32>
    %c0_173 = arith.constant 0 : index
    %c0_174 = arith.constant 0 : index
    %203 = vector.load %arg28[%c0_173, %c0_174] : memref<1x128xf32, #tpu.memory_space<vmem>>, vector<1x128xf32>
    %204 = arith.addf %202, %203 : vector<1x128xf32>
    %205 = arith.truncf %204 : vector<1x128xf32> to vector<1x128xbf16>
    %c0_175 = arith.constant 0 : index
    %c0_176 = arith.constant 0 : index
    %206 = vector.load %arg29[%c0_175, %c0_176] : memref<128x192xbf16, #tpu.memory_space<vmem>>, vector<128x192xbf16>
    %cst_177 = arith.constant dense<0.000000e+00> : vector<1x192xf32>
    %207 = tpu.matmul %205, %206, %cst_177 {dimension_numbers = #tpu.dot_dimension_numbers<[1], [0], [0], [1], [0, 0, 1, 1], [], []>} : vector<1x128xbf16>, vector<128x192xbf16>, vector<1x192xf32> -> vector<1x192xf32>
    %c0_178 = arith.constant 0 : index
    %c0_179 = arith.constant 0 : index
    %208 = vector.load %arg30[%c0_178, %c0_179] : memref<1x192xf32, #tpu.memory_space<vmem>>, vector<1x192xf32>
    %209 = arith.addf %207, %208 : vector<1x192xf32>
    %cst_180 = arith.constant 0.000000e+00 : f32
    %210 = vector.broadcast %cst_180 : f32 to vector<1x192xf32>
    %211 = arith.maximumf %209, %210 : vector<1x192xf32>
    %212 = arith.truncf %211 : vector<1x192xf32> to vector<1x192xbf16>
    %c0_181 = arith.constant 0 : index
    %c0_182 = arith.constant 0 : index
    %213 = vector.load %arg31[%c0_181, %c0_182] : memref<192x128xbf16, #tpu.memory_space<vmem>>, vector<192x128xbf16>
    %cst_183 = arith.constant dense<0.000000e+00> : vector<1x128xf32>
    %214 = tpu.matmul %212, %213, %cst_183 {dimension_numbers = #tpu.dot_dimension_numbers<[1], [0], [0], [1], [0, 0, 1, 1], [], []>} : vector<1x192xbf16>, vector<192x128xbf16>, vector<1x128xf32> -> vector<1x128xf32>
    %c0_184 = arith.constant 0 : index
    %c0_185 = arith.constant 0 : index
    %215 = vector.load %arg32[%c0_184, %c0_185] : memref<1x128xf32, #tpu.memory_space<vmem>>, vector<1x128xf32>
    %216 = arith.addf %214, %215 : vector<1x128xf32>
    %217 = tpu.iota {dimensions = array<i32: 1>} : vector<1x128xi32>
    %c3_i32 = arith.constant 3 : i32
    %218 = vector.broadcast %c3_i32 : i32 to vector<1x128xi32>
    %219 = arith.cmpi slt, %217, %218 : vector<1x128xi32>
    %220 = math.tanh %216 : vector<1x128xf32>
    %221 = arith.select %219, %220, %216 : vector<1x128xi1>, vector<1x128xf32>
    %c0_186 = arith.constant 0 : index
    %c0_187 = arith.constant 0 : index
    %c0_188 = arith.constant 0 : index
    %222 = vector.load %arg34[%c0_186, %c0_187, %c0_188] : memref<1x1x128xf32, #tpu.memory_space<vmem>>, vector<1x1x128xf32>
    %223 = vector.shape_cast %222 : vector<1x1x128xf32> to vector<1x128xf32>
    %224 = vector.shape_cast %221 : vector<1x128xf32> to vector<1x1x128xf32>
    tpu.vector_store %arg34[%c0_186, %c0_187, %c0_188], %224 {strides = array<i32>} : memref<1x1x128xf32, #tpu.memory_space<vmem>>, vector<1x1x128xf32>,
    return
  }
  func.func @transform_0(%arg0: i32) -> (i32, i32, i32) {
    %c0_i32 = arith.constant 0 : i32
    %c0_i32_0 = arith.constant 0 : i32
    %c0_i32_1 = arith.constant 0 : i32
    return %arg0, %c0_i32, %c0_i32_0 : i32, i32, i32
  }
  func.func @transform_1(%arg0: i32) -> (i32, i32, i32) {
    %c0_i32 = arith.constant 0 : i32
    %c0_i32_0 = arith.constant 0 : i32
    %c0_i32_1 = arith.constant 0 : i32
    return %arg0, %c0_i32, %c0_i32_0 : i32, i32, i32
  }
  func.func @transform_2(%arg0: i32) -> (i32, i32, i32) {
    %c0_i32 = arith.constant 0 : i32
    %c0_i32_0 = arith.constant 0 : i32
    %c0_i32_1 = arith.constant 0 : i32
    return %arg0, %c0_i32, %c0_i32_0 : i32, i32, i32
  }
  func.func @transform_3(%arg0: i32) -> (i32, i32, i32) {
    %c0_i32 = arith.constant 0 : i32
    %c0_i32_0 = arith.constant 0 : i32
    %c0_i32_1 = arith.constant 0 : i32
    return %arg0, %c0_i32, %c0_i32_0 : i32, i32, i32
  }
  func.func @transform_4(%arg0: i32) -> (i32, i32, i32) {
    %c0_i32 = arith.constant 0 : i32
    %c0_i32_0 = arith.constant 0 : i32
    %c0_i32_1 = arith.constant 0 : i32
    %c0_i32_2 = arith.constant 0 : i32
    return %c0_i32, %c0_i32_0, %c0_i32_1 : i32, i32, i32
  }
  func.func @transform_5(%arg0: i32) -> (i32, i32, i32) {
    %c0_i32 = arith.constant 0 : i32
    %c0_i32_0 = arith.constant 0 : i32
    %c0_i32_1 = arith.constant 0 : i32
    %c0_i32_2 = arith.constant 0 : i32
    return %c0_i32, %c0_i32_0, %c0_i32_1 : i32, i32, i32
  }
  func.func @transform_6(%arg0: i32) -> (i32, i32) {
    %c0_i32 = arith.constant 0 : i32
    %c0_i32_0 = arith.constant 0 : i32
    %c0_i32_1 = arith.constant 0 : i32
    return %c0_i32, %c0_i32_0 : i32, i32
  }
  func.func @transform_7(%arg0: i32) -> (i32, i32, i32) {
    %c0_i32 = arith.constant 0 : i32
    %c0_i32_0 = arith.constant 0 : i32
    %c0_i32_1 = arith.constant 0 : i32
    %c0_i32_2 = arith.constant 0 : i32
    return %c0_i32, %c0_i32_0, %c0_i32_1 : i32, i32, i32
  }
  func.func @transform_8(%arg0: i32) -> (i32, i32, i32) {
    %c0_i32 = arith.constant 0 : i32
    %c0_i32_0 = arith.constant 0 : i32
    %c0_i32_1 = arith.constant 0 : i32
    %c0_i32_2 = arith.constant 0 : i32
    return %c0_i32, %c0_i32_0, %c0_i32_1 : i32, i32, i32
  }
  func.func @transform_9(%arg0: i32) -> (i32, i32) {
    %c0_i32 = arith.constant 0 : i32
    %c0_i32_0 = arith.constant 0 : i32
    %c0_i32_1 = arith.constant 0 : i32
    return %c0_i32, %c0_i32_0 : i32, i32
  }
  func.func @transform_10(%arg0: i32) -> (i32, i32, i32) {
    %c0_i32 = arith.constant 0 : i32
    %c0_i32_0 = arith.constant 0 : i32
    %c0_i32_1 = arith.constant 0 : i32
    %c0_i32_2 = arith.constant 0 : i32
    return %c0_i32, %c0_i32_0, %c0_i32_1 : i32, i32, i32
  }
  func.func @transform_11(%arg0: i32) -> (i32, i32, i32) {
    %c0_i32 = arith.constant 0 : i32
    %c0_i32_0 = arith.constant 0 : i32
    %c0_i32_1 = arith.constant 0 : i32
    %c0_i32_2 = arith.constant 0 : i32
    return %c0_i32, %c0_i32_0, %c0_i32_1 : i32, i32, i32
  }
  func.func @transform_12(%arg0: i32) -> (i32, i32) {
    %c0_i32 = arith.constant 0 : i32
    %c0_i32_0 = arith.constant 0 : i32
    %c0_i32_1 = arith.constant 0 : i32
    return %c0_i32, %c0_i32_0 : i32, i32
  }
  func.func @transform_13(%arg0: i32) -> (i32, i32) {
    %c0_i32 = arith.constant 0 : i32
    %c0_i32_0 = arith.constant 0 : i32
    %c0_i32_1 = arith.constant 0 : i32
    return %c0_i32, %c0_i32_0 : i32, i32
  }
  func.func @transform_14(%arg0: i32) -> (i32, i32) {
    %c0_i32 = arith.constant 0 : i32
    %c0_i32_0 = arith.constant 0 : i32
    %c0_i32_1 = arith.constant 0 : i32
    return %c0_i32, %c0_i32_0 : i32, i32
  }
  func.func @transform_15(%arg0: i32) -> (i32, i32, i32) {
    %c0_i32 = arith.constant 0 : i32
    %c0_i32_0 = arith.constant 0 : i32
    %c0_i32_1 = arith.constant 0 : i32
    %c0_i32_2 = arith.constant 0 : i32
    return %c0_i32, %c0_i32_0, %c0_i32_1 : i32, i32, i32
  }
  func.func @transform_16(%arg0: i32) -> (i32, i32) {
    %c0_i32 = arith.constant 0 : i32
    %c0_i32_0 = arith.constant 0 : i32
    %c0_i32_1 = arith.constant 0 : i32
    return %c0_i32, %c0_i32_0 : i32, i32
  }
  func.func @transform_17(%arg0: i32) -> (i32, i32) {
    %c0_i32 = arith.constant 0 : i32
    %c0_i32_0 = arith.constant 0 : i32
    %c0_i32_1 = arith.constant 0 : i32
    return %c0_i32, %c0_i32_0 : i32, i32
  }
  func.func @transform_18(%arg0: i32) -> (i32, i32) {
    %c0_i32 = arith.constant 0 : i32
    %c0_i32_0 = arith.constant 0 : i32
    %c0_i32_1 = arith.constant 0 : i32
    return %c0_i32, %c0_i32_0 : i32, i32
  }
  func.func @transform_19(%arg0: i32) -> (i32, i32) {
    %c0_i32 = arith.constant 0 : i32
    %c0_i32_0 = arith.constant 0 : i32
    %c0_i32_1 = arith.constant 0 : i32
    return %c0_i32, %c0_i32_0 : i32, i32
  }
  func.func @transform_20(%arg0: i32) -> (i32, i32) {
    %c0_i32 = arith.constant 0 : i32
    %c0_i32_0 = arith.constant 0 : i32
    %c0_i32_1 = arith.constant 0 : i32
    return %c0_i32, %c0_i32_0 : i32, i32
  }
  func.func @transform_21(%arg0: i32) -> (i32, i32) {
    %c0_i32 = arith.constant 0 : i32
    %c0_i32_0 = arith.constant 0 : i32
    %c0_i32_1 = arith.constant 0 : i32
    return %c0_i32, %c0_i32_0 : i32, i32
  }
  func.func @transform_22(%arg0: i32) -> (i32, i32) {
    %c0_i32 = arith.constant 0 : i32
    %c0_i32_0 = arith.constant 0 : i32
    %c0_i32_1 = arith.constant 0 : i32
    return %c0_i32, %c0_i32_0 : i32, i32
  }
  func.func @transform_23(%arg0: i32) -> (i32, i32) {
    %c0_i32 = arith.constant 0 : i32
    %c0_i32_0 = arith.constant 0 : i32
    %c0_i32_1 = arith.constant 0 : i32
    return %c0_i32, %c0_i32_0 : i32, i32
  }
  func.func @transform_24(%arg0: i32) -> (i32, i32) {
    %c0_i32 = arith.constant 0 : i32
    %c0_i32_0 = arith.constant 0 : i32
    %c0_i32_1 = arith.constant 0 : i32
    return %c0_i32, %c0_i32_0 : i32, i32
  }
  func.func @transform_25(%arg0: i32) -> (i32, i32) {
    %c0_i32 = arith.constant 0 : i32
    %c0_i32_0 = arith.constant 0 : i32
    %c0_i32_1 = arith.constant 0 : i32
    return %c0_i32, %c0_i32_0 : i32, i32
  }
  func.func @transform_26(%arg0: i32) -> (i32, i32) {
    %c0_i32 = arith.constant 0 : i32
    %c0_i32_0 = arith.constant 0 : i32
    %c0_i32_1 = arith.constant 0 : i32
    return %c0_i32, %c0_i32_0 : i32, i32
  }
  func.func @transform_27(%arg0: i32) -> (i32, i32) {
    %c0_i32 = arith.constant 0 : i32
    %c0_i32_0 = arith.constant 0 : i32
    %c0_i32_1 = arith.constant 0 : i32
    return %c0_i32, %c0_i32_0 : i32, i32
  }
  func.func @transform_28(%arg0: i32) -> (i32, i32) {
    %c0_i32 = arith.constant 0 : i32
    %c0_i32_0 = arith.constant 0 : i32
    %c0_i32_1 = arith.constant 0 : i32
    return %c0_i32, %c0_i32_0 : i32, i32
  }
  func.func @transform_29(%arg0: i32) -> (i32, i32) {
    %c0_i32 = arith.constant 0 : i32
    %c0_i32_0 = arith.constant 0 : i32
    %c0_i32_1 = arith.constant 0 : i32
    return %c0_i32, %c0_i32_0 : i32, i32
  }
  func.func @transform_30(%arg0: i32) -> (i32, i32) {
    %c0_i32 = arith.constant 0 : i32
    %c0_i32_0 = arith.constant 0 : i32
    %c0_i32_1 = arith.constant 0 : i32
    return %c0_i32, %c0_i32_0 : i32, i32
  }
  func.func @transform_31(%arg0: i32) -> (i32, i32) {
    %c0_i32 = arith.constant 0 : i32
    %c0_i32_0 = arith.constant 0 : i32
    %c0_i32_1 = arith.constant 0 : i32
    return %c0_i32, %c0_i32_0 : i32, i32
  }
  func.func @transform_32(%arg0: i32) -> (i32, i32, i32) {
    %c0_i32 = arith.constant 0 : i32
    %c0_i32_0 = arith.constant 0 : i32
    %c0_i32_1 = arith.constant 0 : i32
    return %arg0, %c0_i32, %c0_i32_0 : i32, i32, i32
  }
  func.func @transform_33(%arg0: i32) -> (i32, i32, i32) {
    %c0_i32 = arith.constant 0 : i32
    %c0_i32_0 = arith.constant 0 : i32
    %c0_i32_1 = arith.constant 0 : i32
    return %arg0, %c0_i32, %c0_i32_0 : i32, i32, i32
  }
}

</mosaic_0001>

<bundles_post_ra>
// kernel: vision_lnn_forward.1
= control target key start
LH: loop header
LB: loop body
LE: loop exit
PB: predicated region body
PF: predicated region fallthrough
CT: control target
= control target key end

     0   :  { %s7127_s6 = smov 1   ;;  %s7128_s10 = smov 2   ;;  %s7986_s0 = inlined_call_operand.smem [shape: u32[34], index: -1, kind: input, shape index: {}] }
   0x1   :  { %s7193_s5 = sld [smem:[%s7986_s0]]   ;;  %s7129_s14 = smov 3  }
   0x2   :  { %s7198_s9 = sld [smem:[%s7986_s0 + %s7127_s6]]   ;;  %s7130_s18 = smov 4  }
   0x3   :  { %s7203_s13 = sld [smem:[%s7986_s0 + %s7128_s10]]   ;;  %s7131_s22 = smov 5  }
   0x4   :  { %s7208_s17 = sld [smem:[%s7986_s0 + %s7129_s14]]   ;;  %s7132_s26 = smov 6  }
   0x5   :  { %s7213_s21 = sld [smem:[%s7986_s0 + %s7130_s18]]   ;;  %s7133_s30 = smov 7  }
   0x6   :  { %s7218_s25 = sld [smem:[%s7986_s0 + %s7131_s22]]   ;;  %s7134_s4 = smov 8  }
   0x7   :  { %8014 = sst [smem:[#allocation40_spill]] %s7193_s5  ;;  %s7135_s10 = smov 9  }
   0x8   :  { %8015 = sst [smem:[#allocation41_spill]] %s7198_s9  ;;  %s7136_s15 = smov 10  }
   0x9   :  { %8016 = sst [smem:[#allocation42_spill]] %s7203_s13  ;;  %s7137_s20 = smov 11  }
   0xa   :  { %8017 = sst [smem:[#allocation43_spill]] %s7208_s17  ;;  %s7139_s1 = smov 13  }
   0xb   :  { %s7223_s29 = sld [smem:[%s7986_s0 + %s7132_s26]]   ;;  %s7138_s26 = smov 12  }
   0xc   :  { %8018 = sst [smem:[#allocation44_spill]] %s7218_s25  ;;  %s7140_s7 = smov 14  }
   0xd   :  { %s7228_s3 = sld [smem:[%s7986_s0 + %s7133_s30]]   ;;  %s7142_s22 = smov 16  }
   0xe   :  { %s7233_s8 = sld [smem:[%s7986_s0 + %s7134_s4]]   ;;  %s7143_s28 = smov 17  }
   0xf   :  { %s7238_s14 = sld [smem:[%s7986_s0 + %s7135_s10]]  }
  0x10   :  { %s7243_s19 = sld [smem:[%s7986_s0 + %s7136_s15]]   ;;  %s7141_s15 = smov 15  }
  0x11   :  { %s7248_s24 = sld [smem:[%s7986_s0 + %s7137_s20]]  }
  0x12   :  { %s7253_s30 = sld [smem:[%s7986_s0 + %s7138_s26]]  }
  0x13   :  { %8019 = sst [smem:[#allocation45_spill]] %s7228_s3 }
  0x14   :  { %s7258_s6 = sld [smem:[%s7986_s0 + %s7139_s1]]  }
  0x15   :  { %8020 = sst [smem:[#allocation46_spill]] %s7238_s14 }
  0x16   :  { %s7263_s12 = sld [smem:[%s7986_s0 + %s7140_s7]]   ;;  %s7144_s7 = smov 18  }
  0x17   :  { %8021 = sst [smem:[#allocation47_spill]] %s7248_s24 }
  0x18   :  { %8022 = sst [smem:[#allocation48_spill]] %s7253_s30 }
  0x19   :  { %s7268_s20 = sld [smem:[%s7986_s0 + %s7141_s15]]   ;;  %s7145_s15 = smov 19  }
  0x1a   :  { %8023 = sst [smem:[#allocation49_spill]] %s7258_s6 }
  0x1b   :  { %s7273_s27 = sld [smem:[%s7986_s0 + %s7142_s22]]   ;;  %s7146_s22 = smov 20  }
  0x1c   :  { %s7278_s4 = sld [smem:[%s7986_s0 + %s7143_s28]]   ;;  %s7147_s28 = smov 21  }
  0x1d   :  { %s7283_s13 = sld [smem:[%s7986_s0 + %s7144_s7]]   ;;  %s7148_s7 = smov 22  }
  0x1e   :  { %s7288_s17 = sld [smem:[%s7986_s0 + %s7145_s15]]   ;;  %s7149_s15 = smov 23  }
  0x1f   :  { %8024 = sst [smem:[#allocation50_spill]] %s7268_s20 }
  0x20   :  { %s7293_s9 = sld [smem:[%s7986_s0 + %s7146_s22]]   ;;  %s7150_s22 = smov 24  }
  0x21   :  { %8025 = sst [smem:[#allocation51_spill]] %s7273_s27 }
  0x22   :  { %8026 = sst [smem:[#allocation52_spill]] %s7278_s4 }
  0x23   :  { %8027 = sst [smem:[#allocation53_spill]] %s7283_s13 }
  0x24   :  { %s7298_s20 = sld [smem:[%s7986_s0 + %s7147_s28]]   ;;  %s7151_s28 = smov 25  }
  0x25   :  { %s7303_s13 = sld [smem:[%s7986_s0 + %s7148_s7]]   ;;  %s7152_s7 = smov 26  }
  0x26   :  { %8028 = sst [smem:[#allocation54_spill]] %s7293_s9 }
  0x27   :  { %s7308_s27 = sld [smem:[%s7986_s0 + %s7149_s15]]   ;;  %s7153_s15 = smov 27  }
  0x28   :  { %s7313_s9 = sld [smem:[%s7986_s0 + %s7150_s22]]   ;;  %s7154_s22 = smov 28  }
  0x29   :  { %s7323_s6 = sld [smem:[%s7986_s0 + %s7152_s7]]   ;;  %s7156_s7 = smov 30  }
  0x2a   :  { %8029 = sst [smem:[#allocation55_spill]] %s7298_s20 }
  0x2b   :  { %s7318_s20 = sld [smem:[%s7986_s0 + %s7151_s28]]   ;;  %s7155_s28 = smov 29  }
  0x2c   :  { %s7328_s30 = sld [smem:[%s7986_s0 + %s7153_s15]]   ;;  %s7157_s15 = smov 31  }
  0x2d   :  { %s7333_s3 = sld [smem:[%s7986_s0 + %s7154_s22]]   ;;  %s7158_s22 = smov 32  }
  0x2e   :  { %s7338_s25 = sld [smem:[%s7986_s0 + %s7155_s28]]   ;;  %s7159_s28 = smov 33  }
  0x2f   :  { %8031 = sst [smem:[#allocation57_spill]] %s7323_s6 }
  0x30   :  { %s7343_s5 = sld [smem:[%s7986_s0 + %s7156_s7]]  }
  0x31   :  { %8030 = sst [smem:[#allocation56_spill]] %s7318_s20 }
  0x32   :  { %8032 = sst [smem:[#allocation58_spill]] %s7328_s30 }
  0x33   :  { %8033 = sst [smem:[#allocation59_spill]] %s7333_s3 }
  0x34   :  { %s7348_s30 = sld [smem:[%s7986_s0 + %s7157_s15]]  }
  0x35   :  { %s7353_s3 = sld [smem:[%s7986_s0 + %s7158_s22]]  }
  0x36   :  { %8034 = sst [smem:[#allocation60_spill]] %s7343_s5 }
  0x37   :  { %s7358_s20 = sld [smem:[%s7986_s0 + %s7159_s28]]  }
  0x3d   :  { %8035 = sst [smem:[#allocation61_spill]] %s7358_s20 }
  0x3e   :  { %73 = vsyncpa [#allocation3], 0 }
  0x3f   :  { %74 = vsyncpa [#allocation6], 0 }
  0x40   :  { %75 = vsyncpa [#allocation9], 0 }
  0x41   :  { %76 = vsyncpa [#allocation12], 0 }
  0x42   :  { %77 = vsyncpa [#allocation15], 0 }
  0x43   :  { %78 = vsyncpa [#allocation18], 0 }
  0x44   :  { %79 = vsyncpa [#allocation21], 0 }
  0x45   :  { %80 = vsyncpa [#allocation24], 0 }
  0x46   :  { %81 = vsyncpa [#allocation27], 0 }
  0x47   :  { %82 = vsyncpa [#allocation4], 0 }
  0x48   :  { %84 = vsyncpa [#allocation4 + $0x1], 0  ;;  %s7360_s7 = smov 0   ;;  %s7362_s10 = smov 0  }
  0x49   :  { %s7364_s11 = smov 0   ;;  %s7366_s15 = smov 0  }
  0x4a LB: > { %s8036_s5 = sld [smem:[#allocation60_spill]]  ;;  %s7381_s0 = sadd.s32 4294967295, %s7125_s15   ;;  %s7113_s7 = sphi %s7360_s7, %s8080_s7   ;;  %s7125_s15 = sphi %s7366_s15, %s8077_s15   ;;  %s7121_s11 = sphi %s7364_s11, %s8079_s11   ;;  %s7117_s10 = sphi %s7362_s10, %s8081_s10  }
  0x4b   : > { %s8037_s6 = sld [smem:[#allocation57_spill]]  ;;  %s4767_s16 = sadd.s32 4294967294, %s7125_s15  }
  0x4c   : > { %s8038_s4 = sld [smem:[#allocation52_spill]]  ;;  %s7385_s18 = sadd.s32 1, %s7125_s15  }
  0x4d   : > { %s8039_s24 = sld [smem:[#allocation47_spill]]  ;;  %s789_s22 = sadd.s32 1, %s7121_s11 }
  0x4e   : > { %s8040_s14 = sld [smem:[#allocation46_spill]]  ;;  %s786_s23 = ssub.s32 %s7125_s15, %s7385_s18 }
  0x4f   : > { %8041 = sst [smem:[#allocation62_spill]] %s7113_s7  ;;  %p799_p0 = scmp.ne.s32.totalorder %s7121_s11, %s7117_s10 }
  0x50   : > { %8042 = sst [smem:[#allocation63_spill]] %s7121_s11  ;;  %p787_p1 = scmp.eq.s32.totalorder %s786_s23, 0 }
  0x51   : > { %8043 = sst [smem:[#allocation64_spill]] %s7125_s15  ;;  %p800_p2 = scmp.eq.s32.totalorder %s7381_s0, 1 }
  0x52   : > { %8044 = sst [smem:[#allocation65_spill]] %s7385_s18  ;;  %p805_p3 = scmp.ne.s32.totalorder %s7117_s10, %s7113_s7 }
  0x53   : > { %p806_p4 = scmp.eq.s32.totalorder %s4767_s16, 1  ;;  %p7398_p5 = por %p800_p2, %p799_p0 }
  0x54   : > { %s7396_s26 = scalar_select %p787_p1, %s7121_s11, %s789_s22  }
  0x55   : > { %s8046_s28 = scalar_select %p7398_p5, 1, 0 }
  0x56   : > { %8045 = sst [smem:[#allocation66_spill]] %s7396_s26  ;;  %p7402_p6 = por %p806_p4, %p805_p3 }
  0x57   : > { %8047 = sst [smem:[#allocation67_spill]] %s8046_s28  ;;  %p4768_p7 = scmp.ge.s32.totalorder %s7125_s15, 1 }
  0x58   : > { %s8048_s1 = scalar_select %p7402_p6, 1, 0 }
  0x59   : > { %p839_p8 = scmp.lt.s32.totalorder %s7125_s15, 3  ;;  %p6383_p9 = scmp.eq.s32.totalorder %s7381_s0, 0 }
  0x5a   : > { %8049 = sst [smem:[#allocation68_spill]] %s8048_s1  ;;  %s868_s23 = sshll.u32 %s7223_s29, 4  ;;  %s869_s23 = int_to_ptr.hbm [resolvable:$true] %s868_s23 }
  0x5b   : > { %p7409_p10 = pnand %p4768_p7, %p839_p8  ;;  %s7160_s16 = smov [#allocation5]  }
  0x5c   : > { %s870_s22 = sshll.u32 %s7160_s16, 4  ;;  %s897_s26 = sshll.u32 %s8040_s14, 4  ;;  %s871_s22 = int_to_ptr.vmem [resolvable:$true] %s870_s22  ;;  %s7423_s26 = int_to_ptr.hbm [resolvable:$true] %s897_s26 }
  0x5d   : > { %p6327_p11 = pneg %p7409_p10  ;;  %s7161_s18 = smov [#allocation8]  }
  0x5e   : > { %s7425_s1 = sshll.u32 %s7161_s18, 4  ;;  %s6517_s7 = sshra.s32 %s869_s23, 4  ;;  %s6518_s7 = int_to_ptr.hbm [resolvable:$true] %s6517_s7  ;;  %s900_s1 = int_to_ptr.vmem [resolvable:$true] %s7425_s1 }
  0x5f   : > { %p7419_p12 = pnand %p6383_p9, %p6327_p11  ;;  %s6519_s15 = scalar_lea.hbm %s6518_s7, 2 }
  0x60   : > { %p6520_p13 = scmp.ne.s32.totalorder %s6518_s7, %s6519_s15  ;;  %s6524_s20 = scalar_lea.hbm %s7223_s29, 2 }
  0x61   : > { %p7429_p0 = pneg %p7419_p12  ;;  %p6525_p3 = scmp.lt.s32.totalorder %s6518_s7, %s7223_s29 }
  0x62   : > { %p6526_p4 = scmp.lt.s32.totalorder %s6524_s20, %s6519_s15 }
  0x63   : > { %p6522_p1 = pnand %p7429_p0, %p6520_p13 }
  0x64   : > { %p6527_p7 = por %p6526_p4, %p6525_p3 }
  0x65   : > { %p6523_p2 = pneg %p6522_p1 }
  0x67   : > { %p6528_p8 = pnand %p6527_p7, %p6523_p2 }
  0x69   : > { %6531 = shalt.err (!%p6528_p8)
}
  0x6a   : > { %6333 = dma.hbm_to_vmem [thread:$0]  (!%p7419_p12), %s869_s23, 32, %s871_s22, [#allocation6]  }
  0x6b   : > { %s6547_s18 = sshra.s32 %s7423_s26, 4  ;;  %s6554_s20 = scalar_lea.hbm %s8040_s14, 2  ;;  %s6548_s18 = int_to_ptr.hbm [resolvable:$true] %s6547_s18 }
  0x6c   : > { %s6549_s28 = scalar_lea.hbm %s6548_s18, 2  ;;  %p6555_p3 = scmp.lt.s32.totalorder %s6548_s18, %s8040_s14 }
  0x6d   : > { %p6550_p11 = scmp.ne.s32.totalorder %s6548_s18, %s6549_s28  ;;  %p6556_p2 = scmp.lt.s32.totalorder %s6554_s20, %s6549_s28 }
  0x6f   : > { %p6552_p13 = pnand %p6550_p11, %p7429_p0  ;;  %p6557_p4 = por %p6556_p2, %p6555_p3 }
  0x71   : > { %p6553_p1 = pneg %p6552_p13 }
  0x73   : > { %p6558_p7 = pnand %p6557_p4, %p6553_p1 }
  0x75   : > { %6561 = shalt.err (!%p6558_p7)
}
  0x76   : > { %6339 = dma.hbm_to_vmem [thread:$0]  (!%p7419_p12), %s7423_s26, 32, %s900_s1, [#allocation9]  }
  0x77   : > { %s922_s7 = sshll.u32 %s8039_s24, 4  ;;  %s7162_s15 = smov [#allocation11]   ;;  %s923_s7 = int_to_ptr.hbm [resolvable:$true] %s922_s7 }
  0x78   : > { %s924_s23 = sshll.u32 %s7162_s15, 4  ;;  %s963_s22 = sshll.u32 %s8038_s4, 4  ;;  %s925_s23 = int_to_ptr.vmem [resolvable:$true] %s924_s23  ;;  %s964_s22 = int_to_ptr.hbm [resolvable:$true] %s963_s22 }
  0x79   : > { %s6577_s18 = sshra.s32 %s923_s7, 4  ;;  %s6584_s20 = scalar_lea.hbm %s8039_s24, 288  ;;  %s6578_s18 = int_to_ptr.hbm [resolvable:$true] %s6577_s18 }
  0x7a   : > { %s6579_s28 = scalar_lea.hbm %s6578_s18, 288  ;;  %p6585_p1 = scmp.lt.s32.totalorder %s6578_s18, %s8039_s24 }
  0x7b   : > { %p6580_p8 = scmp.ne.s32.totalorder %s6578_s18, %s6579_s28  ;;  %p6586_p3 = scmp.lt.s32.totalorder %s6584_s20, %s6579_s28 }
  0x7d   : > { %p6582_p11 = pnand %p6580_p8, %p7429_p0  ;;  %p6587_p2 = por %p6586_p3, %p6585_p1 }
  0x7f   : > { %p6583_p13 = pneg %p6582_p11 }
  0x81   : > { %p6588_p4 = pnand %p6587_p2, %p6583_p13 }
  0x83   : > { %6591 = shalt.err (!%p6588_p4)
}
  0x84   : > { %s8005_s26 = smov 64   ;;  %s8007_s1 = smov 4  }
  0x85   : > { %6345 = dma.hbm_to_vmem [thread:$0]  (!%p7419_p12), %s923_s7, 4608, %s925_s23, [#allocation12], %s8005_s26, %s8005_s26, %s8007_s1  }
  0x86   : > { %s7165_s15 = smov [#allocation14]   ;;  %s996_s18 = sshll.u32 %s7303_s13, 4  ;;  %s7460_s18 = int_to_ptr.hbm [resolvable:$true] %s996_s18 }
  0x87   : > { %s965_s14 = sshll.u32 %s7165_s15, 4  ;;  %s6607_s28 = sshra.s32 %s964_s22, 4  ;;  %s966_s14 = int_to_ptr.vmem [resolvable:$true] %s965_s14  ;;  %s6608_s28 = int_to_ptr.hbm [resolvable:$true] %s6607_s28 }
  0x88   : > { %s6609_s20 = scalar_lea.hbm %s6608_s28, 1  ;;  %s6614_s24 = scalar_lea.hbm %s8038_s4, 1 }
  0x89   : > { %p6610_p7 = scmp.ne.s32.totalorder %s6608_s28, %s6609_s20  ;;  %p6615_p13 = scmp.lt.s32.totalorder %s6608_s28, %s8038_s4 }
  0x8a   : > { %p6616_p1 = scmp.lt.s32.totalorder %s6614_s24, %s6609_s20 }
  0x8b   : > { %p6612_p8 = pnand %p6610_p7, %p7429_p0 }
  0x8c   : > { %p6617_p3 = por %p6616_p1, %p6615_p13 }
  0x8d   : > { %p6613_p11 = pneg %p6612_p8 }
  0x8f   : > { %p6618_p2 = pnand %p6617_p3, %p6613_p11 }
  0x91   : > { %6621 = shalt.err (!%p6618_p2)
}
  0x92   : > { %6351 = dma.hbm_to_vmem [thread:$0]  (!%p7419_p12), %s964_s22, 16, %s966_s14, [#allocation15]  }
  0x93   : > { %s1022_s7 = sshll.u32 %s7313_s9, 4  ;;  %s7166_s23 = smov [#allocation17]   ;;  %s7469_s7 = int_to_ptr.hbm [resolvable:$true] %s1022_s7 }
  0x94   : > { %s998_s15 = sshll.u32 %s7166_s23, 4  ;;  %s6637_s26 = sshra.s32 %s7460_s18, 4  ;;  %s999_s15 = int_to_ptr.vmem [resolvable:$true] %s998_s15  ;;  %s6638_s26 = int_to_ptr.hbm [resolvable:$true] %s6637_s26 }
  0x95   : > { %s6639_s24 = scalar_lea.hbm %s6638_s26, 2  ;;  %s6644_s28 = scalar_lea.hbm %s7303_s13, 2 }
  0x96   : > { %p6640_p4 = scmp.ne.s32.totalorder %s6638_s26, %s6639_s24  ;;  %p6645_p11 = scmp.lt.s32.totalorder %s6638_s26, %s7303_s13 }
  0x97   : > { %p6646_p13 = scmp.lt.s32.totalorder %s6644_s28, %s6639_s24 }
  0x98   : > { %p6642_p7 = pnand %p6640_p4, %p7429_p0 }
  0x99   : > { %p6647_p1 = por %p6646_p13, %p6645_p11 }
  0x9a   : > { %p6643_p8 = pneg %p6642_p7 }
  0x9c   : > { %p6648_p3 = pnand %p6647_p1, %p6643_p8 }
  0x9e   : > { %6651 = shalt.err (!%p6648_p3)
}
  0x9f   : > { %6357 = dma.hbm_to_vmem [thread:$0]  (!%p7419_p12), %s7460_s18, 32, %s999_s15, [#allocation18]  }
  0xa0   : > { %s7167_s14 = smov [#allocation20]   ;;  %s1046_s20 = sshll.u32 %s8037_s6, 4  ;;  %s7480_s20 = int_to_ptr.hbm [resolvable:$true] %s1046_s20 }
  0xa1   : > { %s1024_s22 = sshll.u32 %s7167_s14, 4  ;;  %s6667_s26 = sshra.s32 %s7469_s7, 4  ;;  %s1025_s22 = int_to_ptr.vmem [resolvable:$true] %s1024_s22  ;;  %s6668_s26 = int_to_ptr.hbm [resolvable:$true] %s6667_s26 }
  0xa2   : > { %s6669_s23 = scalar_lea.hbm %s6668_s26, 1  ;;  %s6674_s24 = scalar_lea.hbm %s7313_s9, 1 }
  0xa3   : > { %p6670_p2 = scmp.ne.s32.totalorder %s6668_s26, %s6669_s23  ;;  %p6675_p8 = scmp.lt.s32.totalorder %s6668_s26, %s7313_s9 }
  0xa4   : > { %p6676_p11 = scmp.lt.s32.totalorder %s6674_s24, %s6669_s23 }
  0xa5   : > { %p6672_p4 = pnand %p6670_p2, %p7429_p0 }
  0xa6   : > { %p6677_p13 = por %p6676_p11, %p6675_p8 }
  0xa7   : > { %p6673_p7 = pneg %p6672_p4 }
  0xa9   : > { %p6678_p1 = pnand %p6677_p13, %p6673_p7 }
  0xab   : > { %6681 = shalt.err (!%p6678_p1)
}
  0xac   : > { %6363 = dma.hbm_to_vmem [thread:$0]  (!%p7419_p12), %s7469_s7, 16, %s1025_s22, [#allocation21]  }
  0xad   : > { %s1073_s18 = sshll.u32 %s7338_s25, 4  ;;  %s7168_s15 = smov [#allocation23]   ;;  %s7491_s18 = int_to_ptr.hbm [resolvable:$true] %s1073_s18 }
  0xae   : > { %s1048_s28 = sshll.u32 %s7168_s15, 4  ;;  %s6697_s14 = sshra.s32 %s7480_s20, 4  ;;  %s1049_s28 = int_to_ptr.vmem [resolvable:$true] %s1048_s28  ;;  %s6698_s14 = int_to_ptr.hbm [resolvable:$true] %s6697_s14 }
  0xaf   : > { %s6699_s26 = scalar_lea.hbm %s6698_s14, 1  ;;  %s6704_s23 = scalar_lea.hbm %s8037_s6, 1 }
  0xb0   : > { %p6700_p3 = scmp.ne.s32.totalorder %s6698_s14, %s6699_s26  ;;  %p6705_p7 = scmp.lt.s32.totalorder %s6698_s14, %s8037_s6 }
  0xb1   : > { %p6706_p8 = scmp.lt.s32.totalorder %s6704_s23, %s6699_s26 }
  0xb2   : > { %p6702_p2 = pnand %p6700_p3, %p7429_p0 }
  0xb3   : > { %p6707_p11 = por %p6706_p8, %p6705_p7 }
  0xb4   : > { %p6703_p4 = pneg %p6702_p2 }
  0xb6   : > { %p6708_p13 = pnand %p6707_p11, %p6703_p4 }
  0xb8   : > { %6711 = shalt.err (!%p6708_p13)
}
  0xb9   : > { %6369 = dma.hbm_to_vmem [thread:$0]  (!%p7419_p12), %s7480_s20, 16, %s1049_s28, [#allocation24]  }
  0xba   : > { %s7169_s7 = smov [#allocation26]   ;;  %s850_s24 = sshll.u32 %s7213_s21, 4  ;;  %s7502_s24 = int_to_ptr.hbm [resolvable:$true] %s850_s24 }
  0xbb   : > { %s1075_s22 = sshll.u32 %s7169_s7, 4  ;;  %s6727_s15 = sshra.s32 %s7491_s18, 4  ;;  %s1076_s22 = int_to_ptr.vmem [resolvable:$true] %s1075_s22  ;;  %s6728_s15 = int_to_ptr.hbm [resolvable:$true] %s6727_s15 }
  0xbc   : > { %s6729_s14 = scalar_lea.hbm %s6728_s15, 2  ;;  %s6734_s26 = scalar_lea.hbm %s7338_s25, 2 }
  0xbd   : > { %p6730_p1 = scmp.ne.s32.totalorder %s6728_s15, %s6729_s14  ;;  %p6735_p4 = scmp.lt.s32.totalorder %s6728_s15, %s7338_s25 }
  0xbe   : > { %p6736_p7 = scmp.lt.s32.totalorder %s6734_s26, %s6729_s14 }
  0xbf   : > { %p6732_p3 = pnand %p6730_p1, %p7429_p0 }
  0xc0   : > { %p6737_p8 = por %p6736_p7, %p6735_p4 }
  0xc1   : > { %p6733_p2 = pneg %p6732_p3 }
  0xc3   : > { %p6738_p11 = pnand %p6737_p8, %p6733_p2 }
  0xc5   : > { %6741 = shalt.err (!%p6738_p11)
}
  0xc6   : > { %6375 = dma.hbm_to_vmem [thread:$0]  (!%p7419_p12), %s7491_s18, 32, %s1076_s22, [#allocation27]  }
  0xc7   : > { %s882_s20 = sshll.u32 %s7233_s8, 4  ;;  %s7170_s28 = smov [#allocation2]   ;;  %s7513_s20 = int_to_ptr.hbm [resolvable:$true] %s882_s20 }
  0xc8   : > { %s852_s23 = sshll.u32 %s7170_s28, 4  ;;  %s6757_s7 = sshra.s32 %s7502_s24, 4  ;;  %s853_s23 = int_to_ptr.vmem [resolvable:$true] %s852_s23  ;;  %s6758_s7 = int_to_ptr.hbm [resolvable:$true] %s6757_s7 }
  0xc9   : > { %s6759_s15 = scalar_lea.hbm %s6758_s7, 40  ;;  %s6764_s14 = scalar_lea.hbm %s7213_s21, 40 }
  0xca   : > { %p6760_p13 = scmp.ne.s32.totalorder %s6758_s7, %s6759_s15  ;;  %p6765_p2 = scmp.lt.s32.totalorder %s6758_s7, %s7213_s21 }
  0xcb   : > { %p6766_p4 = scmp.lt.s32.totalorder %s6764_s14, %s6759_s15 }
  0xcc   : > { %p6762_p1 = pnand %p6760_p13, %p7429_p0 }
  0xcd   : > { %p6767_p7 = por %p6766_p4, %p6765_p2 }
  0xce   : > { %p6763_p3 = pneg %p6762_p1 }
  0xd0   : > { %p6768_p8 = pnand %p6767_p7, %p6763_p3 }
  0xd2   : > { %6771 = shalt.err (!%p6768_p8)
}
  0xd3   : > { %s8053_s18 = smov 64   ;;  %s7171_s22 = smov [#allocation7]  }
  0xd4   : > { %6330 = dma.hbm_to_vmem [thread:$0]  (!%p7419_p12), %s7502_s24, 640, %s853_s23, [#allocation3], %s8053_s18, %s8053_s18, %s8007_s1  }
  0xd5   : > { %s884_s26 = sshll.u32 %s7171_s22, 4  ;;  %s6787_s28 = sshra.s32 %s7513_s20, 4  ;;  %s885_s26 = int_to_ptr.vmem [resolvable:$true] %s884_s26  ;;  %s6788_s28 = int_to_ptr.hbm [resolvable:$true] %s6787_s28 }
  0xd6   : > { %s6789_s7 = scalar_lea.hbm %s6788_s28, 960  ;;  %s6794_s15 = scalar_lea.hbm %s7233_s8, 960 }
  0xd7   : > { %p6790_p11 = scmp.ne.s32.totalorder %s6788_s28, %s6789_s7  ;;  %p6795_p3 = scmp.lt.s32.totalorder %s6788_s28, %s7233_s8 }
  0xd8   : > { %p6796_p2 = scmp.lt.s32.totalorder %s6794_s15, %s6789_s7 }
  0xd9   : > { %p6792_p13 = pnand %p6790_p11, %p7429_p0 }
  0xda   : > { %p6797_p4 = por %p6796_p2, %p6795_p3 }
  0xdb   : > { %p6793_p1 = pneg %p6792_p13 }
  0xdd   : > { %p6798_p7 = pnand %p6797_p4, %p6793_p1 }
  0xdf   : > { %6801 = shalt.err (!%p6798_p7)
}
  0xe0   : > { %s7172_s14 = smov 128   ;;  %s7173_s24 = smov 8  }
  0xe1   : > { %6336 = dma.hbm_to_vmem [thread:$0]  (!%p7419_p12), %s7513_s20, 15360, %s885_s26, [#allocation6], %s7172_s14, %s7172_s14, %s7173_s24  }
  0xe2   : > { %s908_s23 = sshll.u32 %s7243_s19, 4  ;;  %s7174_s22 = smov [#allocation10]   ;;  %s909_s23 = int_to_ptr.hbm [resolvable:$true] %s908_s23 }
  0xe3   : > { %s910_s1 = sshll.u32 %s7174_s22, 4  ;;  %s942_s28 = sshll.u32 %s7263_s12, 4  ;;  %s911_s1 = int_to_ptr.vmem [resolvable:$true] %s910_s1  ;;  %s943_s28 = int_to_ptr.hbm [resolvable:$true] %s942_s28 }
  0xe4   : > { %s6817_s7 = sshra.s32 %s909_s23, 4  ;;  %s6824_s4 = scalar_lea.hbm %s7243_s19, 6  ;;  %s6818_s7 = int_to_ptr.hbm [resolvable:$true] %s6817_s7 }
  0xe5   : > { %s6819_s15 = scalar_lea.hbm %s6818_s7, 6  ;;  %p6825_p1 = scmp.lt.s32.totalorder %s6818_s7, %s7243_s19 }
  0xe6   : > { %p6820_p8 = scmp.ne.s32.totalorder %s6818_s7, %s6819_s15  ;;  %p6826_p3 = scmp.lt.s32.totalorder %s6824_s4, %s6819_s15 }
  0xe8   : > { %p6822_p11 = pnand %p6820_p8, %p7429_p0  ;;  %p6827_p2 = por %p6826_p3, %p6825_p1 }
  0xea   : > { %p6823_p13 = pneg %p6822_p11 }
  0xec   : > { %p6828_p4 = pnand %p6827_p2, %p6823_p13 }
  0xee   : > { %6831 = shalt.err (!%p6828_p4)
}
  0xef   : > { %s7175_s20 = smov 32   ;;  %s7176_s26 = smov 2  }
  0xf0   : > { %6342 = dma.hbm_to_vmem [thread:$0]  (!%p7419_p12), %s909_s23, 96, %s911_s1, [#allocation9], %s7175_s20, %s7175_s20, %s7176_s26  }
  0xf1   : > { %s7177_s14 = smov [#allocation13]   ;;  %s978_s22 = sshll.u32 %s7288_s17, 4  ;;  %s7543_s22 = int_to_ptr.hbm [resolvable:$true] %s978_s22 }
  0xf2   : > { %s944_s24 = sshll.u32 %s7177_s14, 4  ;;  %s6847_s4 = sshra.s32 %s943_s28, 4  ;;  %s945_s24 = int_to_ptr.vmem [resolvable:$true] %s944_s24  ;;  %s6848_s4 = int_to_ptr.hbm [resolvable:$true] %s6847_s4 }
  0xf3   : > { %s6849_s7 = scalar_lea.hbm %s6848_s4, 48  ;;  %s6854_s15 = scalar_lea.hbm %s7263_s12, 48 }
  0xf4   : > { %p6850_p7 = scmp.ne.s32.totalorder %s6848_s4, %s6849_s7  ;;  %p6855_p13 = scmp.lt.s32.totalorder %s6848_s4, %s7263_s12 }
  0xf5   : > { %p6856_p1 = scmp.lt.s32.totalorder %s6854_s15, %s6849_s7 }
  0xf6   : > { %p6852_p8 = pnand %p6850_p7, %p7429_p0 }
  0xf7   : > { %p6857_p3 = por %p6856_p1, %p6855_p13 }
  0xf8   : > { %p6853_p11 = pneg %p6852_p8 }
  0xfa   : > { %p6858_p2 = pnand %p6857_p3, %p6853_p11 }
  0xfc   : > { %6861 = shalt.err (!%p6858_p2)
}
  0xfd   : > { %s8054_s1 = smov 4   ;;  %s1007_s23 = sshll.u32 %s7308_s27, 4  ;;  %s7555_s23 = int_to_ptr.hbm [resolvable:$true] %s1007_s23 }
  0xfe   : > { %6348 = dma.hbm_to_vmem [thread:$0]  (!%p7419_p12), %s943_s28, 768, %s945_s24, [#allocation12], %s8053_s18, %s8053_s18, %s8054_s1  }
  0xff   : > { %s7178_s20 = smov [#allocation16]   ;;  %s6877_s14 = sshra.s32 %s7543_s22, 4  ;;  %s6878_s14 = int_to_ptr.hbm [resolvable:$true] %s6877_s14 }
 0x100   : > { %s980_s26 = sshll.u32 %s7178_s20, 4  ;;  %s6879_s4 = scalar_lea.hbm %s6878_s14, 1  ;;  %s981_s26 = int_to_ptr.vmem [resolvable:$true] %s980_s26 }
 0x101   : > { %p6880_p4 = scmp.ne.s32.totalorder %s6878_s14, %s6879_s4  ;;  %s6884_s7 = scalar_lea.hbm %s7288_s17, 1 }
 0x102   : > { %p6885_p11 = scmp.lt.s32.totalorder %s6878_s14, %s7288_s17  ;;  %p6886_p13 = scmp.lt.s32.totalorder %s6884_s7, %s6879_s4 }
 0x103   : > { %p6882_p7 = pnand %p6880_p4, %p7429_p0 }
 0x104   : > { %p6887_p1 = por %p6886_p13, %p6885_p11 }
 0x105   : > { %p6883_p8 = pneg %p6882_p7 }
 0x107   : > { %p6888_p3 = pnand %p6887_p1, %p6883_p8 }
 0x109   : > { %6891 = shalt.err (!%p6888_p3)
}
 0x10a   : > { %s8055_s28 = sld [smem:[#allocation56_spill]]  ;;  %s7179_s24 = smov [#allocation19]  }
 0x10b   : > { %6354 = dma.hbm_to_vmem [thread:$0]  (!%p7419_p12), %s7543_s22, 16, %s981_s26, [#allocation15]  }
 0x10c   : > { %s1009_s15 = sshll.u32 %s7179_s24, 4  ;;  %s6907_s14 = sshra.s32 %s7555_s23, 4  ;;  %s1010_s15 = int_to_ptr.vmem [resolvable:$true] %s1009_s15  ;;  %s6908_s14 = int_to_ptr.hbm [resolvable:$true] %s6907_s14 }
 0x10d   : > { %s6909_s4 = scalar_lea.hbm %s6908_s14, 64  ;;  %s6914_s7 = scalar_lea.hbm %s7308_s27, 64 }
 0x10e   : > { %p6910_p2 = scmp.ne.s32.totalorder %s6908_s14, %s6909_s4  ;;  %p6915_p8 = scmp.lt.s32.totalorder %s6908_s14, %s7308_s27 }
 0x10f   : > { %p6916_p11 = scmp.lt.s32.totalorder %s6914_s7, %s6909_s4 }
 0x110   : > { %s1034_s20 = sshll.u32 %s8055_s28, 4  ;;  %p6912_p4 = pnand %p6910_p2, %p7429_p0  ;;  %s7566_s20 = int_to_ptr.hbm [resolvable:$true] %s1034_s20 }
 0x111   : > { %p6917_p13 = por %p6916_p11, %p6915_p8 }
 0x112   : > { %p6913_p7 = pneg %p6912_p4 }
 0x114   : > { %p6918_p1 = pnand %p6917_p13, %p6913_p7 }
 0x116   : > { %6921 = shalt.err (!%p6918_p1)
}
 0x117   : > { %s8056_s22 = sld [smem:[#allocation58_spill]]  ;;  %s7180_s24 = smov [#allocation22]  }
 0x118   : > { %6360 = dma.hbm_to_vmem [thread:$0]  (!%p7419_p12), %s7555_s23, 1024, %s1010_s15, [#allocation18], %s8053_s18, %s8053_s18, %s8054_s1  }
 0x119   : > { %s1036_s6 = sshll.u32 %s7180_s24, 4  ;;  %s6937_s14 = sshra.s32 %s7566_s20, 4  ;;  %s1037_s6 = int_to_ptr.vmem [resolvable:$true] %s1036_s6  ;;  %s6938_s14 = int_to_ptr.hbm [resolvable:$true] %s6937_s14 }
 0x11a   : > { %s6939_s4 = scalar_lea.hbm %s6938_s14, 1  ;;  %s6944_s7 = scalar_lea.hbm %s8055_s28, 1 }
 0x11b   : > { %p6940_p3 = scmp.ne.s32.totalorder %s6938_s14, %s6939_s4  ;;  %p6945_p7 = scmp.lt.s32.totalorder %s6938_s14, %s8055_s28 }
 0x11c   : > { %p6946_p8 = scmp.lt.s32.totalorder %s6944_s7, %s6939_s4 }
 0x11d   : > { %s1058_s26 = sshll.u32 %s8056_s22, 4  ;;  %p6942_p2 = pnand %p6940_p3, %p7429_p0  ;;  %s7580_s26 = int_to_ptr.hbm [resolvable:$true] %s1058_s26 }
 0x11e   : > { %p6947_p11 = por %p6946_p8, %p6945_p7 }
 0x11f   : > { %p6943_p4 = pneg %p6942_p2 }
 0x121   : > { %p6948_p13 = pnand %p6947_p11, %p6943_p4 }
 0x123   : > { %6951 = shalt.err (!%p6948_p13)
}
 0x124   : > { %6366 = dma.hbm_to_vmem [thread:$0]  (!%p7419_p12), %s7566_s20, 16, %s1037_s6, [#allocation21]  }
 0x125   : > { %s7181_s18 = smov [#allocation25]   ;;  %s1088_s23 = sshll.u32 %s7348_s30, 4  ;;  %s1089_s23 = int_to_ptr.hbm [resolvable:$true] %s1088_s23 }
 0x126   : > { %s1060_s1 = sshll.u32 %s7181_s18, 4  ;;  %s6967_s15 = sshra.s32 %s7580_s26, 4  ;;  %s1061_s1 = int_to_ptr.vmem [resolvable:$true] %s1060_s1  ;;  %s6968_s15 = int_to_ptr.hbm [resolvable:$true] %s6967_s15 }
 0x127   : > { %s6969_s24 = scalar_lea.hbm %s6968_s15, 1  ;;  %s6974_s14 = scalar_lea.hbm %s8056_s22, 1 }
 0x128   : > { %p6970_p1 = scmp.ne.s32.totalorder %s6968_s15, %s6969_s24  ;;  %p6975_p4 = scmp.lt.s32.totalorder %s6968_s15, %s8056_s22 }
 0x129   : > { %p6976_p7 = scmp.lt.s32.totalorder %s6974_s14, %s6969_s24 }
 0x12a   : > { %p6972_p3 = pnand %p6970_p1, %p7429_p0 }
 0x12b   : > { %p6977_p8 = por %p6976_p7, %p6975_p4 }
 0x12c   : > { %p6973_p2 = pneg %p6972_p3 }
 0x12e   : > { %p6978_p11 = pnand %p6977_p8, %p6973_p2 }
 0x130   : > { %6981 = shalt.err (!%p6978_p11)
}
 0x131   : > { %6372 = dma.hbm_to_vmem [thread:$0]  (!%p7419_p12), %s7580_s26, 16, %s1061_s1, [#allocation24]  }
 0x132   : > { %s7182_s6 = smov [#allocation28]   ;;  %s6997_s4 = sshra.s32 %s1089_s23, 4  ;;  %s6998_s4 = int_to_ptr.hbm [resolvable:$true] %s6997_s4 }
 0x133   : > { %s1090_s20 = sshll.u32 %s7182_s6, 4  ;;  %s6999_s7 = scalar_lea.hbm %s6998_s4, 1  ;;  %s1091_s20 = int_to_ptr.vmem [resolvable:$true] %s1090_s20 }
 0x134   : > { %p7000_p13 = scmp.ne.s32.totalorder %s6998_s4, %s6999_s7  ;;  %s7004_s18 = scalar_lea.hbm %s7348_s30, 1 }
 0x135   : > { %p7005_p2 = scmp.lt.s32.totalorder %s6998_s4, %s7348_s30  ;;  %p7006_p4 = scmp.lt.s32.totalorder %s7004_s18, %s6999_s7 }
 0x136   : > { %p7002_p1 = pnand %p7000_p13, %p7429_p0 }
 0x137   : > { %p7007_p7 = por %p7006_p4, %p7005_p2 }
 0x138   : > { %p7003_p3 = pneg %p7002_p1 }
 0x13a   : > { %p7008_p8 = pnand %p7007_p7, %p7003_p3 }
 0x13c   : > { %7011 = shalt.err (!%p7008_p8)
}
 0x13d   : > { %6378 = dma.hbm_to_vmem [thread:$0]  (!%p7419_p12), %s1089_s23, 16, %s1091_s20, [#allocation27]  }
 0x13e   : > { %1129 = sbr.rel (%p7409_p10) target bundleno = 3119 (0xc2f), region = 148 }
 0x143   : > { %7072 = dma.done.wait (%p6383_p9), [#allocation3], 640  }
 0x144   : > { %7074 = vsyncadd (%p6383_p9), [#allocation3], 4294966656 }
 0x145   : > { %7076 = dma.done.wait (%p6383_p9), [#allocation6], 15392  }
 0x146   : > { %7078 = vsyncadd (%p6383_p9), [#allocation6], 4294951904 }
 0x147   : > { %7080 = dma.done.wait (%p6383_p9), [#allocation9], 128  }
 0x148   : > { %7082 = vsyncadd (%p6383_p9), [#allocation9], 4294967168 }
 0x149   : > { %7084 = dma.done.wait (%p6383_p9), [#allocation12], 5376  }
 0x14a   : > { %7086 = vsyncadd (%p6383_p9), [#allocation12], 4294961920 }
 0x14b   : > { %7088 = dma.done.wait (%p6383_p9), [#allocation15], 32  }
 0x14c   : > { %7090 = vsyncadd (%p6383_p9), [#allocation15], 4294967264 }
 0x14d   : > { %7092 = dma.done.wait (%p6383_p9), [#allocation18], 1056  }
 0x14e   : > { %7094 = vsyncadd (%p6383_p9), [#allocation18], 4294966240 }
 0x14f   : > { %7096 = dma.done.wait (%p6383_p9), [#allocation21], 32  }
 0x150   : > { %7098 = vsyncadd (%p6383_p9), [#allocation21], 4294967264 }
 0x151   : > { %7100 = dma.done.wait (%p6383_p9), [#allocation24], 32  }
 0x152   : > { %7102 = vsyncadd (%p6383_p9), [#allocation24], 4294967264 }
 0x153   : > { %7104 = dma.done.wait (%p6383_p9), [#allocation27], 48  }
 0x154   : > { %7106 = vsyncadd (%p6383_p9), [#allocation27], 4294967248  ;;  %s8057_s11 = sld [smem:[#allocation40_spill]]  ;;  %p1305_p10 = scmp.lt.s32.totalorder %s7381_s0, 1  ;;  %vm1346_vm0 = vcmask 1043456   ;;  %vm1342_vm1 = vcmask 195584  }
 0x155   : > { %s8058_s2 = sld [smem:[#allocation44_spill]]  ;;  %v4808_v7 = vld [vmem:[#allocation2] sm:$0xf]  ;;  %v5991_v16 = vld [vmem:[#allocation2] sm:$0x30]  ;;  %vm1455_vm2 = vcmask 588800  }
 0x156   : > { %s7645_s16 = scalar_select %p1305_p10, %s7381_s0, 1  ;;  %v4817_v17 = vld [vmem:[#allocation2 + $0x8] sm:$0xf]  ;;  %v6000_v18 = vld [vmem:[#allocation2 + $0x8] sm:$0x30]  ;;  %v4809_v28 = vor.u32 %v5991_v16, %v4808_v7  ;;  %vm1962_vm3 = vcmask 1045504  }
 0x157   : > { %v4818_v29 = vor.u32 %v6000_v18, %v4817_v17  ;;  %v4947_v17 = vld [vmem:[#allocation2 + $0x18] sm:$0xf]  ;;  %v6018_v18 = vld [vmem:[#allocation2 + $0x18] sm:$0x30]  ;;  %s8059_s23 = sld [smem:[#allocation45_spill]]  ;;  %vm1958_vm4 = vcmask 97280  }
 0x158   : > { %s6256_s26 = smul.u32 12, %s7645_s16  ;;  %vm2199_vm5 = vcmask 523264   ;;  %vm3152_vm6 = vcmask 1042432   ;;  %vm3148_vm7 = vcmask 48128   ;;  %s8060_s15 = sld [smem:[#allocation48_spill]]  ;;  %vm3643_vm8 = vcmask 1040384  }
 0x159   : > { %s8061_s24 = sld [smem:[#allocation49_spill]]  ;;  %vm3644_vm9 = vcmask 1041408   ;;  %vm3639_vm10 = vcmask 23552   ;;  %vm3712_vm11 = vcmask 785408   ;;  %vm3946_vm12 = vcmask 130048  }
 0x15a   : > { %s1309_s1 = scalar_lea.vmem %s8057_s11, %s6256_s26  ;;  %s8062_s14 = sld [smem:[#allocation51_spill]]  ;;  %vm3986_vm13 = vcmask 293888   ;;  %vm4046_vm14 = vcmask 31744   ;;  %vm4022_vm15 = vcmask 146432  }
 0x15b   : > { %v1325_v0 = vld [vmem:[%s1309_s1 + $0x8] sm:$0xf]  ;;  %v1373_v2 = vld [vmem:[%s8058_s2 + $0x40] sm:$0xff]  ;;  %v5998_v14 = vld [vmem:[%s8058_s2 + $0x34] sm:$0xf]  ;;  %s8063_s6 = sld [smem:[#allocation50_spill]] }
 0x15c   : > { %v1338_v1 = vunpack.c.l.b16 %v1325_v0  ;;  %v1518_v4 = vunpack.c.l.b16 %v1373_v2  ;;  %v1519_v5 = vunpack.c.h.b16 %v1373_v2  ;;  %v4828_v6 = vld [vmem:[%s8058_s2 + $0x88] sm:$0xff]  ;;  %v7654_v11 = vld [vmem:[%s1309_s1] sm:$0xff]  ;;  %v4891_v15 = vld [vmem:[%s8058_s2 + $0x38] sm:$0xf0]  ;;  %s8064_s20 = sld [smem:[#allocation41_spill]] }
 0x15d   : > { %v1435_v8 = vunpack.c.l.b16 %v4828_v6  ;;  %v1436_v9 = vunpack.c.h.b16 %v4828_v6  ;;  %v4889_v22 = vld [vmem:[%s8058_s2 + $0x30] sm:$0xf]  ;;  %v5999_v24 = vld [vmem:[%s8058_s2 + $0x34] sm:$0xf0]  ;;  %v4894_v25 = vor.u32 %v5998_v14, %v4891_v15  ;;  %v4881_v31 = vld [vmem:[%s8058_s2 + $0x20] sm:$0xf] }
 0x15e   : > { %v1340_v3 = vpack.c.b16 %v1338_v1, %v1338_v1  ;;  %v1528_v12 = vpack.c.b16 %v1518_v4, %v1518_v4  ;;  %v1529_v13 = vpack.c.b16 %v1519_v5, %v1519_v5  ;;  %v4890_v30 = vor.u32 %v5999_v24, %v4889_v22  ;;  %v5997_v32 = vld [vmem:[%s8058_s2 + $0x24] sm:$0xf0]  ;;  %v5996_v33 = vld [vmem:[%s8058_s2 + $0x24] sm:$0xf]  ;;  %v4883_v35 = vld [vmem:[%s8058_s2 + $0x28] sm:$0xf0] }
 0x15f   : > { %v1445_v19 = vpack.c.b16 %v1435_v8, %v1435_v8  ;;  %v1446_v20 = vpack.c.b16 %v1436_v9, %v1436_v9  ;;  %v4882_v34 = vor.u32 %v5997_v32, %v4881_v31  ;;  %v4886_v36 = vor.u32 %v5996_v33, %v4883_v35  ;;  %v4855_v37 = vld [vmem:[%s8058_s2 + $0x78] sm:$0xf]  ;;  %v6008_v38 = vld [vmem:[%s8058_s2 + $0x7c] sm:$0xf0]  ;;  %v6007_v39 = vld [vmem:[%s8058_s2 + $0x7c] sm:$0xf] }
 0x160   : > { %v7652_v10 = vsel %vm1346_vm0, %v1340_v3, 0  ;;  %v1545_v21 = vsel %vm1346_vm0, %v1529_v13, 0  ;;  %v1542_v23 = vsel %vm1346_vm0, %v1528_v12, 0  ;;  %v4856_v40 = vor.u32 %v6008_v38, %v4855_v37  ;;  %v4857_v41 = vld [vmem:[%s8058_s2 + $0x80] sm:$0xf0]  ;;  %v7712_v24 = vld [vmem:[%s8058_s2 + $0x118] sm:$0xff] }
 0x161   : > { %1356 = vmatpush.bf16.msra.mxu0 %v7652_v10  ;;  %1391 = vmatpush.bf16.msra.mxu3 %v7652_v10  ;;  %v1460_v26 = vsel %vm1346_vm0, %v1445_v19, 0  ;;  %v1463_v27 = vsel %vm1346_vm0, %v1446_v20, 0  ;;  %v4873_v42 = vld [vmem:[%s8058_s2 + $0x10] sm:$0xf]  ;;  %v5995_v43 = vld [vmem:[%s8058_s2 + $0x14] sm:$0xf0]  ;;  %v4860_v44 = vor.u32 %v6007_v39, %v4857_v41  ;;  %v4948_v19 = vor.u32 %v6018_v18, %v4947_v17 }
 0x162   : > { %1564 = vmatpush.bf16.msra.mxu1 %v1545_v21  ;;  %1468 = vmatpush.bf16.msra.mxu2 %v1460_v26  ;;  %v4874_v45 = vor.u32 %v5995_v43, %v4873_v42  ;;  %v5994_v46 = vld [vmem:[%s8058_s2 + $0x14] sm:$0xf]  ;;  %v4875_v47 = vld [vmem:[%s8058_s2 + $0x18] sm:$0xf0]  ;;  %v4847_v49 = vld [vmem:[%s8058_s2 + $0x68] sm:$0xf]  ;;  %s1312_s4 = scalar_lea.vmem %s8064_s20, %s7645_s16 }
 0x163   : > { %v4878_v48 = vor.u32 %v5994_v46, %v4875_v47  ;;  %v6006_v50 = vld [vmem:[%s8058_s2 + $0x6c] sm:$0xf0]  ;;  %v6005_v51 = vld [vmem:[%s8058_s2 + $0x6c] sm:$0xf]  ;;  %v4849_v53 = vld [vmem:[%s8058_s2 + $0x70] sm:$0xf0] }
 0x164   : > { %v4848_v52 = vor.u32 %v6006_v50, %v4847_v49  ;;  %v4852_v54 = vor.u32 %v6005_v51, %v4849_v53  ;;  %v4865_v55 = vld [vmem:[%s8058_s2] sm:$0xf]  ;;  %v5993_v56 = vld [vmem:[%s8058_s2 + $0x4] sm:$0xf0]  ;;  %v5992_v57 = vld [vmem:[%s8058_s2 + $0x4] sm:$0xf] }
 0x165   : > { %1357 = vmatpush.bf16.msra.mxu0 %v7654_v11  ;;  %1392 = vmatpush.bf16.msra.mxu3 %v7654_v11  ;;  %v4866_v58 = vor.u32 %v5993_v56, %v4865_v55  ;;  %v4867_v59 = vld [vmem:[%s8058_s2 + $0x8] sm:$0xf0]  ;;  %v4839_v61 = vld [vmem:[%s8058_s2 + $0x58] sm:$0xf]  ;;  %v6004_v62 = vld [vmem:[%s8058_s2 + $0x5c] sm:$0xf0] }
 0x166   : > { %1565 = vmatpush.bf16.msra.mxu1 %v4894_v25  ;;  %1469 = vmatpush.bf16.msra.mxu2 %v4856_v40  ;;  %v4870_v60 = vor.u32 %v5992_v57, %v4867_v59  ;;  %v6003_v63 = vld [vmem:[%s8058_s2 + $0x5c] sm:$0xf]  ;;  %v4840_v0 = vor.u32 %v6004_v62, %v4839_v61  ;;  %v4841_v1 = vld [vmem:[%s8058_s2 + $0x60] sm:$0xf0]  ;;  %v4831_v3 = vld [vmem:[%s8058_s2 + $0x48] sm:$0xf]  ;;  %v1758_v25 = vunpack.c.l.b16 %v7712_v24 }
 0x167   : > { %v4844_v2 = vor.u32 %v6003_v63, %v4841_v1  ;;  %v6002_v4 = vld [vmem:[%s8058_s2 + $0x4c] sm:$0xf0]  ;;  %v6001_v5 = vld [vmem:[%s8058_s2 + $0x4c] sm:$0xf]  ;;  %v4833_v7 = vld [vmem:[%s8058_s2 + $0x50] sm:$0xf0] }
 0x168   : > { %4814 = vmatmul.msk.bf16.vlgmr.msra.gmra.mxu0 %vm1342_vm1, %v4809_v28  ;;  %4819 = vmatmul.msk.bf16.vlgmr.msra.gmra.mxu3 %vm1342_vm1, %v4818_v29  ;;  %v4832_v6 = vor.u32 %v6002_v4, %v4831_v3  ;;  %v4836_v8 = vor.u32 %v6001_v5, %v4833_v7  ;;  %v4899_v20 = vld [vmem:[#allocation2 + $0x10] sm:$0xf]  ;;  %v6009_v21 = vld [vmem:[#allocation2 + $0x10] sm:$0x30]  ;;  %v4995_v22 = vld [vmem:[#allocation2 + $0x20] sm:$0xf]  ;;  %v1768_v26 = vpack.c.b16 %v1758_v25, %v1758_v25 }
 0x169   : > { %1550 = vmatpush.bf16.msrb.mxu0 %v1542_v23  ;;  %1482 = vmatpush.bf16.msrb.mxu3 %v1463_v27  ;;  %v4985_v28 = vld [vmem:[%s8058_s2 + $0x108] sm:$0xf]  ;;  %v6026_v29 = vld [vmem:[%s8058_s2 + $0x10c] sm:$0xf0]  ;;  %v4977_v31 = vld [vmem:[%s8058_s2 + $0xf8] sm:$0xf] }
 0x16a   : > { %1566 = vmatpush.bf16.msra.mxu1 %v4886_v36  ;;  %1470 = vmatpush.bf16.msra.mxu2 %v4848_v52  ;;  %v1782_v27 = vsel %vm1346_vm0, %v1768_v26, 0  ;;  %v6024_v32 = vld [vmem:[%s8058_s2 + $0xfc] sm:$0xf0]  ;;  %v4969_v39 = vld [vmem:[%s8058_s2 + $0xe8] sm:$0xf]  ;;  %s8065_s7 = sld [smem:[#allocation53_spill]] }
 0x16b   : > { %v4978_v33 = vor.u32 %v6024_v32, %v4977_v31  ;;  %v6022_v40 = vld [vmem:[%s8058_s2 + $0xec] sm:$0xf0]  ;;  %v4937_v46 = vld [vmem:[%s8058_s2 + $0xc0] sm:$0xf]  ;;  %v6017_v47 = vld [vmem:[%s8058_s2 + $0xc4] sm:$0xf0] }
 0x16c   : > { %v4970_v41 = vor.u32 %v6022_v40, %v4969_v39  ;;  %v4938_v49 = vor.u32 %v6017_v47, %v4937_v46  ;;  %v4939_v50 = vld [vmem:[%s8058_s2 + $0xc8] sm:$0xf0]  ;;  %v4961_v51 = vld [vmem:[%s8058_s2 + $0xd8] sm:$0xf]  ;;  %v6020_v52 = vld [vmem:[%s8058_s2 + $0xdc] sm:$0xf0] }
 0x16d   : > { %1551 = vmatpush.bf16.msrb.mxu0 %v4890_v30  ;;  %1483 = vmatpush.bf16.msrb.mxu3 %v4860_v44  ;;  %v4986_v30 = vor.u32 %v6026_v29, %v4985_v28  ;;  %v5006_v44 = vld [vmem:[%s8058_s2 + $0x160] sm:$0xff]  ;;  %v4962_v55 = vor.u32 %v6020_v52, %v4961_v51  ;;  %v4929_v57 = vld [vmem:[%s8058_s2 + $0xb0] sm:$0xf]  ;;  %v6014_v59 = vld [vmem:[%s8058_s2 + $0xb4] sm:$0xf]  ;;  %s8067_s11 = sld [smem:[#allocation43_spill]] }
 0x16e   : > { %1567 = vmatpush.bf16.msra.mxu1 %v4878_v48  ;;  %1471 = vmatpush.bf16.msra.mxu2 %v4840_v0  ;;  %v6016_v48 = vld [vmem:[%s8058_s2 + $0xc4] sm:$0xf]  ;;  %v4931_v61 = vld [vmem:[%s8058_s2 + $0xb8] sm:$0xf0]  ;;  %v6034_v62 = vld [vmem:[%s8058_s2 + $0x154] sm:$0xf] }
 0x16f   : > { %v5035_v63 = vld [vmem:[%s8058_s2 + $0x158] sm:$0xf0]  ;;  %v4934_v0 = vor.u32 %v6014_v59, %v4931_v61  ;;  %v6013_v3 = vld [vmem:[%s8058_s2 + $0xa4] sm:$0xf0]  ;;  %v6012_v4 = vld [vmem:[%s8058_s2 + $0xa4] sm:$0xf] }
 0x170   : > { %v5038_v1 = vor.u32 %v6034_v62, %v5035_v63  ;;  %v6032_v7 = vld [vmem:[%s8058_s2 + $0x144] sm:$0xf]  ;;  %v6011_v17 = vld [vmem:[%s8058_s2 + $0x94] sm:$0xf0]  ;;  %v6010_v18 = vld [vmem:[%s8058_s2 + $0x94] sm:$0xf]  ;;  %s8066_s18 = smov %s8065_s7 }
 0x171   : > { %1552 = vmatpush.bf16.msrb.mxu0 %v4882_v34  ;;  %1484 = vmatpush.bf16.msrb.mxu3 %v4852_v54  ;;  %v4910_v34 = vld [vmem:[%s8058_s2 + $0xd0] sm:$0xff]  ;;  %v4942_v54 = vor.u32 %v6016_v48, %v4939_v50  ;;  %v6035_v31 = vld [vmem:[%s8058_s2 + $0x154] sm:$0xf0]  ;;  %v6028_v32 = vld [vmem:[%s8058_s2 + $0x124] sm:$0xf]  ;;  %s8068_s26 = sld [smem:[#allocation55_spill]] }
 0x172   : > { %1568 = vmatpush.bf16.msra.mxu1 %v4870_v60  ;;  %1472 = vmatpush.bf16.msra.mxu2 %v4832_v6  ;;  %v1636_v35 = vunpack.c.l.b16 %v4910_v34  ;;  %v1637_v36 = vunpack.c.h.b16 %v4910_v34  ;;  %v4923_v6 = vld [vmem:[%s8058_s2 + $0xa8] sm:$0xf0]  ;;  %v4987_v28 = vld [vmem:[%s8058_s2 + $0x110] sm:$0xf0]  ;;  %v5033_v29 = vld [vmem:[%s8058_s2 + $0x150] sm:$0xf] }
 0x173   : > { %v5034_v34 = vor.u32 %v6035_v31, %v5033_v29  ;;  %v5025_v39 = vld [vmem:[%s8058_s2 + $0x140] sm:$0xf]  ;;  %v6031_v48 = vld [vmem:[%s8058_s2 + $0x134] sm:$0xf0]  ;;  %v6019_v50 = vld [vmem:[%s8058_s2 + $0xdc] sm:$0xf] }
 0x174   : > { %v1646_v37 = vpack.c.b16 %v1636_v35, %v1636_v35  ;;  %v1647_v38 = vpack.c.b16 %v1637_v36, %v1637_v36  ;;  %v4963_v51 = vld [vmem:[%s8058_s2 + $0xe0] sm:$0xf0]  ;;  %v5009_v52 = vld [vmem:[%s8058_s2 + $0x120] sm:$0xf]  ;;  %v6073_v29 = vld [vmem:[#allocation7 + $0x124] sm:$0xf0] }
 0x175   : > { %1553 = vmatpush.bf16.msrb.mxu0 %v4874_v45  ;;  %1485 = vmatpush.bf16.msrb.mxu3 %v4844_v2  ;;  %v1881_v45 = vunpack.c.h.b16 %v5006_v44  ;;  %v4921_v2 = vld [vmem:[%s8058_s2 + $0xa0] sm:$0xf]  ;;  %s8069_s1 = sld [smem:[#allocation42_spill]] }
 0x176   : > { %1714 = vmatpush.bf16.msrb.mxu1 %v7652_v10  ;;  %1592 = vmatpush.bf16.msrb.mxu2 %v7652_v10  ;;  %v1660_v42 = vsel %vm1346_vm0, %v1646_v37, 0  ;;  %v1663_v43 = vsel %vm1346_vm0, %v1647_v38, 0  ;;  %v4922_v5 = vor.u32 %v6013_v3, %v4921_v2  ;;  %v6023_v37 = vld [vmem:[%s8058_s2 + $0xfc] sm:$0xf]  ;;  %v4979_v38 = vld [vmem:[%s8058_s2 + $0x100] sm:$0xf0] }
 0x177   : > { %v1891_v53 = vpack.c.b16 %v1881_v45, %v1881_v45  ;;  %v4982_v40 = vor.u32 %v6023_v37, %v4979_v38  ;;  %v5017_v45 = vld [vmem:[%s8058_s2 + $0x130] sm:$0xf]  ;;  %v5088_v38 = vld [vmem:[#allocation7 + $0x110] sm:$0xf]  ;;  %s8071_s20 = sld [smem:[#allocation59_spill]] }
 0x179   : > { %1554 = vmatpush.bf16.msrb.mxu0 %v4866_v58  ;;  %1486 = vmatpush.bf16.msrb.mxu3 %v4836_v8  ;;  %v1907_v56 = vsel %vm1346_vm0, %v1891_v53, 0  ;;  %v6015_v58 = vld [vmem:[%s8058_s2 + $0xb4] sm:$0xf0]  ;;  %v5027_v8 = vld [vmem:[%s8058_s2 + $0x148] sm:$0xf0] }
 0x17a   : > { %1715 = vmatpush.bf16.msrb.mxu1 %v7654_v11  ;;  %1593 = vmatpush.bf16.msrb.mxu2 %v7654_v11  ;;  %v4930_v60 = vor.u32 %v6015_v58, %v4929_v57  ;;  %v6029_v53 = vld [vmem:[%s8058_s2 + $0x124] sm:$0xf0] }
 0x17d   : > { %1668 = vmatpush.bf16.msra.mxu3 %v1660_v42  ;;  %1682 = vmatpush.bf16.msra.mxu0 %v1663_v43  ;;  %v6021_v43 = vld [vmem:[%s8058_s2 + $0xec] sm:$0xf] }
 0x181   : > { %1669 = vmatpush.bf16.msra.mxu3 %v4938_v49  ;;  %1683 = vmatpush.bf16.msra.mxu0 %v4942_v54  ;;  %v5018_v49 = vor.u32 %v6031_v48, %v5017_v45 }
 0x185   : > { %1670 = vmatpush.bf16.msra.mxu3 %v4930_v60  ;;  %1684 = vmatpush.bf16.msra.mxu0 %v4934_v0 }
 0x189   : > { %1671 = vmatpush.bf16.msra.mxu3 %v4922_v5 }
 0x1e5   : > { %v1359_v9 = vpop.f32.mrf.mxu0 }
 0x1eb   : > { %v1394_v12 = vpop.f32.mrf.mxu3 }
 0x1ed   : > { %v1361_v13 = vpop.f32.mrf.mxu0 }
 0x1ee   : > { %v1364_v14 = vpack.c.bf16 %v1361_v13, %v1359_v9  ;;  %v4926_v9 = vor.u32 %v6012_v4, %v4923_v6  ;;  %v1759_v13 = vunpack.c.h.b16 %v7712_v24 }
 0x1f0   : > { %4895 = vmatmul.msk.bf16.vlgmr.msrb.gmra.mxu0 %vm1455_vm2, %v1364_v14  ;;  %4896 = vmatmul.msk.bf16.vlgmr.msra.gmra.mxu1 %vm1455_vm2, %v1364_v14  ;;  %v1880_v14 = vunpack.c.l.b16 %v5006_v44  ;;  %v4971_v44 = vld [vmem:[%s8058_s2 + $0xf0] sm:$0xf0] }
 0x1f1   : > { %1836 = vmatpush.bf16.msra.mxu1 %v7652_v10  ;;  %v4900_v10 = vor.u32 %v6009_v21, %v4899_v20  ;;  %1685 = vmatpush.bf16.msra.mxu0 %v4926_v9  ;;  %v4915_v20 = vld [vmem:[%s8058_s2 + $0x98] sm:$0xf0]  ;;  %v1769_v21 = vpack.c.b16 %v1759_v13, %v1759_v13  ;;  %v4974_v47 = vor.u32 %v6021_v43, %v4971_v44  ;;  %v5106_v44 = vld [vmem:[#allocation7 + $0x138] sm:$0xf0] }
 0x1f2   : > { %v6074_v43 = vld [vmem:[#allocation7 + $0x134] sm:$0xf] }
 0x1f3   : > { %v1396_v15 = vpop.f32.mrf.mxu3  ;;  %v1785_v25 = vsel %vm1346_vm0, %v1769_v21, 0 }
 0x1f4   : > { %v1399_v16 = vpack.c.bf16 %v1396_v15, %v1394_v12  ;;  %v5030_v12 = vor.u32 %v6032_v7, %v5027_v8 }
 0x1f5   : > { %1837 = vmatpush.bf16.msra.mxu1 %v7654_v11  ;;  %v6027_v11 = vld [vmem:[#allocation2 + $0x20] sm:$0x30] }
 0x1f6   : > { %4861 = vmatmul.msk.bf16.vlgmr.msra.gmra.mxu2 %vm1455_vm2, %v1399_v16  ;;  %4862 = vmatmul.msk.bf16.vlgmr.msrb.gmra.mxu3 %vm1455_vm2, %v1399_v16  ;;  %v4996_v23 = vor.u32 %v6027_v11, %v4995_v22  ;;  %v4913_v16 = vld [vmem:[%s8058_s2 + $0x90] sm:$0xf]  ;;  %v6030_v22 = vld [vmem:[%s8058_s2 + $0x134] sm:$0xf]  ;;  %v5019_v11 = vld [vmem:[%s8058_s2 + $0x138] sm:$0xf0] }
 0x1f7   : > { %1790 = vmatpush.bf16.msra.mxu2 %v1782_v27  ;;  %v5022_v24 = vor.u32 %v6030_v22, %v5019_v11  ;;  %v6025_v27 = vld [vmem:[%s8058_s2 + $0x10c] sm:$0xf] }
 0x1fb   : > { %1791 = vmatpush.bf16.msra.mxu2 %v4986_v30  ;;  %v4990_v30 = vor.u32 %v6025_v27, %v4987_v28  ;;  %v5096_v28 = vld [vmem:[#allocation7 + $0x120] sm:$0xf] }
 0x1ff   : > { %1792 = vmatpush.bf16.msra.mxu2 %v4978_v33  ;;  %v5011_v33 = vld [vmem:[%s8058_s2 + $0x128] sm:$0xf0] }
 0x200   : > { %4949 = vmatmul.msk.bf16.vlgmr.msrb.gmra.mxu1 %vm1342_vm1, %v4948_v19  ;;  %v4914_v19 = vor.u32 %v6011_v17, %v4913_v16  ;;  %v5014_v35 = vor.u32 %v6028_v32, %v5011_v33  ;;  %v5097_v33 = vor.u32 %v6073_v29, %v5096_v28  ;;  %v5130_v28 = vld [vmem:[#allocation7 + $0x168] sm:$0xf0] }
 0x202   : > { %1672 = vmatpush.bf16.msra.mxu3 %v4914_v19  ;;  %v1941_v19 = vld [vmem:[#allocation5] sm:$0x3] }
 0x203   : > { %1793 = vmatpush.bf16.msra.mxu2 %v4970_v41  ;;  %v6033_v41 = vld [vmem:[%s8058_s2 + $0x144] sm:$0xf0]  ;;  %v1943_v11 = vperm.slane %v1941_v19, 0 }
 0x204   : > { %v5026_v42 = vor.u32 %v6033_v41, %v5025_v39  ;;  %v6071_v39 = vld [vmem:[#allocation7 + $0x114] sm:$0xf0]  ;;  %v1944_v41 = vperm.slane %v1941_v19, 1  ;;  %v5128_v19 = vld [vmem:[#allocation7 + $0x160] sm:$0xf] }
 0x206   : > { %4901 = vmatmul.msk.bf16.vlgmr.msrb.gmra.mxu2 %vm1342_vm1, %v4900_v10  ;;  %v1890_v10 = vpack.c.b16 %v1880_v14, %v1880_v14  ;;  %1804 = vmatpush.bf16.msrb.mxu3 %v1785_v25 }
 0x207   : > { %1794 = vmatpush.bf16.msra.mxu2 %v4962_v55  ;;  %v4966_v55 = vor.u32 %v6019_v50, %v4963_v51  ;;  %v6069_v50 = vld [vmem:[#allocation7 + $0x104] sm:$0xf0] }
 0x208   : > { %v1904_v26 = vsel %vm1346_vm0, %v1890_v10, 0 }
 0x20a   : > { %1805 = vmatpush.bf16.msrb.mxu3 %v4990_v30 }
 0x20b   : > { %1926 = vmatpush.bf16.msrb.mxu2 %v1907_v56  ;;  %v5010_v56 = vor.u32 %v6029_v53, %v5009_v52 }
 0x20e   : > { %1806 = vmatpush.bf16.msrb.mxu3 %v4982_v40 }
 0x20f   : > { %1927 = vmatpush.bf16.msrb.mxu2 %v5038_v1 }
 0x210   : > { %4997 = vmatmul.msk.bf16.vlgmr.msra.gmra.mxu1 %vm1342_vm1, %v4996_v23  ;;  %v4918_v23 = vor.u32 %v6010_v18, %v4915_v20 }
 0x212   : > { %1686 = vmatpush.bf16.msra.mxu0 %v4918_v23  ;;  %1807 = vmatpush.bf16.msrb.mxu3 %v4974_v47  ;;  %v5104_v23 = vld [vmem:[#allocation7 + $0x130] sm:$0xf] }
 0x213   : > { %1928 = vmatpush.bf16.msrb.mxu2 %v5030_v12 }
 0x216   : > { %1912 = vmatpush.bf16.msrb.mxu0 %v1904_v26  ;;  %1808 = vmatpush.bf16.msrb.mxu3 %v4966_v55 }
 0x217   : > { %1929 = vmatpush.bf16.msrb.mxu2 %v5022_v24  ;;  %v6075_v24 = vld [vmem:[#allocation7 + $0x134] sm:$0xf0] }
 0x218   : > { %v5105_v27 = vor.u32 %v6075_v24, %v5104_v23  ;;  %v6068_v23 = vld [vmem:[#allocation7 + $0x104] sm:$0xf]  ;;  %v5082_v24 = vld [vmem:[#allocation7 + $0x108] sm:$0xf0] }
 0x21a   : > { %1913 = vmatpush.bf16.msrb.mxu0 %v5034_v34 }
 0x21b   : > { %1930 = vmatpush.bf16.msrb.mxu2 %v5014_v35 }
 0x21e   : > { %1914 = vmatpush.bf16.msrb.mxu0 %v5026_v42  ;;  %v5089_v42 = vor.u32 %v6071_v39, %v5088_v38  ;;  %v5048_v38 = vld [vmem:[#allocation7 + $0xc0] sm:$0xf]  ;;  %v6061_v39 = vld [vmem:[#allocation7 + $0xc4] sm:$0xf0] }
 0x222   : > { %1915 = vmatpush.bf16.msrb.mxu0 %v5018_v49  ;;  %v5080_v49 = vld [vmem:[#allocation7 + $0x100] sm:$0xf] }
 0x223   : > { %v5081_v55 = vor.u32 %v6069_v50, %v5080_v49  ;;  %v6048_v49 = vld [vmem:[#allocation7 + $0x64] sm:$0xf]  ;;  %v5196_v50 = vld [vmem:[#allocation7 + $0x68] sm:$0xf0] }
 0x226   : > { %1916 = vmatpush.bf16.msrb.mxu0 %v5010_v56  ;;  %v6072_v56 = vld [vmem:[#allocation7 + $0x124] sm:$0xf] }
 0x26d   : > { %v7746_v15 = vpop.f32.mrf.mxu1  ;;  %v1556_v2 = vpop.f32.mrf.mxu0 }
 0x275   : > { %v7762_v36 = vpop.f32.mrf.mxu1  ;;  %v1558_v4 = vpop.f32.mrf.mxu0 }
 0x279   : > { %v1474_v46 = vpop.f32.mrf.mxu2  ;;  %v1488_v3 = vpop.f32.mrf.mxu3 }
 0x27a   : > { %v1557_v13 = vadd.f32 %v1556_v2, %v1474_v46  ;;  %v1571_v10 = vadd.f32 %v7746_v15, %v1488_v3  ;;  %v5136_v2 = vld [vmem:[#allocation7 + $0x170] sm:$0xf]  ;;  %v6083_v3 = vld [vmem:[#allocation7 + $0x174] sm:$0xf0] }
 0x27d   : > { %v1717_v54 = vpop.f32.mrf.mxu1 }
 0x281   : > { %v1476_v57 = vpop.f32.mrf.mxu2  ;;  %v1490_v5 = vpop.f32.mrf.mxu3 }
 0x282   : > { %v1559_v18 = vadd.f32 %v1558_v4, %v1476_v57  ;;  %v1573_v15 = vadd.f32 %v7762_v36, %v1490_v5  ;;  %v5098_v57 = vld [vmem:[#allocation7 + $0x128] sm:$0xf0]  ;;  %v5064_v4 = vld [vmem:[#allocation7 + $0xe0] sm:$0xf] }
 0x283   : > { %v5101_v5 = vor.u32 %v6072_v56, %v5098_v57  ;;  %v5188_v56 = vld [vmem:[#allocation7 + $0x58] sm:$0xf0] }
 0x285   : > { %v1719_v58 = vpop.f32.mrf.mxu1 }
 0x286   : > { %v1722_v59 = vpack.c.bf16 %v1719_v58, %v1717_v54  ;;  %v5109_v54 = vor.u32 %v6074_v43, %v5106_v44  ;;  %v5049_v43 = vor.u32 %v6061_v39, %v5048_v38  ;;  %v5112_v44 = vld [vmem:[#allocation7 + $0x140] sm:$0xf]  ;;  %v6057_v39 = vld [vmem:[#allocation7 + $0xa4] sm:$0xf0] }
 0x288   : > { %4991 = vmatmul.msk.bf16.vlgmr.msra.gmra.mxu2 %vm1455_vm2, %v1722_v59 }
 0x289   : > { %v1595_v60 = vpop.f32.mrf.mxu2  ;;  %2203 = vmatpush.bf16.msra.mxu2 %v5105_v27  ;;  %v6080_v27 = vld [vmem:[#allocation7 + $0x164] sm:$0xf] }
 0x28d   : > { %v1839_v61 = vpop.f32.mrf.mxu1  ;;  %2204 = vmatpush.bf16.msra.mxu2 %v5097_v33  ;;  %v6079_v33 = vld [vmem:[#allocation7 + $0x154] sm:$0xf0] }
 0x291   : > { %v1597_v62 = vpop.f32.mrf.mxu2  ;;  %2205 = vmatpush.bf16.msra.mxu2 %v5089_v42 }
 0x292   : > { %v1600_v63 = vpack.c.bf16 %v1597_v62, %v1595_v60  ;;  %v6067_v62 = vld [vmem:[#allocation7 + $0xf4] sm:$0xf0] }
 0x294   : > { %4943 = vmatmul.msk.bf16.vlgmr.msra.gmra.mxu3 %vm1455_vm2, %v1600_v63  ;;  %4944 = vmatmul.msk.bf16.vlgmr.msra.gmra.mxu0 %vm1455_vm2, %v1600_v63  ;;  %v1957_v63 = vld [vmem:[%s8059_s23] sm:$0x7] }
 0x295   : > { %v1841_v0 = vpop.f32.mrf.mxu1  ;;  %2206 = vmatpush.bf16.msra.mxu2 %v5081_v55  ;;  %v6046_v55 = vld [vmem:[#allocation7 + $0x54] sm:$0xf] }
 0x296   : > { %v1844_v1 = vpack.c.bf16 %v1841_v0, %v1839_v61  ;;  %v5072_v61 = vld [vmem:[#allocation7 + $0xf0] sm:$0xf]  ;;  %v7791_v0 = vld [vmem:[%s8059_s23 + $0x4] sm:$0x7] }
 0x298   : > { %5040 = vmatmul.msk.bf16.vlgmr.msrb.gmra.mxu2 %vm1455_vm2, %v1844_v1 }
 0x2a4   : > { %4992 = vmatmul.msk.bf16.vlgmr.msrb.gmra.mxu3 %vm1455_vm2, %v1722_v59  ;;  %5039 = vmatmul.msk.bf16.vlgmr.msrb.gmra.mxu0 %vm1455_vm2, %v1844_v1 }
 0x30b   : > { %v1796_v7 = vpop.f32.mrf.mxu2 }
 0x311   : > { %v1688_v6 = vpop.f32.mrf.mxu0 }
 0x312   : > { %v1694_v30 = vadd.f32 %v1688_v6, %v1571_v10  ;;  %v5073_v6 = vor.u32 %v6067_v62, %v5072_v61  ;;  %v6047_v61 = vld [vmem:[#allocation7 + $0x54] sm:$0xf0] }
 0x313   : > { %v1798_v12 = vpop.f32.mrf.mxu2 }
 0x314   : > { %2207 = vmatpush.bf16.msra.mxu2 %v5073_v6 }
 0x317   : > { %v1674_v8 = vpop.f32.mrf.mxu3 }
 0x318   : > { %v1693_v16 = vadd.f32 %v1674_v8, %v1557_v13  ;;  %v6070_v8 = vld [vmem:[#allocation7 + $0x114] sm:$0xf] }
 0x319   : > { %v1690_v9 = vpop.f32.mrf.mxu0 }
 0x31a   : > { %v1815_v21 = vadd.f32 %v1796_v7, %v1693_v16  ;;  %v1696_v45 = vadd.f32 %v1690_v9, %v1573_v15  ;;  %v6065_v7 = vld [vmem:[#allocation7 + $0xe4] sm:$0xf0]  ;;  %v5090_v9 = vld [vmem:[#allocation7 + $0x118] sm:$0xf0]  ;;  %v6050_v15 = vld [vmem:[#allocation7 + $0x74] sm:$0xf] }
 0x31b   : > { %v1932_v25 = vpop.f32.mrf.mxu2  ;;  %v5138_v16 = vld [vmem:[#allocation7 + $0x178] sm:$0xf0]  ;;  %v5093_v10 = vor.u32 %v6070_v8, %v5090_v9  ;;  %v5178_v8 = vld [vmem:[#allocation7 + $0x40] sm:$0xf]  ;;  %v6045_v9 = vld [vmem:[#allocation7 + $0x44] sm:$0xf0] }
 0x31f   : > { %v1676_v14 = vpop.f32.mrf.mxu3 }
 0x320   : > { %v1695_v20 = vadd.f32 %v1676_v14, %v1559_v18  ;;  %v6082_v14 = vld [vmem:[#allocation7 + $0x174] sm:$0xf]  ;;  %v5137_v18 = vor.u32 %v6083_v3, %v5136_v2  ;;  %v5180_v3 = vld [vmem:[#allocation7 + $0x48] sm:$0xf0] }
 0x321   : > { %v1918_v17 = vpop.f32.mrf.mxu0 }
 0x322   : > { %v1937_v22 = vadd.f32 %v1918_v17, %v1815_v21  ;;  %v1817_v31 = vadd.f32 %v1798_v12, %v1695_v20  ;;  %v6081_v20 = vld [vmem:[#allocation7 + $0x164] sm:$0xf0]  ;;  %v5056_v21 = vld [vmem:[#allocation7 + $0xd0] sm:$0xf] }
 0x323   : > { %v1934_v36 = vpop.f32.mrf.mxu2  ;;  %v5129_v29 = vor.u32 %v6081_v20, %v5128_v19  ;;  %v6076_v19 = vld [vmem:[#allocation7 + $0x144] sm:$0xf]  ;;  %v5114_v20 = vld [vmem:[#allocation7 + $0x148] sm:$0xf0] }
 0x324   : > { %v1947_v34 = vadd.f32 %v1943_v11, %v1937_v22  ;;  %v5065_v22 = vor.u32 %v6065_v7, %v5064_v4  ;;  %v6078_v4 = vld [vmem:[#allocation7 + $0x154] sm:$0xf] }
 0x326   : > { %v1951_v46 = vmax.f32 %v1947_v34, 0.0  ;;  %2208 = vmatpush.bf16.msra.mxu2 %v5065_v22  ;;  %v6066_v34 = vld [vmem:[#allocation7 + $0xf4] sm:$0xf]  ;;  %v5170_v22 = vld [vmem:[#allocation7 + $0x30] sm:$0xf] }
 0x327   : > { %v1810_v26 = vpop.f32.mrf.mxu3 }
 0x328   : > { %v1816_v35 = vadd.f32 %v1810_v26, %v1694_v30  ;;  %v5120_v30 = vld [vmem:[#allocation7 + $0x150] sm:$0xf] }
 0x329   : > { %v1920_v32 = vpop.f32.mrf.mxu0 }
 0x32a   : > { %v1939_v37 = vadd.f32 %v1920_v32, %v1817_v31  ;;  %v1938_v47 = vadd.f32 %v1932_v25, %v1816_v35  ;;  %v5141_v25 = vor.u32 %v6082_v14, %v5138_v16  ;;  %v5085_v31 = vor.u32 %v6068_v23, %v5082_v24  ;;  %v5074_v35 = vld [vmem:[#allocation7 + $0xf8] sm:$0xf0]  ;;  %v6042_v16 = vld [vmem:[#allocation7 + $0x34] sm:$0xf]  ;;  %v5234_v23 = vld [vmem:[#allocation7 + $0xb0] sm:$0xf] }
 0x32b   : > { %v5077_v42 = vor.u32 %v6066_v34, %v5074_v35  ;;  %v5058_v14 = vld [vmem:[#allocation7 + $0xd8] sm:$0xf0]  ;;  %v5162_v34 = vld [vmem:[#allocation7 + $0x20] sm:$0xf]  ;;  %v6041_v35 = vld [vmem:[#allocation7 + $0x24] sm:$0xf0] }
 0x32c   : > { %v1949_v40 = vadd.f32 %v1943_v11, %v1939_v37  ;;  %v1948_v58 = vadd.f32 %v1944_v41, %v1938_v47  ;;  %v6063_v11 = vld [vmem:[#allocation7 + $0xd4] sm:$0xf0]  ;;  %v5133_v37 = vor.u32 %v6080_v27, %v5130_v28  ;;  %v5202_v47 = vld [vmem:[#allocation7 + $0x70] sm:$0xf]  ;;  %v6060_v28 = vld [vmem:[#allocation7 + $0xc4] sm:$0xf]  ;;  %v5163_v38 = vor.u32 %v6041_v35, %v5162_v34 }
 0x32d   : > { %v5057_v32 = vor.u32 %v6063_v11, %v5056_v21  ;;  %v6043_v11 = vld [vmem:[#allocation7 + $0x34] sm:$0xf0]  ;;  %v6102_v34 = vld [vmem:[#allocation7 + $0x214] sm:$0xf]  ;;  %v5321_v35 = vld [vmem:[#allocation7 + $0x218] sm:$0xf0] }
 0x32e   : > { %v1953_v48 = vmax.f32 %v1949_v40, 0.0  ;;  %v1952_v12 = vmax.f32 %v1948_v58, 0.0  ;;  %v5204_v40 = vld [vmem:[#allocation7 + $0x78] sm:$0xf0]  ;;  %v5191_v58 = vor.u32 %v6046_v55, %v5188_v56  ;;  %v5171_v24 = vor.u32 %v6043_v11, %v5170_v22  ;;  %v5228_v55 = vld [vmem:[#allocation7 + $0xa8] sm:$0xf0] }
 0x32f   : > { %v1812_v51 = vpop.f32.mrf.mxu3  ;;  %2209 = vmatpush.bf16.msra.mxu2 %v5057_v32  ;;  %v5164_v32 = vld [vmem:[#allocation7 + $0x28] sm:$0xf0]  ;;  %v6106_v22 = vld [vmem:[#allocation7 + $0x234] sm:$0xf]  ;;  %v5337_v11 = vld [vmem:[#allocation7 + $0x238] sm:$0xf0] }
 0x330   : > { %v1955_v52 = vpack.c.bf16 %v1953_v48, %v1951_v46  ;;  %v1818_v53 = vadd.f32 %v1812_v51, %v1696_v45  ;;  %v6077_v45 = vld [vmem:[#allocation7 + $0x144] sm:$0xf0]  ;;  %v5207_v46 = vor.u32 %v6050_v15, %v5204_v40  ;;  %v6051_v48 = vld [vmem:[#allocation7 + $0x74] sm:$0xf0]  ;;  %v6038_v15 = vld [vmem:[#allocation7 + $0x14] sm:$0xf] }
 0x331   : > { %v5113_v51 = vor.u32 %v6077_v45, %v5112_v44  ;;  %v5156_v40 = vld [vmem:[#allocation7 + $0x18] sm:$0xf0]  ;;  %v5154_v45 = vld [vmem:[#allocation7 + $0x10] sm:$0xf] }
 0x332   : > { %v1940_v59 = vadd.f32 %v1934_v36, %v1818_v53  ;;  %v7785_v60 = vsel %vm1962_vm3, %v1955_v52, 0  ;;  %v5203_v52 = vor.u32 %v6051_v48, %v5202_v47  ;;  %v5199_v53 = vor.u32 %v6048_v49, %v5196_v50  ;;  %v6049_v36 = vld [vmem:[#allocation7 + $0x64] sm:$0xf0]  ;;  %v5236_v44 = vld [vmem:[#allocation7 + $0xb8] sm:$0xf0] }
 0x333   : > { %1976 = vmatpush.bf16.msrb.mxu1 %v7785_v60  ;;  %2033 = vmatpush.bf16.msra.mxu0 %v7785_v60  ;;  %v6039_v47 = vld [vmem:[#allocation7 + $0x14] sm:$0xf0]  ;;  %v5218_v48 = vld [vmem:[#allocation7 + $0x90] sm:$0xf] }
 0x334   : > { %v1950_v1 = vadd.f32 %v1944_v41, %v1940_v59  ;;  %v5121_v41 = vor.u32 %v6079_v33, %v5120_v30  ;;  %2210 = vmatpush.bf16.msra.mxu2 %v5049_v43  ;;  %v5186_v59 = vld [vmem:[#allocation7 + $0x50] sm:$0xf]  ;;  %v6040_v30 = vld [vmem:[#allocation7 + $0x24] sm:$0xf]  ;;  %v6058_v43 = vld [vmem:[#allocation7 + $0xb4] sm:$0xf]  ;;  %v5155_v50 = vor.u32 %v6039_v47, %v5154_v45 }
 0x335   : > { %v5187_v62 = vor.u32 %v6047_v61, %v5186_v59  ;;  %v5167_v33 = vor.u32 %v6040_v30, %v5164_v32  ;;  %v6055_v49 = vld [vmem:[#allocation7 + $0x94] sm:$0xf0]  ;;  %v5210_v59 = vld [vmem:[#allocation7 + $0x80] sm:$0xf]  ;;  %v5319_v32 = vld [vmem:[#allocation7 + $0x210] sm:$0xf] }
 0x336   : > { %v1954_v13 = vmax.f32 %v1950_v1, 0.0  ;;  %5041 = vmatmul.msk.bf16.vlgmr.msrb.gmra.mxu1 %vm1958_vm4, %v1957_v63  ;;  %5044 = vmatmul.msk.bf16.vlgmr.msra.gmra.mxu0 %vm1958_vm4, %v7791_v0  ;;  %v5066_v1 = vld [vmem:[#allocation7 + $0xe8] sm:$0xf0]  ;;  %v5303_v45 = vld [vmem:[#allocation7 + $0x1f0] sm:$0xf] }
 0x337   : > { %2229 = vmatpush.bf16.msrb.mxu0 %v5109_v54  ;;  %v5194_v54 = vld [vmem:[#allocation7 + $0x60] sm:$0xf]  ;;  %v6098_v47 = vld [vmem:[#allocation7 + $0x1f4] sm:$0xf] }
 0x338   : > { %v1956_v17 = vpack.c.bf16 %v1954_v13, %v1952_v12  ;;  %2404 = vmatpush.bf16.msrb.mxu2 %v5207_v46  ;;  %v5195_v57 = vor.u32 %v6049_v36, %v5194_v54  ;;  %v5179_v12 = vor.u32 %v6045_v9, %v5178_v8  ;;  %v6062_v13 = vld [vmem:[#allocation7 + $0xd4] sm:$0xf]  ;;  %v5239_v46 = vor.u32 %v6058_v43, %v5236_v44  ;;  %v6056_v54 = vld [vmem:[#allocation7 + $0xa4] sm:$0xf]  ;;  %v5242_v44 = vld [vmem:[%s8059_s23 + $0x8] sm:$0x7] }
 0x339   : > { %v5231_v56 = vor.u32 %v6056_v54, %v5228_v55 }
 0x33a   : > { %v7797_v26 = vsel %vm1962_vm3, %v1956_v17, 0  ;;  %v5061_v17 = vor.u32 %v6062_v13, %v5058_v14 }
 0x33b   : > { %2230 = vmatpush.bf16.msrb.mxu0 %v5101_v5  ;;  %1989 = vmatpush.bf16.msra.mxu3 %v7797_v26  ;;  %v5122_v5 = vld [vmem:[#allocation7 + $0x158] sm:$0xf0] }
 0x33c   : > { %2046 = vmatpush.bf16.msra.mxu1 %v7797_v26  ;;  %2405 = vmatpush.bf16.msrb.mxu2 %v5199_v53  ;;  %v5125_v7 = vor.u32 %v6078_v4, %v5122_v5  ;;  %v5148_v53 = vld [vmem:[#allocation7 + $0x8] sm:$0xf0] }
 0x33d   : > { %v5212_v4 = vld [vmem:[#allocation7 + $0x88] sm:$0xf0] }
 0x33e   : > { %5042 = vmatmul.msk.bf16.vlgmr.msra.gmra.mxu3 %vm1958_vm4, %v1957_v63  ;;  %v6064_v63 = vld [vmem:[#allocation7 + $0xe4] sm:$0xf] }
 0x33f   : > { %2220 = vmatpush.bf16.msrb.mxu3 %v5137_v18  ;;  %2231 = vmatpush.bf16.msrb.mxu0 %v5093_v10  ;;  %v5069_v2 = vor.u32 %v6064_v63, %v5066_v1  ;;  %v5172_v18 = vld [vmem:[#allocation7 + $0x38] sm:$0xf0]  ;;  %v5117_v10 = vor.u32 %v6076_v19, %v5114_v20  ;;  %v6054_v1 = vld [vmem:[#allocation7 + $0x94] sm:$0xf] }
 0x340   : > { %2246 = vmatpush.bf16.msrb.mxu1 %v5141_v25  ;;  %2406 = vmatpush.bf16.msrb.mxu2 %v5191_v58  ;;  %v5175_v21 = vor.u32 %v6042_v16, %v5172_v18  ;;  %v6059_v25 = vld [vmem:[#allocation7 + $0xb4] sm:$0xf0]  ;;  %v6037_v58 = vld [vmem:[#allocation7 + $0x4] sm:$0xf0] }
 0x341   : > { %v5235_v27 = vor.u32 %v6059_v25, %v5234_v23  ;;  %v5327_v25 = vld [vmem:[#allocation7 + $0x220] sm:$0xf] }
 0x343   : > { %2221 = vmatpush.bf16.msrb.mxu3 %v5129_v29  ;;  %2232 = vmatpush.bf16.msrb.mxu0 %v5085_v31  ;;  %v5050_v29 = vld [vmem:[#allocation7 + $0xc8] sm:$0xf0] }
 0x344   : > { %2247 = vmatpush.bf16.msrb.mxu1 %v5133_v37  ;;  %v5053_v31 = vor.u32 %v6060_v28, %v5050_v29  ;;  %v5226_v37 = vld [vmem:[#allocation7 + $0xa0] sm:$0xf]  ;;  %v6104_v28 = vld [vmem:[#allocation7 + $0x224] sm:$0xf]  ;;  %v5329_v29 = vld [vmem:[#allocation7 + $0x228] sm:$0xf0] }
 0x346   : > { %5045 = vmatmul.msk.bf16.vlgmr.msra.gmra.mxu1 %vm1958_vm4, %v7791_v0  ;;  %v6044_v0 = vld [vmem:[#allocation7 + $0x44] sm:$0xf] }
 0x347   : > { %2222 = vmatpush.bf16.msrb.mxu3 %v5121_v41  ;;  %2233 = vmatpush.bf16.msrb.mxu0 %v5077_v42  ;;  %v5183_v6 = vor.u32 %v6044_v0, %v5180_v3  ;;  %v5227_v41 = vor.u32 %v6057_v39, %v5226_v37  ;;  %v5159_v42 = vor.u32 %v6038_v15, %v5156_v40  ;;  %v5220_v0 = vld [vmem:[#allocation7 + $0x98] sm:$0xf0]  ;;  %v6052_v3 = vld [vmem:[#allocation7 + $0x84] sm:$0xf]  ;;  %v5311_v39 = vld [vmem:[#allocation7 + $0x200] sm:$0xf] }
 0x348   : > { %2248 = vmatpush.bf16.msrb.mxu1 %v5125_v7  ;;  %v5215_v5 = vor.u32 %v6052_v3, %v5212_v4  ;;  %v6101_v15 = vld [vmem:[#allocation7 + $0x204] sm:$0xf0]  ;;  %v6100_v40 = vld [vmem:[#allocation7 + $0x204] sm:$0xf] }
 0x349   : > { %2407 = vmatpush.bf16.msrb.mxu2 %v5183_v6 }
 0x34b   : > { %2223 = vmatpush.bf16.msrb.mxu3 %v5113_v51  ;;  %2234 = vmatpush.bf16.msrb.mxu0 %v5069_v2  ;;  %v5219_v51 = vor.u32 %v6055_v49, %v5218_v48  ;;  %v5223_v2 = vor.u32 %v6054_v1, %v5220_v0  ;;  %v5305_v49 = vld [vmem:[#allocation7 + $0x1f8] sm:$0xf0]  ;;  %v5279_v1 = vld [vmem:[#allocation7 + $0x1c0] sm:$0xf]  ;;  %v6093_v0 = vld [vmem:[#allocation7 + $0x1c4] sm:$0xf0] }
 0x34c   : > { %2249 = vmatpush.bf16.msrb.mxu1 %v5117_v10  ;;  %v6107_v10 = vld [vmem:[#allocation7 + $0x234] sm:$0xf0]  ;;  %v5280_v4 = vor.u32 %v6093_v0, %v5279_v1 }
 0x34d   : > { %2408 = vmatpush.bf16.msrb.mxu2 %v5175_v21  ;;  %v5335_v21 = vld [vmem:[#allocation7 + $0x230] sm:$0xf] }
 0x34e   : > { %v5336_v23 = vor.u32 %v6107_v10, %v5335_v21  ;;  %v5265_v10 = vld [vmem:[#allocation7 + $0x1a8] sm:$0xf0] }
 0x34f   : > { %2378 = vmatpush.bf16.msra.mxu3 %v5203_v52  ;;  %2235 = vmatpush.bf16.msrb.mxu0 %v5061_v17  ;;  %v6036_v52 = vld [vmem:[#allocation7 + $0x4] sm:$0xf] }
 0x350   : > { %2395 = vmatpush.bf16.msra.mxu1 %v5235_v27  ;;  %v5151_v36 = vor.u32 %v6036_v52, %v5148_v53  ;;  %v6105_v27 = vld [vmem:[#allocation7 + $0x224] sm:$0xf0]  ;;  %v6096_v53 = vld [vmem:[#allocation7 + $0x1e4] sm:$0xf] }
 0x351   : > { %2409 = vmatpush.bf16.msrb.mxu2 %v5167_v33  ;;  %v5328_v30 = vor.u32 %v6105_v27, %v5327_v25  ;;  %v6103_v33 = vld [vmem:[#allocation7 + $0x214] sm:$0xf0]  ;;  %v6097_v52 = vld [vmem:[#allocation7 + $0x1e4] sm:$0xf0]  ;;  %v5257_v25 = vld [vmem:[#allocation7 + $0x198] sm:$0xf0] }
 0x352   : > { %v5320_v37 = vor.u32 %v6103_v33, %v5319_v32  ;;  %v5247_v32 = vld [vmem:[#allocation7 + $0x180] sm:$0xf]  ;;  %v6085_v33 = vld [vmem:[#allocation7 + $0x184] sm:$0xf0] }
 0x353   : > { %2379 = vmatpush.bf16.msra.mxu3 %v5195_v57  ;;  %2236 = vmatpush.bf16.msrb.mxu0 %v5053_v31  ;;  %v5146_v57 = vld [vmem:[#allocation7] sm:$0xf]  ;;  %v5332_v31 = vor.u32 %v6104_v28, %v5329_v29 }
 0x354   : > { %2396 = vmatpush.bf16.msra.mxu1 %v5227_v41  ;;  %v5147_v61 = vor.u32 %v6037_v58, %v5146_v57  ;;  %v5313_v41 = vld [vmem:[#allocation7 + $0x208] sm:$0xf0]  ;;  %v6095_v57 = vld [vmem:[#allocation7 + $0x1d4] sm:$0xf0]  ;;  %v6094_v58 = vld [vmem:[#allocation7 + $0x1d4] sm:$0xf] }
 0x355   : > { %2410 = vmatpush.bf16.msrb.mxu2 %v5159_v42  ;;  %v5312_v42 = vor.u32 %v6101_v15, %v5311_v39  ;;  %v5316_v43 = vor.u32 %v6100_v40, %v5313_v41 }
 0x357   : > { %2380 = vmatpush.bf16.msra.mxu3 %v5187_v62  ;;  %2421 = vmatpush.bf16.msra.mxu0 %v5239_v46  ;;  %v6053_v62 = vld [vmem:[#allocation7 + $0x84] sm:$0xf0]  ;;  %v6099_v46 = vld [vmem:[#allocation7 + $0x1f4] sm:$0xf0] }
 0x358   : > { %2397 = vmatpush.bf16.msra.mxu1 %v5219_v51  ;;  %v5211_v63 = vor.u32 %v6053_v62, %v5210_v59  ;;  %v5304_v48 = vor.u32 %v6099_v46, %v5303_v45  ;;  %v5295_v51 = vld [vmem:[#allocation7 + $0x1e0] sm:$0xf]  ;;  %v5289_v62 = vld [vmem:[#allocation7 + $0x1d8] sm:$0xf0] }
 0x359   : > { %2411 = vmatpush.bf16.msrb.mxu2 %v5151_v36  ;;  %v5296_v54 = vor.u32 %v6097_v52, %v5295_v51  ;;  %v5297_v36 = vld [vmem:[#allocation7 + $0x1e8] sm:$0xf0]  ;;  %v5404_v52 = vld [vmem:[#allocation7 + $0x2b0] sm:$0xf] }
 0x35a   : > { %v5300_v55 = vor.u32 %v6096_v53, %v5297_v36  ;;  %v6123_v53 = vld [vmem:[#allocation7 + $0x2b4] sm:$0xf0] }
 0x35b   : > { %2381 = vmatpush.bf16.msra.mxu3 %v5179_v12  ;;  %2422 = vmatpush.bf16.msra.mxu0 %v5231_v56  ;;  %v5287_v56 = vld [vmem:[#allocation7 + $0x1d0] sm:$0xf]  ;;  %v5405_v36 = vor.u32 %v6123_v53, %v5404_v52  ;;  %v5364_v52 = vld [vmem:[#allocation7 + $0x260] sm:$0xf]  ;;  %v6113_v53 = vld [vmem:[#allocation7 + $0x264] sm:$0xf0] }
 0x35c   : > { %2398 = vmatpush.bf16.msra.mxu1 %v5211_v63  ;;  %v5292_v63 = vor.u32 %v6094_v58, %v5289_v62 }
 0x35f   : > { %2382 = vmatpush.bf16.msra.mxu3 %v5171_v24  ;;  %2423 = vmatpush.bf16.msra.mxu0 %v5223_v2  ;;  %v5340_v24 = vor.u32 %v6106_v22, %v5337_v11  ;;  %v6092_v2 = vld [vmem:[#allocation7 + $0x1c4] sm:$0xf]  ;;  %v5255_v22 = vld [vmem:[#allocation7 + $0x190] sm:$0xf]  ;;  %v6087_v11 = vld [vmem:[#allocation7 + $0x194] sm:$0xf0] }
 0x360   : > { %v5256_v28 = vor.u32 %v6087_v11, %v5255_v22  ;;  %v6126_v22 = vld [vmem:[#allocation7 + $0x2d4] sm:$0xf]  ;;  %v5422_v11 = vld [vmem:[#allocation7 + $0x2d8] sm:$0xf0] }
 0x363   : > { %2383 = vmatpush.bf16.msra.mxu3 %v5163_v38  ;;  %2424 = vmatpush.bf16.msra.mxu0 %v5215_v5  ;;  %v5324_v38 = vor.u32 %v6102_v34, %v5321_v35  ;;  %v5281_v5 = vld [vmem:[#allocation7 + $0x1c8] sm:$0xf0]  ;;  %v6084_v34 = vld [vmem:[#allocation7 + $0x184] sm:$0xf] }
 0x367   : > { %2384 = vmatpush.bf16.msra.mxu3 %v5155_v50  ;;  %v5308_v50 = vor.u32 %v6098_v47, %v5305_v49 }
 0x36b   : > { %2385 = vmatpush.bf16.msra.mxu3 %v5147_v61  ;;  %v5288_v61 = vor.u32 %v6095_v57, %v5287_v56  ;;  %v5396_v56 = vld [vmem:[#allocation7 + $0x2a0] sm:$0xf]  ;;  %v6121_v57 = vld [vmem:[#allocation7 + $0x2a4] sm:$0xf0] }
 0x36c   : > { %v5397_v62 = vor.u32 %v6121_v57, %v5396_v56  ;;  %v5356_v56 = vld [vmem:[#allocation7 + $0x250] sm:$0xf]  ;;  %v6111_v57 = vld [vmem:[#allocation7 + $0x254] sm:$0xf0] }
 0x3b3   : > { %v1978_v6 = vpop.f32.mrf.mxu1  ;;  %v2035_v7 = vpop.f32.mrf.mxu0 }
 0x3b4   : > { %v2052_v8 = vpack.c.bf16 %v2035_v7, %v2035_v7  ;;  %v1995_v18 = vpack.c.bf16 %v1978_v6, %v1978_v6  ;;  %v5284_v6 = vor.u32 %v6092_v2, %v5281_v5  ;;  %v6130_v5 = vld [vmem:[#allocation7 + $0x2f4] sm:$0xf] }
 0x3b6   : > { %2211 = vmatmul.bf16.vlgmr.msra.gmra.mxu2 %v2052_v8  ;;  %2237 = vmatmul.bf16.vlgmr.msrb.gmra.mxu0 %v2052_v8  ;;  %v5271_v8 = vld [vmem:[#allocation7 + $0x1b0] sm:$0xf] }
 0x3b7   : > { %2611 = vmatpush.bf16.msrb.mxu0 %v5304_v48  ;;  %2637 = vmatpush.bf16.msra.mxu2 %v5308_v50 }
 0x3bb   : > { %v1980_v9 = vpop.f32.mrf.mxu1  ;;  %v2037_v12 = vpop.f32.mrf.mxu0  ;;  %2612 = vmatpush.bf16.msrb.mxu0 %v5296_v54  ;;  %2638 = vmatpush.bf16.msra.mxu2 %v5300_v55  ;;  %v6122_v54 = vld [vmem:[#allocation7 + $0x2b4] sm:$0xf]  ;;  %v5406_v55 = vld [vmem:[#allocation7 + $0x2b8] sm:$0xf0] }
 0x3bc   : > { %v6091_v9 = vld [vmem:[#allocation7 + $0x1b4] sm:$0xf0]  ;;  %v6090_v12 = vld [vmem:[#allocation7 + $0x1b4] sm:$0xf]  ;;  %v5409_v58 = vor.u32 %v6122_v54, %v5406_v55  ;;  %v6112_v54 = vld [vmem:[#allocation7 + $0x264] sm:$0xf] }
 0x3bd   : > { %v5366_v55 = vld [vmem:[#allocation7 + $0x268] sm:$0xf0] }
 0x3bf   : > { %2613 = vmatpush.bf16.msrb.mxu0 %v5288_v61  ;;  %2639 = vmatpush.bf16.msra.mxu2 %v5292_v63  ;;  %v5398_v61 = vld [vmem:[#allocation7 + $0x2a8] sm:$0xf0] }
 0x3c1   : > { %v1991_v13 = vpop.f32.mrf.mxu3 }
 0x3c2   : > { %v1996_v17 = vpack.c.bf16 %v1991_v13, %v1991_v13  ;;  %v5272_v13 = vor.u32 %v6091_v9, %v5271_v8 }
 0x3c3   : > { %v2048_v14 = vpop.f32.mrf.mxu1  ;;  %2614 = vmatpush.bf16.msrb.mxu0 %v5280_v4  ;;  %2640 = vmatpush.bf16.msra.mxu2 %v5284_v6  ;;  %v6131_v4 = vld [vmem:[#allocation7 + $0x2f4] sm:$0xf0]  ;;  %v5438_v6 = vld [vmem:[#allocation7 + $0x2f8] sm:$0xf0] }
 0x3c4   : > { %v2053_v16 = vpack.c.bf16 %v2048_v14, %v2048_v14  ;;  %v5273_v14 = vld [vmem:[#allocation7 + $0x1b8] sm:$0xf0]  ;;  %v5441_v9 = vor.u32 %v6130_v5, %v5438_v6 }
 0x3c6   : > { %5142 = vmatmul.msk.bf16.vlgmr.msrb.gmra.mxu3 %vm2199_vm5, %v2053_v16  ;;  %5143 = vmatmul.msk.bf16.vlgmr.msrb.gmra.mxu1 %vm2199_vm5, %v2053_v16  ;;  %v5276_v16 = vor.u32 %v6090_v12, %v5273_v14  ;;  %v5428_v12 = vld [vmem:[#allocation7 + $0x2e0] sm:$0xf]  ;;  %v6129_v14 = vld [vmem:[#allocation7 + $0x2e4] sm:$0xf0] }
 0x3c7   : > { %2412 = vmatmul.bf16.vlgmr.msrb.gmra.mxu2 %v1995_v18  ;;  %2442 = vmatpush.bf16.msrb.mxu1 %v7785_v60 }
 0x3c8   : > { %2455 = vmatpush.bf16.msrb.mxu3 %v7797_v26  ;;  %5241 = vmatmul.msk.bf16.vlgmr.msra.gmra.mxu0 %vm2199_vm5, %v1996_v17 }
 0x3c9   : > { %v1993_v19 = vpop.f32.mrf.mxu3  ;;  %2615 = vmatpush.bf16.msrb.mxu0 %v5272_v13  ;;  %2641 = vmatpush.bf16.msra.mxu2 %v5276_v16  ;;  %v6128_v16 = vld [vmem:[#allocation7 + $0x2e4] sm:$0xf] }
 0x3ca   : > { %v6088_v19 = vld [vmem:[#allocation7 + $0x1a4] sm:$0xf] }
 0x3cb   : > { %v2050_v20 = vpop.f32.mrf.mxu1 }
 0x3d6   : > { %2386 = vmatmul.bf16.vlgmr.msra.gmra.mxu3 %v1995_v18  ;;  %5240 = vmatmul.msk.bf16.vlgmr.msra.gmra.mxu1 %vm2199_vm5, %v1996_v17  ;;  %v5263_v17 = vld [vmem:[#allocation7 + $0x1a0] sm:$0xf]  ;;  %v6089_v18 = vld [vmem:[#allocation7 + $0x1a4] sm:$0xf0] }
 0x3d7   : > { %2628 = vmatpush.bf16.msra.mxu1 %v5336_v23  ;;  %2654 = vmatpush.bf16.msra.mxu3 %v5340_v24  ;;  %v5264_v21 = vor.u32 %v6089_v18, %v5263_v17  ;;  %v5268_v23 = vor.u32 %v6088_v19, %v5265_v10  ;;  %v6086_v24 = vld [vmem:[#allocation7 + $0x194] sm:$0xf]  ;;  %v5430_v17 = vld [vmem:[#allocation7 + $0x2e8] sm:$0xf0]  ;;  %v5429_v19 = vor.u32 %v6129_v14, %v5428_v12  ;;  %v6127_v10 = vld [vmem:[#allocation7 + $0x2d4] sm:$0xf0] }
 0x3d9   : > { %2616 = vmatpush.bf16.msrb.mxu0 %v5264_v21  ;;  %2642 = vmatpush.bf16.msra.mxu2 %v5268_v23  ;;  %v5420_v21 = vld [vmem:[#allocation7 + $0x2d0] sm:$0xf] }
 0x3db   : > { %2629 = vmatpush.bf16.msra.mxu1 %v5328_v30  ;;  %2655 = vmatpush.bf16.msra.mxu3 %v5332_v31  ;;  %v5260_v30 = vor.u32 %v6086_v24, %v5257_v25  ;;  %v5421_v24 = vor.u32 %v6127_v10, %v5420_v21  ;;  %v5425_v25 = vor.u32 %v6126_v22, %v5422_v11  ;;  %v6147_v21 = vld [vmem:[#allocation7 + $0x374] sm:$0xf0]  ;;  %v6146_v10 = vld [vmem:[#allocation7 + $0x374] sm:$0xf]  ;;  %v5507_v11 = vld [vmem:[#allocation7 + $0x378] sm:$0xf0] }
 0x3dd   : > { %2617 = vmatpush.bf16.msrb.mxu0 %v5256_v28  ;;  %2643 = vmatpush.bf16.msra.mxu2 %v5260_v30  ;;  %v6125_v28 = vld [vmem:[#allocation7 + $0x2c4] sm:$0xf0]  ;;  %v5414_v30 = vld [vmem:[#allocation7 + $0x2c8] sm:$0xf0] }
 0x3df   : > { %2630 = vmatpush.bf16.msra.mxu1 %v5320_v37  ;;  %2656 = vmatpush.bf16.msra.mxu3 %v5324_v38  ;;  %v5248_v37 = vor.u32 %v6085_v33, %v5247_v32  ;;  %v5249_v38 = vld [vmem:[#allocation7 + $0x188] sm:$0xf0]  ;;  %v5343_v33 = vld [vmem:[%s8059_s23 + $0xc] sm:$0x7] }
 0x3e0   : > { %v5252_v40 = vor.u32 %v6084_v34, %v5249_v38  ;;  %v5388_v34 = vld [vmem:[#allocation7 + $0x290] sm:$0xf] }
 0x3e1   : > { %2618 = vmatpush.bf16.msrb.mxu0 %v5248_v37  ;;  %v6118_v37 = vld [vmem:[#allocation7 + $0x294] sm:$0xf] }
 0x3e2   : > { %2644 = vmatpush.bf16.msra.mxu2 %v5252_v40  ;;  %v5380_v40 = vld [vmem:[#allocation7 + $0x280] sm:$0xf] }
 0x3e3   : > { %2631 = vmatpush.bf16.msra.mxu1 %v5312_v42  ;;  %2657 = vmatpush.bf16.msra.mxu3 %v5316_v43 }
 0x3e5   : > { %2846 = vmatpush.bf16.msra.mxu0 %v5405_v36  ;;  %v5365_v36 = vor.u32 %v6113_v53, %v5364_v52  ;;  %v5475_v53 = vld [vmem:[#allocation7 + $0x338] sm:$0xf0] }
 0x3e6   : > { %5243 = vmatmul.msk.bf16.vlgmr.msrb.gmra.mxu1 %vm1958_vm4, %v5242_v44  ;;  %5244 = vmatmul.msk.bf16.vlgmr.msrb.gmra.mxu3 %vm1958_vm4, %v5242_v44 }
 0x3e7   : > { %2677 = vmatpush.bf16.msrb.mxu1 %v7785_v60  ;;  %2690 = vmatpush.bf16.msrb.mxu3 %v7797_v26 }
 0x3e8   : > { %2872 = vmatpush.bf16.msrb.mxu2 %v5409_v58  ;;  %v5369_v58 = vor.u32 %v6112_v54, %v5366_v55  ;;  %v6137_v55 = vld [vmem:[#allocation7 + $0x324] sm:$0xf0] }
 0x3e9   : > { %2847 = vmatpush.bf16.msra.mxu0 %v5397_v62  ;;  %v5357_v62 = vor.u32 %v6111_v57, %v5356_v56  ;;  %v6136_v56 = vld [vmem:[#allocation7 + $0x324] sm:$0xf] }
 0x433   : > { %v2238_v59 = vpop.f32.mrf.mxu0 }
 0x439   : > { %v2212_v3 = vpop.f32.mrf.mxu2 }
 0x43b   : > { %v2240_v7 = vpop.f32.mrf.mxu0 }
 0x441   : > { %v2214_v20 = vpop.f32.mrf.mxu2 }
 0x442   : > { %v5433_v20 = vor.u32 %v6128_v16, %v5430_v17 }
 0x443   : > { %v2251_v27 = vpop.f32.mrf.mxu1 }
 0x444   : > { %v2252_v29 = vadd.f32 %v2251_v27, %v2238_v59  ;;  %v6120_v59 = vld [vmem:[#allocation7 + $0x2a4] sm:$0xf]  ;;  %v5412_v27 = vld [vmem:[#allocation7 + $0x2c0] sm:$0xf] }
 0x445   : > { %v2426_v31 = vpop.f32.mrf.mxu0  ;;  %v5401_v1 = vor.u32 %v6120_v59, %v5398_v61  ;;  %v6110_v59 = vld [vmem:[#allocation7 + $0x254] sm:$0xf]  ;;  %v5358_v61 = vld [vmem:[#allocation7 + $0x258] sm:$0xf0] }
 0x447   : > { %2873 = vmatpush.bf16.msrb.mxu2 %v5401_v1  ;;  %v5348_v1 = vld [vmem:[#allocation7 + $0x240] sm:$0xf] }
 0x449   : > { %v2225_v35 = vpop.f32.mrf.mxu3 }
 0x44a   : > { %v2226_v39 = vadd.f32 %v2225_v35, %v2212_v3  ;;  %v2413_v15 = vpop.f32.mrf.mxu2  ;;  %v5436_v3 = vld [vmem:[#allocation7 + $0x2f0] sm:$0xf]  ;;  %v6119_v35 = vld [vmem:[#allocation7 + $0x294] sm:$0xf0] }
 0x44b   : > { %v2414_v41 = vadd.f32 %v2413_v15, %v2252_v29  ;;  %v2253_v42 = vpop.f32.mrf.mxu1  ;;  %v5437_v8 = vor.u32 %v6131_v4, %v5436_v3  ;;  %v6124_v29 = vld [vmem:[#allocation7 + $0x2c4] sm:$0xf]  ;;  %v5389_v38 = vor.u32 %v6119_v35, %v5388_v34  ;;  %v5350_v4 = vld [vmem:[#allocation7 + $0x248] sm:$0xf0] }
 0x44c   : > { %v5417_v32 = vor.u32 %v6124_v29, %v5414_v30  ;;  %v6116_v42 = vld [vmem:[#allocation7 + $0x284] sm:$0xf]  ;;  %v5489_v30 = vld [vmem:[#allocation7 + $0x350] sm:$0xf] }
 0x44d   : > { %v7815_v43 = vadd.f32 %v2426_v31, %v2414_v41  ;;  %v2428_v44 = vpop.f32.mrf.mxu0  ;;  %v5413_v31 = vor.u32 %v6125_v28, %v5412_v27  ;;  %2848 = vmatpush.bf16.msra.mxu0 %v5389_v38  ;;  %v6117_v41 = vld [vmem:[#allocation7 + $0x284] sm:$0xf0]  ;;  %v6144_v27 = vld [vmem:[#allocation7 + $0x364] sm:$0xf]  ;;  %v5499_v28 = vld [vmem:[#allocation7 + $0x368] sm:$0xf0] }
 0x44e   : > { %v5381_v44 = vor.u32 %v6117_v41, %v5380_v40  ;;  %v5502_v29 = vor.u32 %v6144_v27, %v5499_v28  ;;  %v6150_v27 = vld [vmem:[#allocation7 + $0x394] sm:$0xf] }
 0x451   : > { %v2227_v45 = vpop.f32.mrf.mxu3  ;;  %2849 = vmatpush.bf16.msra.mxu0 %v5381_v44  ;;  %v5481_v44 = vld [vmem:[#allocation7 + $0x340] sm:$0xf] }
 0x452   : > { %v2415_v46 = vpop.f32.mrf.mxu2  ;;  %v5382_v45 = vld [vmem:[#allocation7 + $0x288] sm:$0xf0] }
 0x453   : > { %v2400_v47 = vpop.f32.mrf.mxu1  ;;  %v5385_v46 = vor.u32 %v6116_v42, %v5382_v45  ;;  %v5444_v42 = vld [vmem:[%s8059_s23 + $0x10] sm:$0x7] }
 0x454   : > { %v6141_v45 = vld [vmem:[#allocation7 + $0x344] sm:$0xf0] }
 0x459   : > { %v2387_v48 = vpop.f32.mrf.mxu3 }
 0x45a   : > { %v2388_v49 = vadd.f32 %v2387_v48, %v2226_v39  ;;  %v5390_v39 = vld [vmem:[#allocation7 + $0x298] sm:$0xf0]  ;;  %v6114_v48 = vld [vmem:[#allocation7 + $0x274] sm:$0xf] }
 0x45b   : > { %v2402_v50 = vpop.f32.mrf.mxu1  ;;  %v5393_v15 = vor.u32 %v6118_v37, %v5390_v39 }
 0x45c   : > { %v7817_v51 = vadd.f32 %v2400_v47, %v2388_v49  ;;  %v5372_v47 = vld [vmem:[#allocation7 + $0x270] sm:$0xf]  ;;  %v5374_v49 = vld [vmem:[#allocation7 + $0x278] sm:$0xf0] }
 0x45d   : > { %2874 = vmatpush.bf16.msrb.mxu2 %v5393_v15  ;;  %v5377_v50 = vor.u32 %v6114_v48, %v5374_v49  ;;  %v6139_v49 = vld [vmem:[#allocation7 + $0x334] sm:$0xf0] }
 0x461   : > { %v2389_v63 = vpop.f32.mrf.mxu3  ;;  %2875 = vmatpush.bf16.msrb.mxu2 %v5385_v46  ;;  %v6140_v46 = vld [vmem:[#allocation7 + $0x344] sm:$0xf] }
 0x462   : > { %v5361_v63 = vor.u32 %v6110_v59, %v5358_v61  ;;  %v5537_v61 = vld [vmem:[#allocation7 + $0x3b0] sm:$0xf] }
 0x463   : > { %v2444_v0 = vpop.f32.mrf.mxu1 }
 0x464   : > { %v2461_v2 = vpack.c.bf16 %v2444_v0, %v2444_v0  ;;  %v6109_v0 = vld [vmem:[#allocation7 + $0x244] sm:$0xf0] }
 0x465   : > { %2876 = vmatpush.bf16.msrb.mxu2 %v5377_v50  ;;  %v5349_v3 = vor.u32 %v6109_v0, %v5348_v1  ;;  %v6138_v50 = vld [vmem:[#allocation7 + $0x334] sm:$0xf]  ;;  %v5539_v0 = vld [vmem:[#allocation7 + $0x3b8] sm:$0xf0] }
 0x466   : > { %2619 = vmatmul.bf16.vlgmr.msrb.gmra.mxu0 %v2461_v2  ;;  %2645 = vmatmul.bf16.vlgmr.msra.gmra.mxu2 %v2461_v2  ;;  %v6108_v2 = vld [vmem:[#allocation7 + $0x244] sm:$0xf]  ;;  %v5478_v54 = vor.u32 %v6138_v50, %v5475_v53  ;;  %v3135_v53 = vld [vmem:[#allocation8] sm:$0x3] }
 0x467   : > { %v5353_v5 = vor.u32 %v6108_v2, %v5350_v4  ;;  %v5457_v2 = vld [vmem:[#allocation7 + $0x310] sm:$0xf] }
 0x469   : > { %v2457_v7 = vpop.f32.mrf.mxu3  ;;  %2877 = vmatpush.bf16.msrb.mxu2 %v5369_v58  ;;  %v5467_v58 = vld [vmem:[#allocation7 + $0x328] sm:$0xf0] }
 0x46a   : > { %v2462_v13 = vpack.c.bf16 %v2457_v7, %v2457_v7  ;;  %v5470_v59 = vor.u32 %v6136_v56, %v5467_v58  ;;  %v3137_v56 = vperm.slane %v3135_v53, 0 }
 0x46b   : > { %v2446_v18 = vpop.f32.mrf.mxu1 }
 0x46c   : > { %5341 = vmatmul.msk.bf16.vlgmr.msra.gmra.mxu1 %vm2199_vm5, %v2462_v13  ;;  %5342 = vmatmul.msk.bf16.vlgmr.msra.gmra.mxu3 %vm2199_vm5, %v2462_v13 }
 0x46d   : > { %2863 = vmatpush.bf16.msra.mxu1 %v5437_v8  ;;  %2889 = vmatpush.bf16.msra.mxu3 %v5441_v9 }
 0x46e   : > { %2878 = vmatpush.bf16.msrb.mxu2 %v5361_v63  ;;  %v6154_v63 = vld [vmem:[#allocation7 + $0x3b4] sm:$0xf] }
 0x46f   : > { %v5542_v4 = vor.u32 %v6154_v63, %v5539_v0  ;;  %v3138_v0 = vperm.slane %v3135_v53, 1  ;;  %v6185_v53 = vld [vmem:[#allocation11 + $0xe8] sm:$0xff] }
 0x471   : > { %v2459_v23 = vpop.f32.mrf.mxu3  ;;  %2864 = vmatpush.bf16.msra.mxu1 %v5429_v19  ;;  %2890 = vmatpush.bf16.msra.mxu3 %v5433_v20  ;;  %v5505_v20 = vld [vmem:[#allocation7 + $0x370] sm:$0xf] }
 0x472   : > { %2879 = vmatpush.bf16.msrb.mxu2 %v5353_v5  ;;  %v5506_v22 = vor.u32 %v6147_v21, %v5505_v20  ;;  %v5497_v23 = vld [vmem:[#allocation7 + $0x360] sm:$0xf]  ;;  %v6133_v21 = vld [vmem:[#allocation7 + $0x304] sm:$0xf0] }
 0x473   : > { %v5449_v20 = vld [vmem:[#allocation7 + $0x300] sm:$0xf] }
 0x475   : > { %2865 = vmatpush.bf16.msra.mxu1 %v5421_v24  ;;  %2891 = vmatpush.bf16.msra.mxu3 %v5425_v25  ;;  %v6145_v24 = vld [vmem:[#allocation7 + $0x364] sm:$0xf0]  ;;  %v5510_v25 = vor.u32 %v6146_v10, %v5507_v11  ;;  %v6132_v10 = vld [vmem:[#allocation7 + $0x304] sm:$0xf]  ;;  %v5451_v11 = vld [vmem:[#allocation7 + $0x308] sm:$0xf0] }
 0x477   : > { %3107 = vmatpush.bf16.msra.mxu2 %v5510_v25  ;;  %v6151_v25 = vld [vmem:[#allocation7 + $0x394] sm:$0xf0] }
 0x479   : > { %2866 = vmatpush.bf16.msra.mxu1 %v5413_v31  ;;  %2892 = vmatpush.bf16.msra.mxu3 %v5417_v32  ;;  %v6143_v31 = vld [vmem:[#allocation7 + $0x354] sm:$0xf0] }
 0x47a   : > { %v5490_v35 = vor.u32 %v6143_v31, %v5489_v30  ;;  %v5513_v30 = vld [vmem:[#allocation7 + $0x380] sm:$0xf]  ;;  %v6149_v31 = vld [vmem:[#allocation7 + $0x384] sm:$0xf0] }
 0x47b   : > { %3108 = vmatpush.bf16.msra.mxu2 %v5502_v29 }
 0x47c   : > { %5344 = vmatmul.msk.bf16.vlgmr.msrb.gmra.mxu1 %vm1958_vm4, %v5343_v33  ;;  %5345 = vmatmul.msk.bf16.vlgmr.msrb.gmra.mxu3 %vm1958_vm4, %v5343_v33  ;;  %v6142_v33 = vld [vmem:[#allocation7 + $0x354] sm:$0xf] }
 0x47d   : > { %2912 = vmatpush.bf16.msrb.mxu1 %v7785_v60  ;;  %2925 = vmatpush.bf16.msrb.mxu3 %v7797_v26  ;;  %v6115_v60 = vld [vmem:[#allocation7 + $0x274] sm:$0xf0] }
 0x47e   : > { %v5373_v26 = vor.u32 %v6115_v60, %v5372_v47  ;;  %v5482_v47 = vor.u32 %v6141_v45, %v5481_v44  ;;  %v5483_v60 = vld [vmem:[#allocation7 + $0x348] sm:$0xf0] }
 0x47f   : > { %v5486_v48 = vor.u32 %v6140_v46, %v5483_v60 }
 0x480   : > { %2850 = vmatpush.bf16.msra.mxu0 %v5373_v26  ;;  %v5473_v26 = vld [vmem:[#allocation7 + $0x330] sm:$0xf] }
 0x481   : > { %v5474_v52 = vor.u32 %v6139_v49, %v5473_v26 }
 0x484   : > { %2851 = vmatpush.bf16.msra.mxu0 %v5365_v36  ;;  %v5465_v36 = vld [vmem:[#allocation7 + $0x320] sm:$0xf] }
 0x485   : > { %v5466_v57 = vor.u32 %v6137_v55, %v5465_v36 }
 0x488   : > { %2852 = vmatpush.bf16.msra.mxu0 %v5357_v62  ;;  %v6155_v62 = vld [vmem:[#allocation7 + $0x3b4] sm:$0xf0] }
 0x489   : > { %v5538_v1 = vor.u32 %v6155_v62, %v5537_v61 }
 0x48c   : > { %2853 = vmatpush.bf16.msra.mxu0 %v5349_v3  ;;  %v6135_v3 = vld [vmem:[#allocation7 + $0x314] sm:$0xf0] }
 0x48d   : > { %v5458_v5 = vor.u32 %v6135_v3, %v5457_v2 }
 0x490   : > { %3081 = vmatpush.bf16.msrb.mxu0 %v5506_v22  ;;  %v5450_v22 = vor.u32 %v6133_v21, %v5449_v20  ;;  %v6179_v21 = vld [vmem:[#allocation11 + $0xb8] sm:$0xff] }
 0x4e3   : > { %v2620_v6 = vpop.f32.mrf.mxu0 }
 0x4e9   : > { %v2633_v7 = vpop.f32.mrf.mxu1  ;;  %v2646_v8 = vpop.f32.mrf.mxu2 }
 0x4ea   : > { %v2634_v9 = vadd.f32 %v2633_v7, %v2620_v6  ;;  %v6134_v6 = vld [vmem:[#allocation7 + $0x314] sm:$0xf]  ;;  %v5459_v7 = vld [vmem:[#allocation7 + $0x318] sm:$0xf0] }
 0x4eb   : > { %v2622_v12 = vpop.f32.mrf.mxu0 }
 0x4ec   : > { %v7827_v13 = vadd.f32 %v2634_v9, %v7817_v51  ;;  %v5498_v51 = vor.u32 %v6145_v24, %v5497_v23  ;;  %v5529_v9 = vld [vmem:[#allocation7 + $0x3a0] sm:$0xf]  ;;  %v6153_v12 = vld [vmem:[#allocation7 + $0x3a4] sm:$0xf0]  ;;  %v5454_v23 = vor.u32 %v6132_v10, %v5451_v11  ;;  %v5521_v24 = vld [vmem:[#allocation7 + $0x390] sm:$0xf] }
 0x4ed   : > { %v5522_v28 = vor.u32 %v6151_v25, %v5521_v24  ;;  %v6167_v10 = vld [vmem:[#allocation11 + $0x58] sm:$0xff]  ;;  %v6161_v11 = vld [vmem:[#allocation11 + $0x28] sm:$0xff]  ;;  %v6166_v24 = vld [vmem:[#allocation11 + $0x50] sm:$0xff] }
 0x4ee   : > { %3082 = vmatpush.bf16.msrb.mxu0 %v5498_v51  ;;  %v5523_v51 = vld [vmem:[#allocation7 + $0x398] sm:$0xf0]  ;;  %v6160_v25 = vld [vmem:[#allocation11 + $0x20] sm:$0xff] }
 0x4ef   : > { %v2659_v14 = vpop.f32.mrf.mxu3  ;;  %v5526_v29 = vor.u32 %v6150_v27, %v5523_v51  ;;  %v6177_v27 = vld [vmem:[#allocation11 + $0xa8] sm:$0xff]  ;;  %v6159_v51 = vld [vmem:[#allocation11 + $0x18] sm:$0xff] }
 0x4f0   : > { %v2660_v16 = vadd.f32 %v2659_v14, %v2646_v8  ;;  %v5462_v8 = vor.u32 %v6134_v6, %v5459_v7  ;;  %v6152_v14 = vld [vmem:[#allocation7 + $0x3a4] sm:$0xf]  ;;  %v6173_v7 = vld [vmem:[#allocation11 + $0x88] sm:$0xff] }
 0x4f1   : > { %v2635_v17 = vpop.f32.mrf.mxu1  ;;  %v2648_v18 = vpop.f32.mrf.mxu2  ;;  %v6163_v6 = vld [vmem:[#allocation11 + $0x38] sm:$0xff] }
 0x4f2   : > { %v7830_v19 = vadd.f32 %v2660_v16, %v7815_v43  ;;  %v5491_v43 = vld [vmem:[#allocation7 + $0x358] sm:$0xf0]  ;;  %3083 = vmatpush.bf16.msrb.mxu0 %v5490_v35  ;;  %v5530_v16 = vor.u32 %v6153_v12, %v5529_v9  ;;  %v5531_v17 = vld [vmem:[#allocation7 + $0x3a8] sm:$0xf0]  ;;  %v3147_v12 = vld [vmem:[#allocation10] sm:$0x3] }
 0x4f3   : > { %v5494_v38 = vor.u32 %v6142_v33, %v5491_v43  ;;  %v5534_v18 = vor.u32 %v6152_v14, %v5531_v17  ;;  %v5514_v33 = vor.u32 %v6149_v31, %v5513_v30  ;;  %v5515_v43 = vld [vmem:[#allocation7 + $0x388] sm:$0xf0]  ;;  %v3212_v14 = vld [vmem:[#allocation10 + $0x2] sm:$0x3]  ;;  %v6162_v17 = vld [vmem:[#allocation11 + $0x30] sm:$0xff] }
 0x4f4   : > { %v6164_v30 = vld [vmem:[#allocation11 + $0x40] sm:$0xff]  ;;  %v6158_v31 = vld [vmem:[#allocation11 + $0x10] sm:$0xff] }
 0x4f5   : > { %3109 = vmatpush.bf16.msra.mxu2 %v5494_v38 }
 0x4f6   : > { %3084 = vmatpush.bf16.msrb.mxu0 %v5482_v47 }
 0x4f7   : > { %v2661_v32 = vpop.f32.mrf.mxu3 }
 0x4f8   : > { %v6148_v32 = vld [vmem:[#allocation7 + $0x384] sm:$0xf] }
 0x4f9   : > { %v2679_v34 = vpop.f32.mrf.mxu1  ;;  %3110 = vmatpush.bf16.msra.mxu2 %v5486_v48 }
 0x4fa   : > { %v2696_v37 = vpack.c.bf16 %v2679_v34, %v2679_v34  ;;  %3085 = vmatpush.bf16.msrb.mxu0 %v5474_v52  ;;  %v5518_v34 = vor.u32 %v6148_v32, %v5515_v43  ;;  %v6157_v32 = vld [vmem:[#allocation11 + $0x8] sm:$0xff]  ;;  %v6156_v43 = vld [vmem:[#allocation11] sm:$0xff] }
 0x4fc   : > { %2854 = vmatmul.bf16.vlgmr.msra.gmra.mxu0 %v2696_v37  ;;  %2880 = vmatmul.bf16.vlgmr.msrb.gmra.mxu2 %v2696_v37 }
 0x4fd   : > { %3111 = vmatpush.bf16.msra.mxu2 %v5478_v54 }
 0x4fe   : > { %3086 = vmatpush.bf16.msrb.mxu0 %v5466_v57  ;;  %v6175_v57 = vld [vmem:[#allocation11 + $0x98] sm:$0xff] }
 0x4ff   : > { %v2692_v39 = vpop.f32.mrf.mxu3 }
 0x500   : > { %v2697_v15 = vpack.c.bf16 %v2692_v39, %v2692_v39 }
 0x501   : > { %v2681_v40 = vpop.f32.mrf.mxu1  ;;  %3112 = vmatpush.bf16.msra.mxu2 %v5470_v59  ;;  %v6174_v59 = vld [vmem:[#allocation11 + $0x90] sm:$0xff] }
 0x502   : > { %5442 = vmatmul.msk.bf16.vlgmr.msra.gmra.mxu1 %vm2199_vm5, %v2697_v15  ;;  %5443 = vmatmul.msk.bf16.vlgmr.msra.gmra.mxu3 %vm2199_vm5, %v2697_v15 }
 0x503   : > { %3098 = vmatpush.bf16.msra.mxu1 %v5538_v1  ;;  %3124 = vmatpush.bf16.msra.mxu3 %v5542_v4 }
 0x504   : > { %3087 = vmatpush.bf16.msrb.mxu0 %v5458_v5 }
 0x505   : > { %3113 = vmatpush.bf16.msra.mxu2 %v5462_v8 }
 0x507   : > { %v2694_v41 = vpop.f32.mrf.mxu3  ;;  %3099 = vmatpush.bf16.msra.mxu1 %v5530_v16  ;;  %3125 = vmatpush.bf16.msra.mxu3 %v5534_v18 }
 0x508   : > { %3088 = vmatpush.bf16.msrb.mxu0 %v5450_v22 }
 0x509   : > { %3114 = vmatpush.bf16.msra.mxu2 %v5454_v23  ;;  %v6178_v23 = vld [vmem:[#allocation11 + $0xb0] sm:$0xff] }
 0x50b   : > { %3100 = vmatpush.bf16.msra.mxu1 %v5522_v28  ;;  %3126 = vmatpush.bf16.msra.mxu3 %v5526_v29  ;;  %v6165_v28 = vld [vmem:[#allocation11 + $0x48] sm:$0xff]  ;;  %v6176_v29 = vld [vmem:[#allocation11 + $0xa0] sm:$0xff] }
 0x50d   : > { %3344 = vmatpush.bf16.msrb.mxu2 %v6175_v57  ;;  %v6188_v57 = vld [vmem:[#allocation11 + $0x100] sm:$0xff] }
 0x50f   : > { %3101 = vmatpush.bf16.msra.mxu1 %v5514_v33  ;;  %3127 = vmatpush.bf16.msra.mxu3 %v5518_v34  ;;  %v6172_v33 = vld [vmem:[#allocation11 + $0x80] sm:$0xff]  ;;  %v6171_v34 = vld [vmem:[#allocation11 + $0x78] sm:$0xff] }
 0x511   : > { %3345 = vmatpush.bf16.msrb.mxu2 %v6174_v59  ;;  %v6181_v59 = vld [vmem:[#allocation11 + $0xc8] sm:$0xff] }
 0x512   : > { %5445 = vmatmul.msk.bf16.vlgmr.msrb.gmra.mxu1 %vm1958_vm4, %v5444_v42  ;;  %5446 = vmatmul.msk.bf16.vlgmr.msrb.gmra.mxu3 %vm1958_vm4, %v5444_v42 }
 0x515   : > { %3346 = vmatpush.bf16.msrb.mxu2 %v6173_v7 }
 0x519   : > { %3347 = vmatpush.bf16.msrb.mxu2 %v6172_v33 }
 0x51d   : > { %3348 = vmatpush.bf16.msrb.mxu2 %v6171_v34 }
 0x579   : > { %v2855_v35 = vpop.f32.mrf.mxu0 }
 0x57f   : > { %v2868_v37 = vpop.f32.mrf.mxu1  ;;  %v2881_v38 = vpop.f32.mrf.mxu2 }
 0x580   : > { %v2869_v39 = vadd.f32 %v2868_v37, %v2855_v35  ;;  %v6170_v35 = vld [vmem:[#allocation11 + $0x70] sm:$0xff]  ;;  %v6169_v37 = vld [vmem:[#allocation11 + $0x68] sm:$0xff] }
 0x581   : > { %v2857_v15 = vpop.f32.mrf.mxu0  ;;  %3349 = vmatpush.bf16.msrb.mxu2 %v6170_v35  ;;  %v3638_v35 = vld [vmem:[%s8061_s24] sm:$0x3]  ;;  %s1315_s24 = scalar_lea.vmem %s8069_s1, %s7645_s16  ;;  %s4462_s1 = scalar_lea.hbm %s7353_s3, %s7381_s0 }
 0x582   : > { %v2898_v40 = vadd.f32 %v2869_v39, %v7827_v13 }
 0x585   : > { %v2894_v41 = vpop.f32.mrf.mxu3  ;;  %3350 = vmatpush.bf16.msrb.mxu2 %v6169_v37  ;;  %v6192_v37 = vld [vmem:[#allocation13] sm:$0xff] }
 0x586   : > { %v2895_v42 = vadd.f32 %v2894_v41, %v2881_v38  ;;  %v6168_v38 = vld [vmem:[#allocation11 + $0x60] sm:$0xff] }
 0x587   : > { %v2870_v44 = vpop.f32.mrf.mxu1  ;;  %v2883_v45 = vpop.f32.mrf.mxu2 }
 0x588   : > { %v2899_v46 = vadd.f32 %v2895_v42, %v7830_v19 }
 0x589   : > { %3351 = vmatpush.bf16.msrb.mxu2 %v6168_v38  ;;  %v6216_v38 = vld [vmem:[%s8062_s14] sm:$0xff]  ;;  %s8070_s14 = sld [smem:[#allocation54_spill]] }
 0x58d   : > { %v2896_v47 = vpop.f32.mrf.mxu3 }
 0x58f   : > { %v2914_v60 = vpop.f32.mrf.mxu1 }
 0x590   : > { %v2931_v48 = vpack.c.bf16 %v2914_v60, %v2914_v60 }
 0x592   : > { %3089 = vmatmul.bf16.vlgmr.msrb.gmra.mxu0 %v2931_v48  ;;  %3115 = vmatmul.bf16.vlgmr.msra.gmra.mxu2 %v2931_v48 }
 0x595   : > { %v2927_v26 = vpop.f32.mrf.mxu3 }
 0x596   : > { %v2932_v49 = vpack.c.bf16 %v2927_v26, %v2927_v26 }
 0x597   : > { %v2916_v50 = vpop.f32.mrf.mxu1 }
 0x598   : > { %5543 = vmatmul.msk.bf16.vlgmr.msra.gmra.mxu1 %vm2199_vm5, %v2932_v49  ;;  %5544 = vmatmul.msk.bf16.vlgmr.msra.gmra.mxu3 %vm2199_vm5, %v2932_v49  ;;  %v3472_v49 = vld [vmem:[#allocation10 + $0x4] sm:$0x3] }
 0x599   : > { %v6187_v50 = vld [vmem:[#allocation11 + $0xf8] sm:$0xff] }
 0x59a   : > { %3604 = vmatpush.bf16.msra.mxu2 %v6187_v50  ;;  %v3935_v50 = vld [vmem:[%s1312_s4] sm:$0x1]  ;;  %s1298_s4 = sand.u32 1, %s7117_s10  }
 0x59d   : > { %v2929_v52 = vpop.f32.mrf.mxu3 }
 0x59e   : > { %v6186_v52 = vld [vmem:[#allocation11 + $0xf0] sm:$0xff] }
 0x59f   : > { %3605 = vmatpush.bf16.msra.mxu2 %v6186_v52  ;;  %v3936_v52 = vpack.c.bf16 %v3935_v50, %v3935_v50 }
 0x5a3   : > { %3606 = vmatpush.bf16.msra.mxu2 %v6185_v53  ;;  %v6206_v53 = vld [vmem:[%s8063_s6 + $0x40] sm:$0xff] }
 0x60f   : > { %v3090_v13 = vpop.f32.mrf.mxu0 }
 0x615   : > { %v3103_v54 = vpop.f32.mrf.mxu1  ;;  %v3116_v36 = vpop.f32.mrf.mxu2 }
 0x616   : > { %v3104_v55 = vadd.f32 %v3103_v54, %v3090_v13  ;;  %v6191_v13 = vld [vmem:[#allocation11 + $0x118] sm:$0xff]  ;;  %v6184_v54 = vld [vmem:[#allocation11 + $0xe0] sm:$0xff] }
 0x617   : > { %v3092_v19 = vpop.f32.mrf.mxu0  ;;  %3607 = vmatpush.bf16.msra.mxu2 %v6184_v54  ;;  %v6212_v54 = vld [vmem:[%s8063_s6 + $0x70] sm:$0xff] }
 0x618   : > { %v3133_v58 = vadd.f32 %v3104_v55, %v2898_v40  ;;  %v6183_v55 = vld [vmem:[#allocation11 + $0xd8] sm:$0xff]  ;;  %v6182_v19 = vld [vmem:[#allocation11 + $0xd0] sm:$0xff] }
 0x61a   : > { %v3141_v61 = vadd.f32 %v3137_v56, %v3133_v58  ;;  %v6189_v56 = vld [vmem:[#allocation11 + $0x108] sm:$0xff] }
 0x61b   : > { %v3129_v62 = vpop.f32.mrf.mxu3  ;;  %3608 = vmatpush.bf16.msra.mxu2 %v6183_v55  ;;  %v6205_v55 = vld [vmem:[%s8063_s6 + $0x38] sm:$0xff] }
 0x61c   : > { %v3143_v63 = vmax.f32 %v3141_v61, 0.0  ;;  %v3130_v1 = vadd.f32 %v3129_v62, %v3116_v36  ;;  %v6190_v36 = vld [vmem:[#allocation11 + $0x110] sm:$0xff]  ;;  %v6180_v62 = vld [vmem:[#allocation11 + $0xc0] sm:$0xff] }
 0x61d   : > { %v3105_v2 = vpop.f32.mrf.mxu1  ;;  %v3118_v3 = vpop.f32.mrf.mxu2 }
 0x61e   : > { %v3134_v4 = vadd.f32 %v3130_v1, %v2899_v46  ;;  %v3145_v5 = vpack.c.bf16 %v3143_v63, %v3143_v63 }
 0x61f   : > { %3609 = vmatpush.bf16.msra.mxu2 %v6182_v19  ;;  %v6204_v19 = vld [vmem:[%s8063_s6 + $0x30] sm:$0xff] }
 0x620   : > { %v3142_v8 = vadd.f32 %v3138_v0, %v3134_v4  ;;  %v3154_v9 = vsel %vm3152_vm6, %v3145_v5, 0 }
 0x621   : > { %3166 = vmatpush.bf16.msrb.mxu1 %v3154_v9  ;;  %3223 = vmatpush.bf16.msra.mxu0 %v3154_v9 }
 0x622   : > { %v3144_v16 = vmax.f32 %v3142_v8, 0.0 }
 0x623   : > { %v3131_v18 = vpop.f32.mrf.mxu3  ;;  %3610 = vmatpush.bf16.msra.mxu2 %v6181_v59 }
 0x624   : > { %5545 = vmatmul.msk.bf16.vlgmr.msrb.gmra.mxu1 %vm3148_vm7, %v3147_v12  ;;  %v3146_v20 = vpack.c.bf16 %v3144_v16, %v3144_v16  ;;  %5547 = vmatmul.msk.bf16.vlgmr.msra.gmra.mxu0 %vm3148_vm7, %v3212_v14  ;;  %v6197_v18 = vld [vmem:[#allocation13 + $0x28] sm:$0xff] }
 0x625   : > { %3445 = vmatpush.bf16.msrb.mxu0 %v6163_v6 }
 0x626   : > { %v3157_v22 = vsel %vm3152_vm6, %v3146_v20, 0  ;;  %v6196_v20 = vld [vmem:[#allocation13 + $0x20] sm:$0xff] }
 0x627   : > { %3179 = vmatpush.bf16.msrb.mxu3 %v3157_v22  ;;  %3236 = vmatpush.bf16.msra.mxu1 %v3157_v22 }
 0x628   : > { %3611 = vmatpush.bf16.msra.mxu2 %v6180_v62 }
 0x629   : > { %3446 = vmatpush.bf16.msrb.mxu0 %v6162_v17 }
 0x62a   : > { %5546 = vmatmul.msk.bf16.vlgmr.msrb.gmra.mxu3 %vm3148_vm7, %v3147_v12 }
 0x62b   : > { %3361 = vmatpush.bf16.msra.mxu3 %v6179_v21  ;;  %3462 = vmatpush.bf16.msrb.mxu1 %v6167_v10  ;;  %v6195_v10 = vld [vmem:[#allocation13 + $0x18] sm:$0xff] }
 0x62d   : > { %3447 = vmatpush.bf16.msrb.mxu0 %v6161_v11 }
 0x62f   : > { %3362 = vmatpush.bf16.msra.mxu3 %v6178_v23  ;;  %3463 = vmatpush.bf16.msrb.mxu1 %v6166_v24  ;;  %v6193_v23 = vld [vmem:[#allocation13 + $0x8] sm:$0xff] }
 0x631   : > { %3448 = vmatpush.bf16.msrb.mxu0 %v6160_v25 }
 0x633   : > { %3363 = vmatpush.bf16.msra.mxu3 %v6177_v27  ;;  %3464 = vmatpush.bf16.msrb.mxu1 %v6165_v28  ;;  %v6508_v27 = vld [vmem:[%s8060_s15] ss:$0 sm:$0xff]  ;;  %s1318_s15 = scalar_lea.vmem %s8067_s11, %s7645_s16 }
 0x634   : > { %5548 = vmatmul.msk.bf16.vlgmr.msra.gmra.mxu1 %vm3148_vm7, %v3212_v14 }
 0x635   : > { %3449 = vmatpush.bf16.msrb.mxu0 %v6159_v51 }
 0x637   : > { %3364 = vmatpush.bf16.msra.mxu3 %v6176_v29  ;;  %3465 = vmatpush.bf16.msrb.mxu1 %v6164_v30  ;;  %v7183_v29 = vmov 65535  }
 0x638   : > { %v3645_v30 = vsel %vm3643_vm8, 4294967295, %v7183_v29  ;;  %v4045_v29 = vld [vmem:[#allocation17] sm:$0x3] }
 0x639   : > { %3450 = vmatpush.bf16.msrb.mxu0 %v6158_v31  ;;  %v3646_v33 = vsel %vm3644_vm9, %v3645_v30, 0 }
 0x63b   : > { %3483 = vmatpush.bf16.msrb.mxu3 %v3154_v9  ;;  %3496 = vmatpush.bf16.msra.mxu1 %v3157_v22  ;;  %v6194_v22 = vld [vmem:[#allocation13 + $0x10] sm:$0xff] }
 0x63d   : > { %3451 = vmatpush.bf16.msrb.mxu0 %v6157_v32 }
 0x641   : > { %3452 = vmatpush.bf16.msrb.mxu0 %v6156_v43 }
 0x6a1   : > { %v3168_v39 = vpop.f32.mrf.mxu1  ;;  %v3225_v15 = vpop.f32.mrf.mxu0 }
 0x6a2   : > { %v3185_v40 = vpack.c.bf16 %v3168_v39, %v3168_v39  ;;  %v3242_v41 = vpack.c.bf16 %v3225_v15, %v3225_v15  ;;  %v6203_v39 = vld [vmem:[%s8063_s6 + $0x28] sm:$0xff]  ;;  %v6209_v15 = vld [vmem:[%s8063_s6 + $0x58] sm:$0xff] }
 0x6a4   : > { %3453 = vmatmul.bf16.vlgmr.msrb.gmra.mxu0 %v3185_v40  ;;  %3352 = vmatmul.bf16.vlgmr.msrb.gmra.mxu2 %v3242_v41  ;;  %v6215_v40 = vld [vmem:[%s8063_s6 + $0x88] sm:$0xff]  ;;  %v6202_v41 = vld [vmem:[%s8063_s6 + $0x20] sm:$0xff] }
 0x6a5   : > { %3923 = vmatpush.bf16.msrb.mxu2 %v6215_v40 }
 0x6a9   : > { %v3170_v42 = vpop.f32.mrf.mxu1  ;;  %v3227_v44 = vpop.f32.mrf.mxu0 }
 0x6aa   : > { %v6208_v42 = vld [vmem:[%s8063_s6 + $0x50] sm:$0xff]  ;;  %v6214_v44 = vld [vmem:[%s8063_s6 + $0x80] sm:$0xff] }
 0x6ab   : > { %3924 = vmatpush.bf16.msrb.mxu2 %v6214_v44 }
 0x6ad   : > { %v3181_v45 = vpop.f32.mrf.mxu3 }
 0x6ae   : > { %v3186_v46 = vpack.c.bf16 %v3181_v45, %v3181_v45  ;;  %v6201_v45 = vld [vmem:[%s8063_s6 + $0x18] sm:$0xff] }
 0x6b0   : > { %5646 = vmatmul.msk.bf16.vlgmr.msrb.gmra.mxu1 %vm2199_vm5, %v3186_v46  ;;  %v6207_v46 = vld [vmem:[%s8063_s6 + $0x48] sm:$0xff] }
 0x6b1   : > { %v3238_v47 = vpop.f32.mrf.mxu1  ;;  %3718 = vmatpush.bf16.msrb.mxu1 %v6197_v18 }
 0x6b2   : > { %v3243_v60 = vpack.c.bf16 %v3238_v47, %v3238_v47  ;;  %v6213_v47 = vld [vmem:[%s8063_s6 + $0x78] sm:$0xff] }
 0x6b3   : > { %3925 = vmatpush.bf16.msrb.mxu2 %v6213_v47 }
 0x6b4   : > { %5597 = vmatmul.msk.bf16.vlgmr.msra.gmra.mxu3 %vm2199_vm5, %v3243_v60  ;;  %v6200_v60 = vld [vmem:[%s8063_s6 + $0x10] sm:$0xff] }
 0x6b5   : > { %v3183_v48 = vpop.f32.mrf.mxu3  ;;  %3621 = vmatpush.bf16.msra.mxu3 %v6191_v13  ;;  %3719 = vmatpush.bf16.msrb.mxu1 %v6196_v20  ;;  %v6199_v13 = vld [vmem:[%s8063_s6 + $0x8] sm:$0xff] }
 0x6b7   : > { %3926 = vmatpush.bf16.msrb.mxu2 %v6212_v54 }
 0x6b9   : > { %v3240_v26 = vpop.f32.mrf.mxu1  ;;  %3622 = vmatpush.bf16.msra.mxu3 %v6190_v36  ;;  %3720 = vmatpush.bf16.msrb.mxu1 %v6195_v10  ;;  %v6198_v36 = vld [vmem:[%s8063_s6] sm:$0xff]  ;;  %v6224_v10 = vld [vmem:[#allocation19 + $0x20] sm:$0xff] }
 0x6bd   : > { %3623 = vmatpush.bf16.msra.mxu3 %v6189_v56  ;;  %3721 = vmatpush.bf16.msrb.mxu1 %v6194_v22  ;;  %v6211_v56 = vld [vmem:[%s8063_s6 + $0x68] sm:$0xff]  ;;  %v6223_v22 = vld [vmem:[#allocation19 + $0x18] sm:$0xff] }
 0x6be   : > { %3927 = vmatpush.bf16.msrb.mxu2 %v6211_v56 }
 0x6c0   : > { %5648 = vmatmul.msk.bf16.vlgmr.msra.gmra.mxu1 %vm3148_vm7, %v3472_v49 }
 0x6c1   : > { %3624 = vmatpush.bf16.msra.mxu3 %v6188_v57  ;;  %3722 = vmatpush.bf16.msrb.mxu1 %v6193_v23  ;;  %v6210_v57 = vld [vmem:[%s8063_s6 + $0x60] sm:$0xff]  ;;  %v6221_v23 = vld [vmem:[#allocation19 + $0x8] sm:$0xff]  ;;  %s7047_s6 = scalar_lea.hbm %s7353_s3, 2 }
 0x6c2   : > { %3928 = vmatpush.bf16.msrb.mxu2 %v6210_v57 }
 0x6c4   : > { %5647 = vmatmul.msk.bf16.vlgmr.msrb.gmra.mxu3 %vm3148_vm7, %v3472_v49 }
 0x6c5   : > { %3723 = vmatpush.bf16.msrb.mxu1 %v6192_v37  ;;  %3784 = vmatpush.bf16.msrb.mxu3 %v6203_v39 }
 0x6c9   : > { %3957 = vmatpush.bf16.msra.mxu1 %v6216_v38  ;;  %3785 = vmatpush.bf16.msrb.mxu3 %v6202_v41 }
 0x6cd   : > { %3786 = vmatpush.bf16.msrb.mxu3 %v6201_v45 }
 0x6d1   : > { %3787 = vmatpush.bf16.msrb.mxu3 %v6200_v60  ;;  %v4006_v60 = vld [vmem:[%s8070_s14] sm:$0x1]  ;;  %s4451_s14 = scalar_lea.sflag [#allocation4], %s1298_s4 }
 0x6d5   : > { %3788 = vmatpush.bf16.msrb.mxu3 %v6199_v13 }
 0x6d9   : > { %3789 = vmatpush.bf16.msrb.mxu3 %v6198_v36 }
 0x721   : > { %v3454_v58 = vpop.f32.mrf.mxu0 }
 0x727   : > { %v3353_v61 = vpop.f32.mrf.mxu2 }
 0x729   : > { %v3456_v63 = vpop.f32.mrf.mxu0 }
 0x72a   : > { %v6218_v63 = vld [vmem:[%s8066_s18 + $0x8] sm:$0xff] }
 0x72d   : > { %v3467_v1 = vpop.f32.mrf.mxu1 }
 0x72f   : > { %v3355_v0 = vpop.f32.mrf.mxu2 }
 0x730   : > { %v6227_v0 = vld [vmem:[#allocation19 + $0x38] sm:$0xff] }
 0x735   : > { %v3469_v2 = vpop.f32.mrf.mxu1 }
 0x736   : > { %v6226_v2 = vld [vmem:[#allocation19 + $0x30] sm:$0xff] }
 0x737   : > { %v3366_v3 = vpop.f32.mrf.mxu3 }
 0x738   : > { %v3367_v4 = vadd.f32 %v3366_v3, %v3353_v61  ;;  %v6225_v3 = vld [vmem:[#allocation19 + $0x28] sm:$0xff] }
 0x73a   : > { %v3455_v5 = vadd.f32 %v3454_v58, %v3367_v4  ;;  %v3969_v58 = vld [vmem:[%s8065_s7 + $0x10] sm:$0x3]  ;;  %s7898_s7 = scalar_lea.vmem [#allocation29], %s1298_s4 }
 0x73b   : > { %v3980_v59 = vunpack.c.l.b16 %v3969_v58 }
 0x73c   : > { %v3468_v6 = vadd.f32 %v3467_v1, %v3455_v5  ;;  %v6217_v1 = vld [vmem:[%s8066_s18] sm:$0xff] }
 0x73d   : > { %v3498_v7 = vpop.f32.mrf.mxu1  ;;  %v3983_v61 = vpack.c.b16 %v3980_v59, %v3980_v59  ;;  %v4148_v59 = vld [vmem:[#allocation22] sm:$0x1] }
 0x73e   : > { %v3503_v8 = vpack.c.bf16 %v3498_v7, %v3498_v7 }
 0x73f   : > { %v3368_v9 = vpop.f32.mrf.mxu3  ;;  %v3991_v62 = vsel %vm3644_vm9, %v3983_v61, 0 }
 0x740   : > { %5697 = vmatmul.msk.bf16.vlgmr.msra.gmra.mxu3 %vm2199_vm5, %v3503_v8 }
 0x741   : > { %3998 = vmatpush.bf16.msra.mxu3 %v3991_v62 }
 0x745   : > { %v3500_v12 = vpop.f32.mrf.mxu1  ;;  %3999 = vmatpush.bf16.msra.mxu3 %v6218_v63 }
 0x747   : > { %v3485_v14 = vpop.f32.mrf.mxu3 }
 0x748   : > { %v3502_v16 = vpack.c.bf16 %v3485_v14, %v3485_v14  ;;  %v3939_v14 = vld [vmem:[#allocation14] sm:$0x1] }
 0x749   : > { %4000 = vmatpush.bf16.msra.mxu3 %v6217_v1 }
 0x74a   : > { %3612 = vmatmul.bf16.vlgmr.msra.gmra.mxu2 %v3502_v16 }
 0x74b   : > { %4132 = vmatpush.bf16.msra.mxu2 %v6227_v0  ;;  %v7184_v0 = vmov 128.0  }
 0x74f   : > { %v3487_v17 = vpop.f32.mrf.mxu3  ;;  %4133 = vmatpush.bf16.msra.mxu2 %v6226_v2  ;;  %v5933_v2 = vld [vmem:[%s8071_s20 + $0x70] sm:$0xf] }
 0x753   : > { %4134 = vmatpush.bf16.msra.mxu2 %v6225_v3  ;;  %v6243_v3 = vld [vmem:[%s8071_s20 + $0x74] sm:$0xf0] }
 0x757   : > { %4135 = vmatpush.bf16.msra.mxu2 %v6224_v10 }
 0x75b   : > { %4136 = vmatpush.bf16.msra.mxu2 %v6223_v22 }
 0x7c3   : > { %v3626_v21 = vpop.f32.mrf.mxu3 }
 0x7cb   : > { %v3628_v11 = vpop.f32.mrf.mxu3 }
 0x7cc   : > { %v6222_v11 = vld [vmem:[#allocation19 + $0x10] sm:$0xff] }
 0x7cd   : > { %v3613_v24 = vpop.f32.mrf.mxu2  ;;  %4137 = vmatpush.bf16.msra.mxu2 %v6222_v11  ;;  %v5925_v11 = vld [vmem:[%s8071_s20 + $0x60] sm:$0xf] }
 0x7ce   : > { %v3627_v25 = vadd.f32 %v3626_v21, %v3613_v24  ;;  %v6220_v24 = vld [vmem:[#allocation19] sm:$0xff] }
 0x7d0   : > { %v3630_v28 = vadd.f32 %v3627_v25, %v3468_v6  ;;  %v4012_v25 = vld [vmem:[%s8068_s26 + $0x8] sm:$0x1] }
 0x7d1   : > { %4138 = vmatpush.bf16.msra.mxu2 %v6221_v23  ;;  %v6241_v23 = vld [vmem:[%s8071_s20 + $0x64] sm:$0xf0] }
 0x7d2   : > { %v3635_v51 = vadd.f32 %v6508_v27, %v3630_v28  ;;  %v4008_v27 = vld [vmem:[%s1318_s15] sm:$0x1]  ;;  %v4018_v28 = vunpack.c.l.b16 %v4012_v25  ;;  %v5926_v25 = vor.u32 %v6241_v23, %v5925_v11  ;;  %s4464_s15 = sshll.u32 %s7898_s7, 4  ;;  %s4465_s15 = int_to_ptr.vmem [resolvable:$true] %s4464_s15 }
 0x7d4   : > { %v3636_v31 = vmax.f32 %v3635_v51, 0.0  ;;  %v4067_v51 = vpack.c.bf16 %v4008_v27, %v4008_v27  ;;  %v4020_v30 = vpack.c.b16 %v4018_v28, %v4018_v28 }
 0x7d5   : > { %v3615_v32 = vpop.f32.mrf.mxu2  ;;  %4139 = vmatpush.bf16.msra.mxu2 %v6220_v24  ;;  %v6240_v24 = vld [vmem:[%s8071_s20 + $0x64] sm:$0xf] }
 0x7d6   : > { %v3637_v43 = vpack.c.bf16 %v3636_v31, %v3636_v31  ;;  %v4051_v31 = vsel %vm3644_vm9, %v4045_v29, 0  ;;  %v4043_v32 = vld [vmem:[%s1315_s24] sm:$0x1]  ;;  %v6239_v29 = vld [vmem:[%s8071_s20 + $0x54] sm:$0xf0]  ;;  %s4466_s24 = sshll.u32 %s4462_s1, 4  ;;  %s4467_s24 = int_to_ptr.hbm [resolvable:$true] %s4466_s24 }
 0x7d7   : > { %s7041_s2 = sshra.s32 %s4467_s24, 4  ;;  %s7042_s2 = int_to_ptr.hbm [resolvable:$true] %s7041_s2 }
 0x7d8   : > { %v3648_v34 = vand.u32 %v3646_v33, %v3637_v43  ;;  %v4027_v33 = vsel %vm3643_vm8, %v4020_v30, 0  ;;  %v4044_v43 = vpack.c.bf16 %v4043_v32, %v4043_v32  ;;  %v6238_v30 = vld [vmem:[%s8071_s20 + $0x54] sm:$0xf]  ;;  %v5919_v32 = vld [vmem:[%s8071_s20 + $0x58] sm:$0xf0]  ;;  %p7048_p11 = scmp.lt.s32.totalorder %s7042_s2, %s7353_s3 }
 0x7da   : > { %3657 = vmatpush.bf16.msra.mxu0 %v3648_v34  ;;  %v6219_v34 = vld [vmem:[%s8068_s26] sm:$0xff] }
 0x7dd   : > { %5698 = vmatmul.msk.bf16.vlgmr.msra.gmra.mxu0 %vm3639_vm10, %v3638_v35  ;;  %v3730_v35 = vld [vmem:[#allocation20] sm:$0x1] }
 0x7de   : > { %3856 = vmatpush.bf16.msrb.mxu0 %v6209_v15 }
 0x7e2   : > { %3857 = vmatpush.bf16.msrb.mxu0 %v6208_v42 }
 0x7e6   : > { %3858 = vmatpush.bf16.msrb.mxu0 %v6207_v46  ;;  %v3970_v46 = vld [vmem:[#allocation16] sm:$0x1] }
 0x7ea   : > { %3859 = vmatpush.bf16.msrb.mxu0 %v6206_v53 }
 0x7ee   : > { %3860 = vmatpush.bf16.msrb.mxu0 %v6205_v55 }
 0x7f2   : > { %3861 = vmatpush.bf16.msrb.mxu0 %v6204_v19 }
 0x7f6   : > { %4035 = vmatpush.bf16.msra.mxu0 %v4027_v33  ;;  %v5922_v33 = vor.u32 %v6238_v30, %v5919_v32 }
 0x7fa   : > { %4036 = vmatpush.bf16.msra.mxu0 %v6219_v34  ;;  %v6237_v34 = vld [vmem:[%s8071_s20 + $0x44] sm:$0xf0] }
 0x85a   : > { %v3659_v48 = vpop.f32.mrf.mxu0 }
 0x85b   : > { %v3663_v26 = vpack.c.bf16 %v3659_v48, %v3659_v48 }
 0x85d   : > { %5723 = vmatmul.msk.bf16.vlgmr.msrb.gmra.mxu1 %vm3712_vm11, %v3663_v26 }
 0x85e   : > { %4060 = vmatpush.bf16.msrb.mxu1 %v4051_v31 }
 0x862   : > { %v3661_v49 = vpop.f32.mrf.mxu0 }
 0x86d   : > { %5827 = vmatmul.msk.bf16.vlgmr.msra.gmra.mxu1 %vm3946_vm12, %v3936_v52 }
 0x87d   : > { %5842 = vmatmul.msk.bf16.vlgmr.msrb.gmra.mxu1 %vm4046_vm14, %v4044_v43  ;;  %v5909_v43 = vld [vmem:[%s8071_s20 + $0x40] sm:$0xf] }
 0x8da   : > { %v3725_v4 = vpop.f32.mrf.mxu1 }
 0x8db   : > { %v3729_v5 = vpack.c.bf16 %v3725_v4, %v3725_v4  ;;  %v6242_v4 = vld [vmem:[%s8071_s20 + $0x74] sm:$0xf] }
 0x8dd   : > { %v3810_v6 = vunpack.c.l.b16 %v3729_v5  ;;  %5748 = vmatmul.msk.bf16.vlgmr.msrb.gmra.mxu3 %vm3712_vm11, %v3729_v5  ;;  %v5934_v5 = vor.u32 %v6243_v3, %v5933_v2  ;;  %v6254_v2 = vld [vmem:[%s8036_s5 + $0x50] sm:$0xff] }
 0x8df   : > { %v3811_v7 = vpack.c.b16 %v3810_v6, %v3810_v6  ;;  %v5935_v6 = vld [vmem:[%s8071_s20 + $0x78] sm:$0xf0]  ;;  %4288 = vmatpush.bf16.msrb.mxu3 %v5934_v5  ;;  %v6248_v5 = vld [vmem:[%s8036_s5 + $0x20] sm:$0xff] }
 0x8e1   : > { %v3813_v8 = vshrl.u32 %v3811_v7, 16  ;;  %v3881_v9 = vrot.slane %v3811_v7, 1  ;;  %v5938_v7 = vor.u32 %v6242_v4, %v5935_v6  ;;  %v6249_v4 = vld [vmem:[%s8036_s5 + $0x28] sm:$0xff] }
 0x8e2   : > { %v3727_v12 = vpop.f32.mrf.mxu1 }
 0x8e3   : > { %5785 = vmatmul.msk.bf16.vlgmr.msrb.gmra.mxu0 %vm3712_vm11, %v3813_v8  ;;  %5822 = vmatmul.msk.bf16.vlgmr.msrb.gmra.mxu2 %vm3712_vm11, %v3881_v9 }
 0x8e4   : > { %4301 = vmatpush.bf16.msrb.mxu0 %v5938_v7  ;;  %4289 = vmatpush.bf16.msrb.mxu3 %v5926_v25  ;;  %v6246_v25 = vld [vmem:[%s8036_s5 + $0x10] sm:$0xff] }
 0x8ea   : > { %v3959_v16 = vpop.f32.mrf.mxu1 }
 0x8eb   : > { %v3960_v17 = vadd.f32 %v3959_v16, %v3939_v14 }
 0x8ed   : > { %v3963_v18 = vmax.f32 %v3960_v17, 0.0 }
 0x8ef   : > { %v3964_v20 = vpack.c.bf16 %v3963_v18, %v3963_v18 }
 0x8f1   : > { %5836 = vmatmul.msk.bf16.vlgmr.msra.gmra.mxu3 %vm3986_vm13, %v3964_v20 }
 0x8f2   : > { %v3961_v21 = vpop.f32.mrf.mxu1 }
 0x8f3   : > { %4140 = vmatmul.bf16.vlgmr.msra.gmra.mxu2 %v4067_v51  ;;  %v5917_v51 = vld [vmem:[%s8071_s20 + $0x50] sm:$0xf] }
 0x8f4   : > { %v5918_v31 = vor.u32 %v6239_v29, %v5917_v51  ;;  %v6244_v51 = vld [vmem:[%s8036_s5] sm:$0xff]  ;;  %v4202_v29 = vld [vmem:[#allocation26] sm:$0x3] }
 0x8f6   : > { %4290 = vmatpush.bf16.msrb.mxu3 %v5918_v31 }
 0x8fa   : > { %v4062_v52 = vpop.f32.mrf.mxu1 }
 0x902   : > { %v4064_v53 = vpop.f32.mrf.mxu1 }
 0x960   : > { %v3791_v37 = vpop.f32.mrf.mxu3  ;;  %v3863_v38 = vpop.f32.mrf.mxu0 }
 0x961   : > { %v3795_v39 = vadd.f32 %v3791_v37, %v3730_v35  ;;  %v6236_v35 = vld [vmem:[%s8071_s20 + $0x44] sm:$0xf]  ;;  %v5910_v37 = vor.u32 %v6237_v34, %v5909_v43 }
 0x963   : > { %v3867_v15 = vadd.f32 %v3863_v38, %v3795_v39  ;;  %v5911_v38 = vld [vmem:[%s8071_s20 + $0x48] sm:$0xf0]  ;;  %4291 = vmatpush.bf16.msrb.mxu3 %v5910_v37 }
 0x964   : > { %v5914_v39 = vor.u32 %v6236_v35, %v5911_v38 }
 0x966   : > { %v3930_v40 = vpop.f32.mrf.mxu2 }
 0x967   : > { %v3934_v41 = vadd.f32 %v3930_v40, %v3867_v15  ;;  %v5901_v15 = vld [vmem:[%s8071_s20 + $0x30] sm:$0xf]  ;;  %v6235_v40 = vld [vmem:[%s8071_s20 + $0x34] sm:$0xf0] }
 0x968   : > { %v3793_v42 = vpop.f32.mrf.mxu3  ;;  %v3865_v44 = vpop.f32.mrf.mxu0 }
 0x969   : > { %v5902_v42 = vor.u32 %v6235_v40, %v5901_v15  ;;  %v5903_v44 = vld [vmem:[%s8071_s20 + $0x38] sm:$0xf0] }
 0x96b   : > { %4292 = vmatpush.bf16.msrb.mxu3 %v5902_v42 }
 0x96e   : > { %v3932_v45 = vpop.f32.mrf.mxu2 }
 0x974   : > { %v4002_v47 = vpop.f32.mrf.mxu3 }
 0x975   : > { %v4003_v48 = vadd.f32 %v4002_v47, %v3970_v46  ;;  %v5893_v46 = vld [vmem:[%s8071_s20 + $0x20] sm:$0xf]  ;;  %v6233_v47 = vld [vmem:[%s8071_s20 + $0x24] sm:$0xf0] }
 0x976   : > { %v4141_v13 = vpop.f32.mrf.mxu2 }
 0x977   : > { %v4007_v26 = vmul.f32 %v4006_v60, %v4003_v48  ;;  %v6232_v60 = vld [vmem:[%s8071_s20 + $0x24] sm:$0xf]  ;;  %v5894_v48 = vor.u32 %v6233_v47, %v5893_v46 }
 0x979   : > { %v4009_v49 = vpack.c.bf16 %v4007_v26, %v4007_v26  ;;  %v5895_v26 = vld [vmem:[%s8071_s20 + $0x28] sm:$0xf0]  ;;  %4293 = vmatpush.bf16.msrb.mxu3 %v5894_v48 }
 0x97b   : > { %5841 = vmatmul.msk.bf16.vlgmr.msra.gmra.mxu0 %vm4022_vm15, %v4009_v49  ;;  %v5898_v49 = vor.u32 %v6232_v60, %v5895_v26 }
 0x97c   : > { %v4004_v50 = vpop.f32.mrf.mxu3 }
 0x97d   : > { %v5885_v50 = vld [vmem:[%s8071_s20 + $0x10] sm:$0xf] }
 0x97e   : > { %v4143_v54 = vpop.f32.mrf.mxu2 }
 0x97f   : > { %v5887_v54 = vld [vmem:[%s8071_s20 + $0x18] sm:$0xf0] }
 0x9f8   : > { %v4038_v36 = vpop.f32.mrf.mxu0 }
 0x9f9   : > { %v4042_v55 = vadd.f32 %v4038_v36, %v3934_v41  ;;  %v6234_v41 = vld [vmem:[%s8071_s20 + $0x34] sm:$0xf] }
 0x9fa   : > { %v5906_v45 = vor.u32 %v6234_v41, %v5903_v44 }
 0x9fb   : > { %v4066_v56 = vadd.f32 %v4062_v52, %v4042_v55  ;;  %v6231_v52 = vld [vmem:[%s8071_s20 + $0x14] sm:$0xf0]  ;;  %v5877_v55 = vld [vmem:[%s8071_s20] sm:$0xf] }
 0x9fc   : > { %v5886_v53 = vor.u32 %v6231_v52, %v5885_v50 }
 0x9fd   : > { %v4145_v19 = vadd.f32 %v4141_v13, %v4066_v56  ;;  %v6230_v13 = vld [vmem:[%s8071_s20 + $0x14] sm:$0xf]  ;;  %v6229_v56 = vld [vmem:[%s8071_s20 + $0x4] sm:$0xf0] }
 0x9fe   : > { %v5890_v36 = vor.u32 %v6230_v13, %v5887_v54  ;;  %4294 = vmatpush.bf16.msrb.mxu3 %v5886_v53 }
 0x9ff   : > { %6509 = vtanh.f32 %v4145_v19  ;;  %v6228_v19 = vld [vmem:[%s8071_s20 + $0x4] sm:$0xf] }
 0xa00   : > { %v4040_v57 = vpop.f32.mrf.mxu0  ;;  %6511 = vrcp.f32 %v7184_v0  ;;  %v6250_v0 = vld [vmem:[%s8036_s5 + $0x30] sm:$0xff] }
 0xa01   : > { %v5878_v57 = vor.u32 %v6229_v56, %v5877_v55 }
 0xa03   : > { %4295 = vmatpush.bf16.msrb.mxu3 %v5878_v57 }
 0xa05   : > { %v6510_v58 = vpop.eup %6509 }
 0xa06   : > { %v4147_v61 = vsub.f32 %v6510_v58, %v4008_v27  ;;  %v6512_v8 = vpop.eup %6511  ;;  %v5879_v58 = vld [vmem:[%s8071_s20 + $0x8] sm:$0xf0] }
 0xa07   : > { %v4156_v9 = vmul.f32 128.0, %v6512_v8  ;;  %vm4160_vm0 = vweird.f32 %v6512_v8 }
 0xa08   : > { %v4149_v62 = vmul.f32 %v4148_v59, %v4147_v61  ;;  %v5882_v59 = vor.u32 %v6228_v19, %v5879_v58  ;;  %v6251_v61 = vld [vmem:[%s8036_s5 + $0x38] sm:$0xff] }
 0xa09   : > { %v4157_v12 = vsub.f32 1.0, %v4156_v9  ;;  %4418 = vmatpush.bf16.msra.mxu1 %v6251_v61 }
 0xa0a   : > { %v4150_v63 = vadd.f32 %v4149_v62, %v4008_v27  ;;  %v5927_v27 = vld [vmem:[%s8071_s20 + $0x68] sm:$0xf0] }
 0xa0b   : > { %v4158_v14 = vmul.f32 %v6512_v8, %v4157_v12  ;;  %v5930_v28 = vor.u32 %v6240_v24, %v5927_v27  ;;  %v6253_v24 = vld [vmem:[%s8036_s5 + $0x48] sm:$0xff]  ;;  %v6252_v27 = vld [vmem:[%s8036_s5 + $0x40] sm:$0xff] }
 0xa0c   : > { %v4152_v1 = vsel %vm3643_vm8, %v4150_v63, 0.0  ;;  %4151 = vst [vmem:[%s7898_s7] sm:$0x1] %v4150_v63 }
 0xa0d   : > { %4153 = vadd.xlane.f32.xlu0 %v4152_v1  ;;  %v4159_v16 = vadd.f32 %v6512_v8, %v4158_v14  ;;  %4302 = vmatpush.bf16.msrb.mxu0 %v5930_v28  ;;  %v6245_v28 = vld [vmem:[%s8036_s5 + $0x8] sm:$0xff] }
 0xa0e   : > { %4419 = vmatpush.bf16.msra.mxu1 %v6250_v0 }
 0xa0f   : > { %v7905_v17 = vsel %vm4160_vm0, %v6512_v8, %v4159_v16  ;;  %v6247_v8 = vld [vmem:[%s8036_s5 + $0x18] sm:$0xff] }
 0xa11   : > { %4303 = vmatpush.bf16.msrb.mxu0 %v5922_v33  ;;  %v4284_v33 = vperm.slane %v4202_v29, 0 }
 0xa12   : > { %4420 = vmatpush.bf16.msra.mxu1 %v6249_v4 }
 0xa15   : > { %4304 = vmatpush.bf16.msrb.mxu0 %v5914_v39 }
 0xa16   : > { %4421 = vmatpush.bf16.msra.mxu1 %v6248_v5 }
 0xa19   : > { %4305 = vmatpush.bf16.msrb.mxu0 %v5906_v45 }
 0xa1a   : > { %4422 = vmatpush.bf16.msra.mxu1 %v6247_v8 }
 0xa1d   : > { %4306 = vmatpush.bf16.msrb.mxu0 %v5898_v49 }
 0xa1e   : > { %4423 = vmatpush.bf16.msra.mxu1 %v6246_v25 }
 0xa21   : > { %4307 = vmatpush.bf16.msrb.mxu0 %v5890_v36 }
 0xa22   : > { %4424 = vmatpush.bf16.msra.mxu1 %v6245_v28 }
 0xa25   : > { %4308 = vmatpush.bf16.msrb.mxu0 %v5882_v59 }
 0xa26   : > { %4425 = vmatpush.bf16.msra.mxu1 %v6244_v51 }
 0xa80   : > { %v4154_v18 = vpop.xlane.xlu0 %4153 }
 0xa81   : > { %v4162_v20 = vmul.f32 %v7905_v17, %v4154_v18 }
 0xa83   : > { %v7908_v21 = vsub.f32 %v4150_v63, %v4162_v20  ;;  %v6255_v63 = vld [vmem:[%s8036_s5 + $0x58] sm:$0xff]  ;;  %s7043_s5 = scalar_lea.hbm %s7042_s2, 1 }
 0xa84   : > { %4435 = vmatpush.bf16.msrb.mxu2 %v6255_v63  ;;  %p7044_p9 = scmp.ne.s32.totalorder %s7042_s2, %s7043_s5  ;;  %p7049_p13 = scmp.lt.s32.totalorder %s7047_s6, %s7043_s5 }
 0xa85   : > { %v4164_v10 = vmul.f32 %v7908_v21, %v7908_v21 }
 0xa86   : > { %p7045_p12 = pnand %p7044_p9, %p7398_p5  ;;  %p7050_p1 = por %p7049_p13, %p7048_p11 }
 0xa87   : > { %v4165_v22 = vsel %vm3643_vm8, %v4164_v10, 0.0  ;;  %v4183_v10 = vld [vmem:[#allocation25] sm:$0x1] }
 0xa88   : > { %4166 = vadd.xlane.f32.xlu0 %v4165_v22  ;;  %4436 = vmatpush.bf16.msrb.mxu2 %v6254_v2  ;;  %p7046_p0 = pneg %p7045_p12 }
 0xa8a   : > { %p7051_p3 = pnand %p7050_p1, %p7046_p0 }
 0xa8c   : > { %4437 = vmatpush.bf16.msrb.mxu2 %v6253_v24 }
 0xa90   : > { %4438 = vmatpush.bf16.msrb.mxu2 %v6252_v27 }
 0xafb   : > { %v4167_v62 = vpop.xlane.xlu0 %4166 }
 0xafc   : > { %v4168_v1 = vmul.f32 %v4167_v62, %v7905_v17  ;;  %v4181_v17 = vld [vmem:[#allocation23] sm:$0x1] }
 0xafe   : > { %v4169_v3 = vadd.f32 1e-05, %v4168_v1 }
 0xb00   : > { %6513 = vrsqrt.f32 %v4169_v3  ;;  %vm4176_vm2 = vweird.f32 %v4169_v3 }
 0xb06   : > { %v6514_v6 = vpop.eup %6513 }
 0xb07   : > { %v4171_v7 = vmul.f32 %v6514_v6, %v4169_v3  ;;  %vm4177_vm1 = vweird.f32 %v6514_v6 }
 0xb08   : > { %vm4178_vm3 = vmor %vm4176_vm2, %vm4177_vm1 }
 0xb09   : > { %v4172_v9 = vmul.f32 %v6514_v6, %v4171_v7 }
 0xb0b   : > { %v4173_v12 = vmul.f32 0.5, %v4172_v9 }
 0xb0d   : > { %v4174_v14 = vsub.f32 1.5, %v4173_v12 }
 0xb0f   : > { %v4175_v16 = vmul.f32 %v6514_v6, %v4174_v14 }
 0xb11   : > { %v4179_v18 = vsel %vm4178_vm3, %v6514_v6, %v4175_v16 }
 0xb12   : > { %v4180_v20 = vmul.f32 %v4179_v18, %v7908_v21  ;;  %v4285_v21 = vperm.slane %v4202_v29, 1 }
 0xb14   : > { %v4182_v22 = vmul.f32 %v4181_v17, %v4180_v20 }
 0xb16   : > { %v4184_v11 = vadd.f32 %v4183_v10, %v4182_v22 }
 0xb18   : > { %v4185_v23 = vpack.c.bf16 %v4184_v11, %v4184_v11 }
 0xb1a   : > { %4296 = vmatmul.bf16.vlgmr.msrb.gmra.mxu3 %v4185_v23  ;;  %4309 = vmatmul.bf16.vlgmr.msrb.gmra.mxu0 %v4185_v23 }
 0xb97   : > { %v4310_v30 = vpop.f32.mrf.mxu0 }
 0xb98   : > { %v4311_v31 = vadd.f32 %v4310_v30, %v4285_v21 }
 0xb9a   : > { %v4315_v32 = vmax.f32 %v4311_v31, 0.0 }
 0xb9c   : > { %v4317_v43 = vpack.c.bf16 %v4315_v32, %v4315_v32 }
 0xb9d   : > { %v4297_v34 = vpop.f32.mrf.mxu3 }
 0xb9e   : > { %v4298_v35 = vadd.f32 %v4297_v34, %v4284_v33  ;;  %5987 = vmatmul.msk.bf16.vlgmr.msrb.gmra.mxu2 %vm2199_vm5, %v4317_v43 }
 0xb9f   : > { %v4312_v37 = vpop.f32.mrf.mxu0 }
 0xba0   : > { %v4314_v38 = vmax.f32 %v4298_v35, 0.0 }
 0xba2   : > { %v4316_v39 = vpack.c.bf16 %v4314_v38, %v4314_v38 }
 0xba4   : > { %4426 = vmatmul.bf16.vlgmr.msra.gmra.mxu1 %v4316_v39 }
 0xba5   : > { %v4299_v15 = vpop.f32.mrf.mxu3 }
 0xba6   : > { %7054 = shalt.err (!%p7051_p3)
}
 0xba7   : > { %s8073_s0 = sld [smem:[#allocation61_spill]]  ;;  %v4342_v40 = vld [vmem:[#allocation28] sm:$0x1]  ;;  %v4444_v45 = vlaneseq }
 0xba8   : > { %6325 = dma.vmem_to_hbm [thread:$0]  (%p7398_p5), %s4465_s15, 16, %s4467_s24, %s4451_s14  }
 0xba9   : > { %v4445_v47 = vand.u32 127, %v4444_v45 }
 0xbab   : > { %vm4446_vm4 = vcmp.lt.s32.totalorder %v4445_v47, 3 }
 0xbad   : > { %s1321_s5 = scalar_lea.vmem %s8073_s0, %s7645_s16 }
 0xc21   : > { %v4427_v41 = vpop.f32.mrf.mxu1  ;;  %v4440_v42 = vpop.f32.mrf.mxu2 }
 0xc22   : > { %v4428_v44 = vadd.f32 %v4427_v41, %v4342_v40 }
 0xc24   : > { %v4441_v46 = vadd.f32 %v4440_v42, %v4428_v44 }
 0xc26   : > { %6515 = vtanh.f32 %v4441_v46 }
 0xc29   : > { %v4429_v60 = vpop.f32.mrf.mxu1  ;;  %v4442_v48 = vpop.f32.mrf.mxu2 }
 0xc2c   : > { %v6516_v26 = vpop.eup %6515 }
 0xc2d   : > { %v4448_v49 = vsel %vm4446_vm4, %v6516_v26, %v4441_v46 }
 0xc2e   : > { %4449 = vst [vmem:[%s1321_s5] sm:$0x1] %v4448_v49 }
 0xc2f PF: > { %s8074_s2 = sld [smem:[#allocation64_spill]] }
 0xc30   : > { %s8075_s6 = sld [smem:[#allocation62_spill]] }
 0xc35   : > { %p6417_p5 = scmp.ge.s32.totalorder %s8074_s2, 2 }
 0xc36   : > { %s4481_s7 = sand.u32 1, %s8075_s6  }
 0xc37   : > { %p6380_p2 = pnand %p6417_p5, %p7402_p6  ;;  %s4482_s11 = scalar_lea.sflag [#allocation4], %s4481_s7 }
 0xc39   : > { %p6381_p4 = pneg %p6380_p2 }
 0xc3b   : > { %7108 = dma.done.wait (%p6381_p4), %s4482_s11, 16  }
 0xc3c   : > { %7110 = vsyncadd (%p6381_p4), %s4482_s11, 4294967280  ;;  %s8077_s15 = sld [smem:[#allocation65_spill]]  ;;  %s8080_s7 = smov %s7117_s10 }
 0xc3d   : > { %s8078_s1 = sld [smem:[#allocation63_spill]] }
 0xc3e   : > { %s8079_s11 = sld [smem:[#allocation66_spill]] }
 0xc42   : > { %p87_p7 = scmp.ge.s32.totalorder %s8077_s15, 4  }
 0xc43   : > { %s8081_s10 = smov %s8078_s1 }
 0xc44   :  { %89 = sbr.rel (!%p87_p7) target bundleno = 74 (0x4a), region = 328 }
 0xc49   :  { %4493 = vsyncpa [#allocation3], 1 }
 0xc4a   :  { %4495 = vsyncpa [#allocation3 + $0x1], 1 }
 0xc4b   :  { %4496 = vsyncpa [#allocation6], 1 }
 0xc4c   :  { %4497 = vsyncpa [#allocation9], 1 }
 0xc4d   :  { %4498 = vsyncpa [#allocation12], 1 }
 0xc4e   :  { %4499 = vsyncpa [#allocation15], 1 }
 0xc4f   :  { %4500 = vsyncpa [#allocation18], 1 }
 0xc50   :  { %4501 = vsyncpa [#allocation21], 1 }
 0xc51   :  { %4502 = vsyncpa [#allocation24], 1 }
 0xc52   :  { %4503 = vsyncpa [#allocation27], 1 }
 0xc53   :  { %4504 = vsyncpa [#allocation4], 1 }
 0xc54   :  { %4506 = vsyncpa [#allocation4 + $0x1], 1 }

</bundles_post_ra>
